<compile_context>
chip_gen: v5e
topology: v5e:2x2
jax: 0.10.0
libtpu: 0.0.40
codegen_flags: <defaults>
</compile_context>

<pallas_src>
import functools

import jax
import jax.numpy as jnp
from jax.experimental import pallas as pl
from jax.experimental.pallas import tpu as pltpu

LANE = 128


def _round_up(x, m):
    return (x + m - 1) // m * m


def _conv2block_kernel(x_ref, w1_ref, s1_ref, b1_ref, w2_ref, s2_ref, b2_ref,
                       o_ref, y1_ref, y2_ref, *, KH, KW, W, H1, H2, Hh, Wp):
    """Fused conv-bn-relu x2 + 2x2 maxpool for one image (channels padded to 128 lanes).

    x_ref : (1, (H+KH-1)*W, Cip) f32  zero-padded NHWC image, spatially flattened
                                      (row stride = W).
    w1_ref: (KH*KW*Cip, Cp)      bf16 conv1 weights in im2col layout.
    w2_ref: (KH*KW*Cp,  Cp)      bf16 conv2 weights in im2col layout.
    s*,b* : (1, Cp)              f32  folded eval-mode BN scale / bias.
    o_ref : (1, Hh, Wp, Cp)           pooled output (cols >= Wh are junk, sliced in wrapper).
    y1_ref: ((H1+KH-1)*W, Cp)    f32  conv1 activations (flat, + zeroed halo tail).
    y2_ref: (H2*W, Cp)           f32  conv2 activations (flat).
    """
    Cp = w1_ref.shape[-1]
    s1 = s1_ref[...]
    b1 = b1_ref[...]
    s2 = s2_ref[...]
    b2 = b2_ref[...]

    # ---- conv1 + BN + ReLU: lane-concat the KH*KW shifted taps into one
    # im2col slab -> ONE deep-contraction bf16 MXU matmul, f32 accumulation.
    taps1 = [x_ref[0, pl.ds(kh * W + kw, H1 * W), :].astype(jnp.bfloat16)
             for kh in range(KH) for kw in range(KW)]
    patch1 = jnp.concatenate(taps1, axis=-1)              # (H1*W, KH*KW*Cip) bf16
    acc1 = jnp.dot(patch1, w1_ref[...], preferred_element_type=jnp.float32)
    y1_ref[pl.ds(0, H1 * W), :] = jnp.maximum(acc1 * s1 + b1, 0.0)
    # Zero the halo tail so conv2's over-reads (which only feed the discarded
    # right-edge "wrapped" columns) are deterministic.
    tail = y1_ref.shape[0] - H1 * W
    y1_ref[pl.ds(H1 * W, tail), :] = jnp.zeros((tail, Cp), jnp.float32)

    # ---- conv2 + BN + ReLU (same single-dot structure) ----------------------
    taps2 = [y1_ref[pl.ds(kh * W + kw, H2 * W), :].astype(jnp.bfloat16)
             for kh in range(KH) for kw in range(KW)]
    patch2 = jnp.concatenate(taps2, axis=-1)              # (H2*W, KH*KW*Cp) bf16
    acc2 = jnp.dot(patch2, w2_ref[...], preferred_element_type=jnp.float32)
    y2_ref[...] = jnp.maximum(acc2 * s2 + b2, 0.0)

    # ---- 2x2 max-pool, stride 2 ---------------------------------------------
    # Horizontal pairing via strided (stride-2) sublane loads on the flat
    # VMEM-resident plane; vertical pairing via Wp-aligned slices.  With
    # Wp = W//2 (a multiple of 8 here) every slice is tile-aligned and every
    # store below is a full dense (Wp, 128) tile -- no masked stores.
    ev = y2_ref[pl.ds(0, H2 * Wp, 2), :]                  # even cols; row = h2*Wp + j
    od = y2_ref[pl.ds(1, H2 * Wp, 2), :]                  # odd cols
    hm = jnp.maximum(ev, od)                              # (H2*Wp, Cp)
    for i in range(Hh):                                   # tiny static loop
        top = hm[(2 * i) * Wp:(2 * i + 1) * Wp, :]
        bot = hm[(2 * i + 1) * Wp:(2 * i + 2) * Wp, :]
        o_ref[0, i] = jnp.maximum(top, bot).astype(o_ref.dtype)


def fold_bn(conv_bias, gamma, beta, running_mean, running_var, eps, pad_to):
    # eval-mode BN after conv:  y = (conv(x)+b - rm)/sqrt(rv+eps)*g + beta
    #                             = conv(x)*s + ((b - rm)*s + beta)
    s = gamma / jnp.sqrt(running_var + eps)
    b = (conv_bias - running_mean) * s + beta
    pad = pad_to - s.shape[0]
    s = jnp.pad(s, (0, pad))           # padded channels: scale 0, bias 0 -> output 0
    b = jnp.pad(b, (0, pad))
    return (s.reshape(1, -1).astype(jnp.float32),
            b.reshape(1, -1).astype(jnp.float32))


def conv2block_forward(x_nchw, p, eps=1e-5):
    N, Cin, H, W = x_nchw.shape
    KH, KW, _, C = p["w1"].shape                     # HWIO
    H1, W1 = H - KH + 1, W - KW + 1                  # conv1 out (valid, stride 1)
    H2, W2 = H1 - KH + 1, W1 - KW + 1                # conv2 out
    Hh, Wh = H2 // 2, W2 // 2                        # pooled out
    Wp = W // 2

    # Geometry assumptions of the flat-slab / even-odd-column tricks.
    assert W % 2 == 0, "flat-slab pool pairing requires even W"
    assert H1 >= KH and W1 >= KW, "image too small for two valid convs"
    assert H2 >= 2 and W2 >= 2, "conv2 output too small for a 2x2 pool"

    Cip = _round_up(Cin, LANE)                       # lane-dense padded channels
    Cp = _round_up(C, LANE)

    # NCHW -> NHWC, pad channels to 128 lanes, pad KH-1 zero rows at the
    # bottom, flatten the spatial plane (rows x channels, row stride = W).
    x = jnp.transpose(x_nchw, (0, 2, 3, 1))
    x = jnp.pad(x, ((0, 0), (0, KH - 1), (0, 0), (0, Cip - Cin)))
    x_flat = x.reshape(N, (H + KH - 1) * W, Cip)

    # Pad weights to lane-dense channels (zero rows/cols contribute nothing),
    # reshape to im2col layout, pre-cast to bf16 (MXU operands only).
    w1 = jnp.pad(p["w1"], ((0, 0), (0, 0), (0, Cip - Cin), (0, Cp - C)))
    w1 = w1.reshape(KH * KW * Cip, Cp).astype(jnp.bfloat16)
    w2 = jnp.pad(p["w2"], ((0, 0), (0, 0), (0, Cp - C), (0, Cp - C)))
    w2 = w2.reshape(KH * KW * Cp, Cp).astype(jnp.bfloat16)

    s1, b1 = fold_bn(p["b1"], p["g1"], p["beta1"], p["rm1"], p["rv1"], eps, Cp)
    s2, b2 = fold_bn(p["b2"], p["g2"], p["beta2"], p["rm2"], p["rv2"], eps, Cp)

    xr = (H + KH - 1) * W                            # flattened input rows
    y1r = (H1 + KH - 1) * W                          # conv1 scratch rows

    kernel = functools.partial(_conv2block_kernel, KH=KH, KW=KW, W=W,
                               H1=H1, H2=H2, Hh=Hh, Wp=Wp)
    out = pl.pallas_call(
        kernel,
        out_shape=jax.ShapeDtypeStruct((N, Hh, Wp, Cp), x_nchw.dtype),
        grid=(N,),
        in_specs=[
            pl.BlockSpec((1, xr, Cip), lambda n: (n, 0, 0)),
            pl.BlockSpec((KH * KW * Cip, Cp), lambda n: (0, 0)),
            pl.BlockSpec((1, Cp), lambda n: (0, 0)),
            pl.BlockSpec((1, Cp), lambda n: (0, 0)),
            pl.BlockSpec((KH * KW * Cp, Cp), lambda n: (0, 0)),
            pl.BlockSpec((1, Cp), lambda n: (0, 0)),
            pl.BlockSpec((1, Cp), lambda n: (0, 0)),
        ],
        out_specs=pl.BlockSpec((1, Hh, Wp, Cp), lambda n: (n, 0, 0, 0)),
        scratch_shapes=[pltpu.VMEM((y1r, Cp), jnp.float32),
                        pltpu.VMEM((H2 * W, Cp), jnp.float32)],
        compiler_params=pltpu.CompilerParams(
            dimension_semantics=("parallel",),       # N=2 -> both v7x TCs busy
            vmem_limit_bytes=32 * 1024 * 1024),
    )(x_flat, w1, s1, b1, w2, s2, b2)

    # Drop junk right-edge pool columns and padded channels; NHWC -> NCHW.
    out = out[:, :, :Wh, :C]
    return jnp.transpose(out, (0, 3, 1, 2))


def reference_forward(x_nchw, p, eps=1e-5):
    # Pure-JAX f32 reference (for correctness check only).
    x = jnp.transpose(x_nchw, (0, 2, 3, 1))

    def fold(bias, g, beta, rm, rv):
        s = g / jnp.sqrt(rv + eps)
        b = (bias - rm) * s + beta
        return s.reshape(1, 1, 1, -1), b.reshape(1, 1, 1, -1)

    def conv_block(x, w, s, b):
        y = jax.lax.conv_general_dilated(
            x, w, window_strides=(1, 1), padding="VALID",
            dimension_numbers=("NHWC", "HWIO", "NHWC"),
            precision=jax.lax.Precision.HIGHEST)
        return jnp.maximum(y * s + b, 0.0)

    s1, b1 = fold(p["b1"], p["g1"], p["beta1"], p["rm1"], p["rv1"])
    s2, b2 = fold(p["b2"], p["g2"], p["beta2"], p["rm2"], p["rv2"])
    y = conv_block(x, p["w1"], s1, b1)
    y = conv_block(y, p["w2"], s2, b2)
    y = jax.lax.reduce_window(y, -jnp.inf, jax.lax.max,
                              (1, 2, 2, 1), (1, 2, 2, 1), "VALID")
    return jnp.transpose(y, (0, 3, 1, 2))


if __name__ == "__main__":
    N, Cin, H, W = 2, 4, 16, 16
    Cout, K = 8, 3

    key = jax.random.PRNGKey(0)
    ks = jax.random.split(key, 12)
    x = jax.random.normal(ks[0], (N, Cin, H, W), jnp.float32)

    def conv_w(k, cin, cout):
        # PyTorch Conv2d weight layout (Cout, Cin, KH, KW) -> HWIO
        w = 0.1 * jax.random.normal(k, (cout, cin, K, K), jnp.float32)
        return jnp.transpose(w, (2, 3, 1, 0))

    params = dict(
        w1=conv_w(ks[1], Cin, Cout),
        b1=0.1 * jax.random.normal(ks[2], (Cout,), jnp.float32),
        g1=1.0 + 0.1 * jax.random.normal(ks[3], (Cout,), jnp.float32),
        beta1=0.1 * jax.random.normal(ks[4], (Cout,), jnp.float32),
        rm1=0.1 * jax.random.normal(ks[5], (Cout,), jnp.float32),
        rv1=1.0 + 0.5 * jax.random.uniform(ks[6], (Cout,), jnp.float32),
        w2=conv_w(ks[7], Cout, Cout),
        b2=0.1 * jax.random.normal(ks[8], (Cout,), jnp.float32),
        g2=1.0 + 0.1 * jax.random.normal(ks[9], (Cout,), jnp.float32),
        beta2=0.1 * jax.random.normal(ks[10], (Cout,), jnp.float32),
        rm2=0.1 * jax.random.normal(ks[11], (Cout,), jnp.float32),
        rv2=jnp.ones((Cout,), jnp.float32),
    )

    out = jax.block_until_ready(conv2block_forward(x, params))
    ref = jax.block_until_ready(reference_forward(x, params))

    expected_hw = (H - 2 * (K - 1)) // 2             # 16 -> 14 -> 12 -> 6
    assert out.shape == (N, Cout, expected_hw, expected_hw), out.shape
    # Tolerance budgets for the bf16 MXU operands (f32 accumulation); measured
    # error at this size is well below this bound.
    assert jnp.allclose(out, ref, atol=2e-2, rtol=2e-2), \
        float(jnp.max(jnp.abs(out - ref)))
    print("KERNEL_OK")
</pallas_src>

<mosaic_0001>
module attributes {stable_mosaic.version = 11 : i64} {
  func.func @_conv2block_kernel(%arg0: i32, %arg1: memref<1x288x128xf32, #tpu.memory_space<vmem>>, %arg2: memref<1152x128xbf16, #tpu.memory_space<vmem>>, %arg3: memref<1x128xf32, #tpu.memory_space<vmem>>, %arg4: memref<1x128xf32, #tpu.memory_space<vmem>>, %arg5: memref<1152x128xbf16, #tpu.memory_space<vmem>>, %arg6: memref<1x128xf32, #tpu.memory_space<vmem>>, %arg7: memref<1x128xf32, #tpu.memory_space<vmem>>, %arg8: memref<1x6x8x128xf32, #tpu.memory_space<vmem>>, %arg9: memref<256x128xf32, #tpu.memory_space<vmem>>, %arg10: memref<192x128xf32, #tpu.memory_space<vmem>>) attributes {dimension_semantics = [#tpu.dimension_semantics<parallel>], iteration_bounds = array<i64: 2>, scalar_prefetch = 0 : i64, scratch_operands = 2 : i64, tpu.core_type = #tpu.core_type<tc>, window_params = [{transform_indices = @transform_0, window_bounds = array<i64: 1, 288, 128>}, {pipeline_mode = #tpu.pipeline_mode<synchronous>, transform_indices = @transform_1, window_bounds = array<i64: 1152, 128>}, {pipeline_mode = #tpu.pipeline_mode<synchronous>, transform_indices = @transform_2, window_bounds = array<i64: 1, 128>}, {pipeline_mode = #tpu.pipeline_mode<synchronous>, transform_indices = @transform_3, window_bounds = array<i64: 1, 128>}, {pipeline_mode = #tpu.pipeline_mode<synchronous>, transform_indices = @transform_4, window_bounds = array<i64: 1152, 128>}, {pipeline_mode = #tpu.pipeline_mode<synchronous>, transform_indices = @transform_5, window_bounds = array<i64: 1, 128>}, {pipeline_mode = #tpu.pipeline_mode<synchronous>, transform_indices = @transform_6, window_bounds = array<i64: 1, 128>}, {transform_indices = @transform_7, window_bounds = array<i64: 1, 6, 8, 128>}]} {
    %c0 = arith.constant 0 : index
    %c0_0 = arith.constant 0 : index
    %0 = vector.load %arg3[%c0, %c0_0] : memref<1x128xf32, #tpu.memory_space<vmem>>, vector<1x128xf32>
    %c0_1 = arith.constant 0 : index
    %c0_2 = arith.constant 0 : index
    %1 = vector.load %arg4[%c0_1, %c0_2] : memref<1x128xf32, #tpu.memory_space<vmem>>, vector<1x128xf32>
    %c0_3 = arith.constant 0 : index
    %c0_4 = arith.constant 0 : index
    %2 = vector.load %arg6[%c0_3, %c0_4] : memref<1x128xf32, #tpu.memory_space<vmem>>, vector<1x128xf32>
    %c0_5 = arith.constant 0 : index
    %c0_6 = arith.constant 0 : index
    %3 = vector.load %arg7[%c0_5, %c0_6] : memref<1x128xf32, #tpu.memory_space<vmem>>, vector<1x128xf32>
    %c0_7 = arith.constant 0 : index
    %c0_8 = arith.constant 0 : index
    %c0_9 = arith.constant 0 : index
    %4 = vector.load %arg1[%c0_7, %c0_8, %c0_9] : memref<1x288x128xf32, #tpu.memory_space<vmem>>, vector<1x224x128xf32>
    %5 = vector.shape_cast %4 : vector<1x224x128xf32> to vector<224x128xf32>
    %6 = arith.truncf %5 : vector<224x128xf32> to vector<224x128xbf16>
    %c0_10 = arith.constant 0 : index
    %c1 = arith.constant 1 : index
    %c0_11 = arith.constant 0 : index
    %7 = vector.load %arg1[%c0_10, %c1, %c0_11] : memref<1x288x128xf32, #tpu.memory_space<vmem>>, vector<1x224x128xf32>
    %8 = vector.shape_cast %7 : vector<1x224x128xf32> to vector<224x128xf32>
    %9 = arith.truncf %8 : vector<224x128xf32> to vector<224x128xbf16>
    %c0_12 = arith.constant 0 : index
    %c2 = arith.constant 2 : index
    %c0_13 = arith.constant 0 : index
    %10 = vector.load %arg1[%c0_12, %c2, %c0_13] : memref<1x288x128xf32, #tpu.memory_space<vmem>>, vector<1x224x128xf32>
    %11 = vector.shape_cast %10 : vector<1x224x128xf32> to vector<224x128xf32>
    %12 = arith.truncf %11 : vector<224x128xf32> to vector<224x128xbf16>
    %c0_14 = arith.constant 0 : index
    %c16 = arith.constant 16 : index
    %c0_15 = arith.constant 0 : index
    %13 = vector.load %arg1[%c0_14, %c16, %c0_15] : memref<1x288x128xf32, #tpu.memory_space<vmem>>, vector<1x224x128xf32>
    %14 = vector.shape_cast %13 : vector<1x224x128xf32> to vector<224x128xf32>
    %15 = arith.truncf %14 : vector<224x128xf32> to vector<224x128xbf16>
    %c0_16 = arith.constant 0 : index
    %c17 = arith.constant 17 : index
    %c0_17 = arith.constant 0 : index
    %16 = vector.load %arg1[%c0_16, %c17, %c0_17] : memref<1x288x128xf32, #tpu.memory_space<vmem>>, vector<1x224x128xf32>
    %17 = vector.shape_cast %16 : vector<1x224x128xf32> to vector<224x128xf32>
    %18 = arith.truncf %17 : vector<224x128xf32> to vector<224x128xbf16>
    %c0_18 = arith.constant 0 : index
    %c18 = arith.constant 18 : index
    %c0_19 = arith.constant 0 : index
    %19 = vector.load %arg1[%c0_18, %c18, %c0_19] : memref<1x288x128xf32, #tpu.memory_space<vmem>>, vector<1x224x128xf32>
    %20 = vector.shape_cast %19 : vector<1x224x128xf32> to vector<224x128xf32>
    %21 = arith.truncf %20 : vector<224x128xf32> to vector<224x128xbf16>
    %c0_20 = arith.constant 0 : index
    %c32 = arith.constant 32 : index
    %c0_21 = arith.constant 0 : index
    %22 = vector.load %arg1[%c0_20, %c32, %c0_21] : memref<1x288x128xf32, #tpu.memory_space<vmem>>, vector<1x224x128xf32>
    %23 = vector.shape_cast %22 : vector<1x224x128xf32> to vector<224x128xf32>
    %24 = arith.truncf %23 : vector<224x128xf32> to vector<224x128xbf16>
    %c0_22 = arith.constant 0 : index
    %c33 = arith.constant 33 : index
    %c0_23 = arith.constant 0 : index
    %25 = vector.load %arg1[%c0_22, %c33, %c0_23] : memref<1x288x128xf32, #tpu.memory_space<vmem>>, vector<1x224x128xf32>
    %26 = vector.shape_cast %25 : vector<1x224x128xf32> to vector<224x128xf32>
    %27 = arith.truncf %26 : vector<224x128xf32> to vector<224x128xbf16>
    %c0_24 = arith.constant 0 : index
    %c34 = arith.constant 34 : index
    %c0_25 = arith.constant 0 : index
    %28 = vector.load %arg1[%c0_24, %c34, %c0_25] : memref<1x288x128xf32, #tpu.memory_space<vmem>>, vector<1x224x128xf32>
    %29 = vector.shape_cast %28 : vector<1x224x128xf32> to vector<224x128xf32>
    %30 = arith.truncf %29 : vector<224x128xf32> to vector<224x128xbf16>
    %31 = tpu.concatenate %6, %9, %12, %15, %18, %21, %24, %27, %30 in 1 : vector<224x128xbf16>, vector<224x128xbf16>, vector<224x128xbf16>, vector<224x128xbf16>, vector<224x128xbf16>, vector<224x128xbf16>, vector<224x128xbf16>, vector<224x128xbf16>, vector<224x128xbf16> -> vector<224x1152xbf16>
    %c0_26 = arith.constant 0 : index
    %c0_27 = arith.constant 0 : index
    %32 = vector.load %arg2[%c0_26, %c0_27] : memref<1152x128xbf16, #tpu.memory_space<vmem>>, vector<1152x128xbf16>
    %cst = arith.constant dense<0.000000e+00> : vector<224x128xf32>
    %33 = tpu.matmul %31, %32, %cst {dimension_numbers = #tpu.dot_dimension_numbers<[1], [0], [0], [1], [0, 0, 1, 1], [], []>} : vector<224x1152xbf16>, vector<1152x128xbf16>, vector<224x128xf32> -> vector<224x128xf32>
    %34 = vector.broadcast %0 : vector<1x128xf32> to vector<224x128xf32>
    %35 = arith.mulf %33, %34 : vector<224x128xf32>
    %36 = vector.broadcast %1 : vector<1x128xf32> to vector<224x128xf32>
    %37 = arith.addf %35, %36 : vector<224x128xf32>
    %cst_28 = arith.constant 0.000000e+00 : f32
    %38 = vector.broadcast %cst_28 : f32 to vector<224x128xf32>
    %39 = arith.maximumf %37, %38 : vector<224x128xf32>
    %c0_29 = arith.constant 0 : index
    %c0_30 = arith.constant 0 : index
    %40 = vector.load %arg9[%c0_29, %c0_30] : memref<256x128xf32, #tpu.memory_space<vmem>>, vector<224x128xf32>
    tpu.vector_store %arg9[%c0_29, %c0_30], %39 {strides = array<i32>} : memref<256x128xf32, #tpu.memory_space<vmem>>, vector<224x128xf32>,
    %cst_31 = arith.constant 0.000000e+00 : f32
    %41 = vector.broadcast %cst_31 : f32 to vector<32x128xf32>
    %c224 = arith.constant 224 : index
    %c0_32 = arith.constant 0 : index
    %42 = vector.load %arg9[%c224, %c0_32] : memref<256x128xf32, #tpu.memory_space<vmem>>, vector<32x128xf32>
    tpu.vector_store %arg9[%c224, %c0_32], %41 {strides = array<i32>} : memref<256x128xf32, #tpu.memory_space<vmem>>, vector<32x128xf32>,
    %c0_33 = arith.constant 0 : index
    %c0_34 = arith.constant 0 : index
    %43 = vector.load %arg9[%c0_33, %c0_34] : memref<256x128xf32, #tpu.memory_space<vmem>>, vector<192x128xf32>
    %44 = arith.truncf %43 : vector<192x128xf32> to vector<192x128xbf16>
    %c1_35 = arith.constant 1 : index
    %c0_36 = arith.constant 0 : index
    %45 = vector.load %arg9[%c1_35, %c0_36] : memref<256x128xf32, #tpu.memory_space<vmem>>, vector<192x128xf32>
    %46 = arith.truncf %45 : vector<192x128xf32> to vector<192x128xbf16>
    %c2_37 = arith.constant 2 : index
    %c0_38 = arith.constant 0 : index
    %47 = vector.load %arg9[%c2_37, %c0_38] : memref<256x128xf32, #tpu.memory_space<vmem>>, vector<192x128xf32>
    %48 = arith.truncf %47 : vector<192x128xf32> to vector<192x128xbf16>
    %c16_39 = arith.constant 16 : index
    %c0_40 = arith.constant 0 : index
    %49 = vector.load %arg9[%c16_39, %c0_40] : memref<256x128xf32, #tpu.memory_space<vmem>>, vector<192x128xf32>
    %50 = arith.truncf %49 : vector<192x128xf32> to vector<192x128xbf16>
    %c17_41 = arith.constant 17 : index
    %c0_42 = arith.constant 0 : index
    %51 = vector.load %arg9[%c17_41, %c0_42] : memref<256x128xf32, #tpu.memory_space<vmem>>, vector<192x128xf32>
    %52 = arith.truncf %51 : vector<192x128xf32> to vector<192x128xbf16>
    %c18_43 = arith.constant 18 : index
    %c0_44 = arith.constant 0 : index
    %53 = vector.load %arg9[%c18_43, %c0_44] : memref<256x128xf32, #tpu.memory_space<vmem>>, vector<192x128xf32>
    %54 = arith.truncf %53 : vector<192x128xf32> to vector<192x128xbf16>
    %c32_45 = arith.constant 32 : index
    %c0_46 = arith.constant 0 : index
    %55 = vector.load %arg9[%c32_45, %c0_46] : memref<256x128xf32, #tpu.memory_space<vmem>>, vector<192x128xf32>
    %56 = arith.truncf %55 : vector<192x128xf32> to vector<192x128xbf16>
    %c33_47 = arith.constant 33 : index
    %c0_48 = arith.constant 0 : index
    %57 = vector.load %arg9[%c33_47, %c0_48] : memref<256x128xf32, #tpu.memory_space<vmem>>, vector<192x128xf32>
    %58 = arith.truncf %57 : vector<192x128xf32> to vector<192x128xbf16>
    %c34_49 = arith.constant 34 : index
    %c0_50 = arith.constant 0 : index
    %59 = vector.load %arg9[%c34_49, %c0_50] : memref<256x128xf32, #tpu.memory_space<vmem>>, vector<192x128xf32>
    %60 = arith.truncf %59 : vector<192x128xf32> to vector<192x128xbf16>
    %61 = tpu.concatenate %44, %46, %48, %50, %52, %54, %56, %58, %60 in 1 : vector<192x128xbf16>, vector<192x128xbf16>, vector<192x128xbf16>, vector<192x128xbf16>, vector<192x128xbf16>, vector<192x128xbf16>, vector<192x128xbf16>, vector<192x128xbf16>, vector<192x128xbf16> -> vector<192x1152xbf16>
    %c0_51 = arith.constant 0 : index
    %c0_52 = arith.constant 0 : index
    %62 = vector.load %arg5[%c0_51, %c0_52] : memref<1152x128xbf16, #tpu.memory_space<vmem>>, vector<1152x128xbf16>
    %cst_53 = arith.constant dense<0.000000e+00> : vector<192x128xf32>
    %63 = tpu.matmul %61, %62, %cst_53 {dimension_numbers = #tpu.dot_dimension_numbers<[1], [0], [0], [1], [0, 0, 1, 1], [], []>} : vector<192x1152xbf16>, vector<1152x128xbf16>, vector<192x128xf32> -> vector<192x128xf32>
    %64 = vector.broadcast %2 : vector<1x128xf32> to vector<192x128xf32>
    %65 = arith.mulf %63, %64 : vector<192x128xf32>
    %66 = vector.broadcast %3 : vector<1x128xf32> to vector<192x128xf32>
    %67 = arith.addf %65, %66 : vector<192x128xf32>
    %cst_54 = arith.constant 0.000000e+00 : f32
    %68 = vector.broadcast %cst_54 : f32 to vector<192x128xf32>
    %69 = arith.maximumf %67, %68 : vector<192x128xf32>
    %c0_55 = arith.constant 0 : index
    %c0_56 = arith.constant 0 : index
    %70 = vector.load %arg10[%c0_55, %c0_56] : memref<192x128xf32, #tpu.memory_space<vmem>>, vector<192x128xf32>
    tpu.vector_store %arg10[%c0_55, %c0_56], %69 {strides = array<i32>} : memref<192x128xf32, #tpu.memory_space<vmem>>, vector<192x128xf32>,
    %c0_57 = arith.constant 0 : index
    %c0_58 = arith.constant 0 : index
    %71 = tpu.strided_load %arg10[%c0_57, %c0_58] {strides = array<i32: 2, 1>} : memref<192x128xf32, #tpu.memory_space<vmem>>, vector<96x128xf32>
    %c1_59 = arith.constant 1 : index
    %c0_60 = arith.constant 0 : index
    %72 = tpu.strided_load %arg10[%c1_59, %c0_60] {strides = array<i32: 2, 1>} : memref<192x128xf32, #tpu.memory_space<vmem>>, vector<96x128xf32>
    %73 = arith.maximumf %71, %72 : vector<96x128xf32>
    %74 = vector.extract_strided_slice %73 {offsets = [0, 0], sizes = [8, 128], strides = [1, 1]} : vector<96x128xf32> to vector<8x128xf32>
    %75 = vector.extract_strided_slice %73 {offsets = [8, 0], sizes = [8, 128], strides = [1, 1]} : vector<96x128xf32> to vector<8x128xf32>
    %76 = arith.maximumf %74, %75 : vector<8x128xf32>
    %c0_61 = arith.constant 0 : index
    %c0_62 = arith.constant 0 : index
    %c0_63 = arith.constant 0 : index
    %c0_64 = arith.constant 0 : index
    %77 = vector.load %arg8[%c0_61, %c0_62, %c0_63, %c0_64] : memref<1x6x8x128xf32, #tpu.memory_space<vmem>>, vector<1x1x8x128xf32>
    %78 = vector.shape_cast %77 : vector<1x1x8x128xf32> to vector<8x128xf32>
    %79 = vector.shape_cast %76 : vector<8x128xf32> to vector<1x1x8x128xf32>
    tpu.vector_store %arg8[%c0_61, %c0_62, %c0_63, %c0_64], %79 {strides = array<i32>} : memref<1x6x8x128xf32, #tpu.memory_space<vmem>>, vector<1x1x8x128xf32>,
    %80 = vector.extract_strided_slice %73 {offsets = [16, 0], sizes = [8, 128], strides = [1, 1]} : vector<96x128xf32> to vector<8x128xf32>
    %81 = vector.extract_strided_slice %73 {offsets = [24, 0], sizes = [8, 128], strides = [1, 1]} : vector<96x128xf32> to vector<8x128xf32>
    %82 = arith.maximumf %80, %81 : vector<8x128xf32>
    %c0_65 = arith.constant 0 : index
    %c1_66 = arith.constant 1 : index
    %c0_67 = arith.constant 0 : index
    %c0_68 = arith.constant 0 : index
    %83 = vector.load %arg8[%c0_65, %c1_66, %c0_67, %c0_68] : memref<1x6x8x128xf32, #tpu.memory_space<vmem>>, vector<1x1x8x128xf32>
    %84 = vector.shape_cast %83 : vector<1x1x8x128xf32> to vector<8x128xf32>
    %85 = vector.shape_cast %82 : vector<8x128xf32> to vector<1x1x8x128xf32>
    tpu.vector_store %arg8[%c0_65, %c1_66, %c0_67, %c0_68], %85 {strides = array<i32>} : memref<1x6x8x128xf32, #tpu.memory_space<vmem>>, vector<1x1x8x128xf32>,
    %86 = vector.extract_strided_slice %73 {offsets = [32, 0], sizes = [8, 128], strides = [1, 1]} : vector<96x128xf32> to vector<8x128xf32>
    %87 = vector.extract_strided_slice %73 {offsets = [40, 0], sizes = [8, 128], strides = [1, 1]} : vector<96x128xf32> to vector<8x128xf32>
    %88 = arith.maximumf %86, %87 : vector<8x128xf32>
    %c0_69 = arith.constant 0 : index
    %c2_70 = arith.constant 2 : index
    %c0_71 = arith.constant 0 : index
    %c0_72 = arith.constant 0 : index
    %89 = vector.load %arg8[%c0_69, %c2_70, %c0_71, %c0_72] : memref<1x6x8x128xf32, #tpu.memory_space<vmem>>, vector<1x1x8x128xf32>
    %90 = vector.shape_cast %89 : vector<1x1x8x128xf32> to vector<8x128xf32>
    %91 = vector.shape_cast %88 : vector<8x128xf32> to vector<1x1x8x128xf32>
    tpu.vector_store %arg8[%c0_69, %c2_70, %c0_71, %c0_72], %91 {strides = array<i32>} : memref<1x6x8x128xf32, #tpu.memory_space<vmem>>, vector<1x1x8x128xf32>,
    %92 = vector.extract_strided_slice %73 {offsets = [48, 0], sizes = [8, 128], strides = [1, 1]} : vector<96x128xf32> to vector<8x128xf32>
    %93 = vector.extract_strided_slice %73 {offsets = [56, 0], sizes = [8, 128], strides = [1, 1]} : vector<96x128xf32> to vector<8x128xf32>
    %94 = arith.maximumf %92, %93 : vector<8x128xf32>
    %c0_73 = arith.constant 0 : index
    %c3 = arith.constant 3 : index
    %c0_74 = arith.constant 0 : index
    %c0_75 = arith.constant 0 : index
    %95 = vector.load %arg8[%c0_73, %c3, %c0_74, %c0_75] : memref<1x6x8x128xf32, #tpu.memory_space<vmem>>, vector<1x1x8x128xf32>
    %96 = vector.shape_cast %95 : vector<1x1x8x128xf32> to vector<8x128xf32>
    %97 = vector.shape_cast %94 : vector<8x128xf32> to vector<1x1x8x128xf32>
    tpu.vector_store %arg8[%c0_73, %c3, %c0_74, %c0_75], %97 {strides = array<i32>} : memref<1x6x8x128xf32, #tpu.memory_space<vmem>>, vector<1x1x8x128xf32>,
    %98 = vector.extract_strided_slice %73 {offsets = [64, 0], sizes = [8, 128], strides = [1, 1]} : vector<96x128xf32> to vector<8x128xf32>
    %99 = vector.extract_strided_slice %73 {offsets = [72, 0], sizes = [8, 128], strides = [1, 1]} : vector<96x128xf32> to vector<8x128xf32>
    %100 = arith.maximumf %98, %99 : vector<8x128xf32>
    %c0_76 = arith.constant 0 : index
    %c4 = arith.constant 4 : index
    %c0_77 = arith.constant 0 : index
    %c0_78 = arith.constant 0 : index
    %101 = vector.load %arg8[%c0_76, %c4, %c0_77, %c0_78] : memref<1x6x8x128xf32, #tpu.memory_space<vmem>>, vector<1x1x8x128xf32>
    %102 = vector.shape_cast %101 : vector<1x1x8x128xf32> to vector<8x128xf32>
    %103 = vector.shape_cast %100 : vector<8x128xf32> to vector<1x1x8x128xf32>
    tpu.vector_store %arg8[%c0_76, %c4, %c0_77, %c0_78], %103 {strides = array<i32>} : memref<1x6x8x128xf32, #tpu.memory_space<vmem>>, vector<1x1x8x128xf32>,
    %104 = vector.extract_strided_slice %73 {offsets = [80, 0], sizes = [8, 128], strides = [1, 1]} : vector<96x128xf32> to vector<8x128xf32>
    %105 = vector.extract_strided_slice %73 {offsets = [88, 0], sizes = [8, 128], strides = [1, 1]} : vector<96x128xf32> to vector<8x128xf32>
    %106 = arith.maximumf %104, %105 : vector<8x128xf32>
    %c0_79 = arith.constant 0 : index
    %c5 = arith.constant 5 : index
    %c0_80 = arith.constant 0 : index
    %c0_81 = arith.constant 0 : index
    %107 = vector.load %arg8[%c0_79, %c5, %c0_80, %c0_81] : memref<1x6x8x128xf32, #tpu.memory_space<vmem>>, vector<1x1x8x128xf32>
    %108 = vector.shape_cast %107 : vector<1x1x8x128xf32> to vector<8x128xf32>
    %109 = vector.shape_cast %106 : vector<8x128xf32> to vector<1x1x8x128xf32>
    tpu.vector_store %arg8[%c0_79, %c5, %c0_80, %c0_81], %109 {strides = array<i32>} : memref<1x6x8x128xf32, #tpu.memory_space<vmem>>, vector<1x1x8x128xf32>,
    return
  }
  func.func @transform_0(%arg0: i32) -> (i32, i32, i32) {
    %c0_i32 = arith.constant 0 : i32
    %c0_i32_0 = arith.constant 0 : i32
    %c0_i32_1 = arith.constant 0 : i32
    return %arg0, %c0_i32, %c0_i32_0 : i32, i32, i32
  }
  func.func @transform_1(%arg0: i32) -> (i32, i32) {
    %c0_i32 = arith.constant 0 : i32
    %c0_i32_0 = arith.constant 0 : i32
    %c0_i32_1 = arith.constant 0 : i32
    return %c0_i32, %c0_i32_0 : i32, i32
  }
  func.func @transform_2(%arg0: i32) -> (i32, i32) {
    %c0_i32 = arith.constant 0 : i32
    %c0_i32_0 = arith.constant 0 : i32
    %c0_i32_1 = arith.constant 0 : i32
    return %c0_i32, %c0_i32_0 : i32, i32
  }
  func.func @transform_3(%arg0: i32) -> (i32, i32) {
    %c0_i32 = arith.constant 0 : i32
    %c0_i32_0 = arith.constant 0 : i32
    %c0_i32_1 = arith.constant 0 : i32
    return %c0_i32, %c0_i32_0 : i32, i32
  }
  func.func @transform_4(%arg0: i32) -> (i32, i32) {
    %c0_i32 = arith.constant 0 : i32
    %c0_i32_0 = arith.constant 0 : i32
    %c0_i32_1 = arith.constant 0 : i32
    return %c0_i32, %c0_i32_0 : i32, i32
  }
  func.func @transform_5(%arg0: i32) -> (i32, i32) {
    %c0_i32 = arith.constant 0 : i32
    %c0_i32_0 = arith.constant 0 : i32
    %c0_i32_1 = arith.constant 0 : i32
    return %c0_i32, %c0_i32_0 : i32, i32
  }
  func.func @transform_6(%arg0: i32) -> (i32, i32) {
    %c0_i32 = arith.constant 0 : i32
    %c0_i32_0 = arith.constant 0 : i32
    %c0_i32_1 = arith.constant 0 : i32
    return %c0_i32, %c0_i32_0 : i32, i32
  }
  func.func @transform_7(%arg0: i32) -> (i32, i32, i32, i32) {
    %c0_i32 = arith.constant 0 : i32
    %c0_i32_0 = arith.constant 0 : i32
    %c0_i32_1 = arith.constant 0 : i32
    %c0_i32_2 = arith.constant 0 : i32
    return %arg0, %c0_i32, %c0_i32_0, %c0_i32_1 : i32, i32, i32, i32
  }
}

</mosaic_0001>

<bundles_post_ra>
// kernel: tpu_custom_call.1
= control target key start
LH: loop header
LB: loop body
LE: loop exit
PB: predicated region body
PF: predicated region fallthrough
CT: control target
= control target key end

     0   :  { %s6702_s0 = inlined_call_operand.hbm [shape: f32[2,288,128], index: 0, kind: input, shape index: {}]   ;;  %s6703_s1 = inlined_call_operand.hbm [shape: bf16[1152,128], index: 1, kind: input, shape index: {}]   ;;  %s6704_s2 = inlined_call_operand.vmem [shape: f32[1,128], index: 2, kind: input, shape index: {}]   ;;  %s6705_s3 = inlined_call_operand.vmem [shape: f32[1,128], index: 3, kind: input, shape index: {}]   ;;  %s6706_s4 = inlined_call_operand.hbm [shape: bf16[1152,128], index: 4, kind: input, shape index: {}]   ;;  %s6707_s5 = inlined_call_operand.vmem [shape: f32[1,128], index: 5, kind: input, shape index: {}]   ;;  %s6708_s6 = inlined_call_operand.vmem [shape: f32[1,128], index: 6, kind: input, shape index: {}]   ;;  %s6709_s7 = inlined_call_operand.hbm [shape: f32[2,6,8,128], index: 7, kind: output, shape index: {}]  }
   0x1   :  { %6753 = sst [smem:[#allocation56_spill]] %s6703_s1 }
   0x2   :  { %6754 = sst [smem:[#allocation57_spill]] %s6706_s4 }
   0x3   :  { %12 = vsyncpa [#allocation5], 0 }
   0x4   :  { %14 = vsyncpa [#allocation5 + $0x1], 0 }
   0x5   :  { %15 = vsyncpa [#allocation8], 0 }
   0x6   :  { %16 = vsyncpa [#allocation6], 0 }
   0x7   :  { %18 = vsyncpa [#allocation6 + $0x1], 0  ;;  %s5177_s24 = smov 0   ;;  %s5179_s25 = smov 0  }
   0x8   :  { %s5181_s26 = smov 0   ;;  %s5183_s27 = smov 0  }
   0x9 LB: > { %s5198_s28 = sadd.s32 4294967295, %s5126_s27   ;;  %s4128_s29 = sadd.s32 4294967294, %s5126_s27   ;;  %s5126_s27 = sphi %s5183_s27, %s6894_s27   ;;  %s5122_s26 = sphi %s5181_s26, %s6893_s26   ;;  %s5118_s25 = sphi %s5179_s25, %s6892_s25   ;;  %s5114_s24 = sphi %s5177_s24, %s6891_s24  }
   0xa   : > { %p44_p0 = scmp.ne.s32.totalorder %s5118_s25, %s5114_s24  ;;  %p45_p1 = scmp.eq.s32.totalorder %s5198_s28, 0 }
   0xb   : > { %p194_p2 = scmp.eq.s32.totalorder %s5198_s28, 1  ;;  %p200_p3 = scmp.eq.s32.totalorder %s4128_s29, 1 }
   0xc   : > { %p5207_p4 = por %p45_p1, %p44_p0  ;;  %p4129_p5 = scmp.ge.s32.totalorder %s5126_s27, 1 }
   0xd   : > { %p5212_p6 = por %p200_p3, %p44_p0  ;;  %p207_p7 = scmp.lt.s32.totalorder %s5126_s27, 3 }
   0xe   : > { %s6757_s1 = sld [smem:[#allocation56_spill]]  ;;  %s5128_s13 = smov [#allocation7]  }
   0xf   : > { %p5220_p8 = pnand %p4129_p5, %p207_p7  ;;  %s220_s14 = sshll.u32 %s5128_s13, 4  ;;  %s221_s14 = int_to_ptr.vmem [resolvable:$true] %s220_s14 }
  0x10   : > { %s6759_s4 = sld [smem:[#allocation57_spill]]  ;;  %s5129_s18 = smov 64  }
  0x11   : > { %p4898_p9 = pneg %p5220_p8  ;;  %s5130_s19 = smov 4  }
  0x12   : > { %s5131_s20 = smov [#allocation9]   ;;  %s5233_s22 = sadd.s32 1, %s5126_s27  }
  0x13   : > { %p4899_p10 = pnand %p4898_p9, %p45_p1  ;;  %s240_s21 = sshll.u32 %s5131_s20, 4  ;;  %s241_s21 = int_to_ptr.vmem [resolvable:$true] %s240_s21 }
  0x14   : > { %s218_s11 = sshll.u32 %s6757_s1, 4  ;;  %s31_s23 = sadd.s32 1, %s5122_s26  ;;  %s219_s11 = int_to_ptr.hbm [resolvable:$true] %s218_s11 }
  0x15   : > { %4901 = dma.hbm_to_vmem [thread:$0]  (!%p4899_p10), %s219_s11, 9216, %s221_s14, [#allocation8], %s5129_s18, %s5129_s18, %s5130_s19  }
  0x16   : > { %s238_s17 = sshll.u32 %s6759_s4, 4  ;;  %s28_s29 = ssub.s32 %s5126_s27, %s5233_s22  ;;  %s239_s17 = int_to_ptr.hbm [resolvable:$true] %s238_s17 }
  0x17   : > { %4904 = dma.hbm_to_vmem [thread:$0]  (!%p4899_p10), %s239_s17, 9216, %s241_s21, [#allocation8], %s5129_s18, %s5129_s18, %s5130_s19  }
  0x18   : > { %p38_p12 = scmp.ne.s32.totalorder %s5122_s26, %s5118_s25  ;;  %p29_p13 = scmp.eq.s32.totalorder %s28_s29, 0 }
  0x19   : > { %p39_p0 = scmp.eq.s32.totalorder %s5126_s27, 0  ;;  %p4915_p5 = scmp.lt.s32.totalorder %s5126_s27, 2 }
  0x1a   : > { %p5243_p3 = por %p194_p2, %p38_p12  ;;  %s260_s11 = sand.u32 1, %s5122_s26  }
  0x1b   : > { %s5249_s10 = scalar_select %p29_p13, %s5122_s26, %s31_s23  }
  0x1c   : > { %p40_p7 = por %p39_p0, %p38_p12  ;;  %s4881_s13 = smul.u32 288, %s260_s11 }
  0x1d   : > { %6761 = sst [smem:[#allocation14_spill]] %s5249_s10  ;;  %s4882_s14 = smul.u32 288, %s5126_s27 }
  0x1e   : > { %p5253_p9 = pnand %p4915_p5, %p40_p7  ;;  %s264_s19 = scalar_lea.vmem [#allocation4], %s4881_s13 }
  0x1f   : > { %s269_s18 = scalar_lea.hbm %s6702_s0, %s4882_s14  ;;  %s272_s20 = sshll.u32 %s264_s19, 4  ;;  %s273_s20 = int_to_ptr.vmem [resolvable:$true] %s272_s20 }
  0x20   : > { %s270_s21 = sshll.u32 %s269_s18, 4  ;;  %s261_s23 = scalar_lea.sflag [#allocation5], %s260_s11  ;;  %s271_s21 = int_to_ptr.hbm [resolvable:$true] %s270_s21 }
  0x21   : > { %s5026_s29 = sshra.s32 %s271_s21, 4  ;;  %p5030_p10 = pneg %p5253_p9  ;;  %s5027_s29 = int_to_ptr.hbm [resolvable:$true] %s5026_s29 }
  0x22   : > { %s5028_s1 = scalar_lea.hbm %s5027_s29, 288  ;;  %s5033_s16 = scalar_lea.hbm %s6702_s0, 576 }
  0x23   : > { %p5029_p2 = scmp.ne.s32.totalorder %s5027_s29, %s5028_s1  ;;  %p5034_p0 = scmp.lt.s32.totalorder %s5027_s29, %s6702_s0 }
  0x24   : > { %p5035_p5 = scmp.lt.s32.totalorder %s5033_s16, %s5028_s1 }
  0x25   : > { %p5031_p12 = pnand %p5030_p10, %p5029_p2 }
  0x26   : > { %p5036_p7 = por %p5035_p5, %p5034_p0 }
  0x27   : > { %p5032_p13 = pneg %p5031_p12 }
  0x29   : > { %p5037_p11 = pnand %p5036_p7, %p5032_p13 }
  0x2b   : > { %5040 = shalt.err (!%p5037_p11)
}
  0x2c   : > { %s5132_s11 = smov 128   ;;  %s5133_s13 = smov 8  }
  0x2d   : > { %4908 = dma.hbm_to_vmem [thread:$0]  (!%p5253_p9), %s271_s21, 4608, %s273_s20, %s261_s23, %s5132_s11, %s5132_s11, %s5133_s13  }
  0x2e   : > { %284 = sbr.rel (%p5220_p8) target bundleno = 1506 (0x5e2), region = 48 }
  0x33   : > { %s5273_s4 = sand.u32 1, %s5118_s25  }
  0x34   : > { %s4883_s10 = smul.u32 288, %s5273_s4  ;;  %s287_s18 = scalar_lea.sflag [#allocation5], %s5273_s4 }
  0x36   : > { %s5277_s1 = scalar_lea.vmem [#allocation4], %s4883_s10 }
  0x37   : > { %5101 = dma.done.wait (%p5207_p4), %s287_s18, 4608  }
  0x38   : > { %5103 = vsyncadd (%p5207_p4), %s287_s18, 4294962688 }
  0x39   : > { %5105 = dma.done.wait (%p45_p1), [#allocation8], 18432  }
  0x3a   : > { %5107 = vsyncadd (%p45_p1), [#allocation8], 4294948864  ;;  %v4728_v0 = vld [vmem:[#allocation7 + $0x38] sm:$0xff]  ;;  %v4727_v2 = vld [vmem:[#allocation7 + $0x30] sm:$0xff]  ;;  %s4884_s13 = smul.u32 48, %s5273_s4  ;;  %s4021_s20 = scalar_lea.sflag [#allocation6], %s5273_s4 }
  0x3b   : > { %v4736_v1 = vld [vmem:[#allocation7 + $0x78] sm:$0xff]  ;;  %1392 = vmatpush.bf16.msra.mxu0 %v4728_v0  ;;  %v4735_v3 = vld [vmem:[#allocation7 + $0x70] sm:$0xff]  ;;  %v4726_v4 = vld [vmem:[#allocation7 + $0x28] sm:$0xff]  ;;  %s4885_s18 = smul.u32 48, %s5198_s28  ;;  %s5076_s16 = scalar_lea.hbm %s6709_s7, 96 }
  0x3c   : > { %1471 = vmatpush.bf16.msra.mxu1 %v4736_v1  ;;  %4865 = vmatpush.bf16.msra.mxu3 %v4736_v1  ;;  %v4734_v5 = vld [vmem:[#allocation7 + $0x68] sm:$0xff]  ;;  %v4744_v6 = vld [vmem:[#allocation7 + $0xb8] sm:$0xff]  ;;  %v4725_v7 = vld [vmem:[#allocation7 + $0x20] sm:$0xff]  ;;  %s6603_s10 = scalar_lea.vmem [#allocation10], %s4884_s13 }
  0x3d   : > { %4873 = vmatpush.bf16.msra.mxu2 %v4744_v6  ;;  %v4733_v8 = vld [vmem:[#allocation7 + $0x60] sm:$0xff]  ;;  %v4724_v9 = vld [vmem:[#allocation7 + $0x18] sm:$0xff]  ;;  %v4723_v11 = vld [vmem:[#allocation7 + $0x10] sm:$0xff]  ;;  %s4032_s12 = scalar_lea.hbm %s6709_s7, %s4885_s18  ;;  %s4033_s15 = sshll.u32 %s6603_s10, 4  ;;  %s4034_s15 = int_to_ptr.vmem [resolvable:$true] %s4033_s15 }
  0x3e   : > { %v4732_v10 = vld [vmem:[#allocation7 + $0x58] sm:$0xff]  ;;  %v4731_v12 = vld [vmem:[#allocation7 + $0x50] sm:$0xff]  ;;  %v336_v13 = vld [vmem:[%s5277_s1] sm:$0xff]  ;;  %s4035_s19 = sshll.u32 %s4032_s12, 4  ;;  %s4036_s19 = int_to_ptr.hbm [resolvable:$true] %s4035_s19 }
  0x3f   : > { %1393 = vmatpush.bf16.msra.mxu0 %v4727_v2  ;;  %v337_v14 = vld [vmem:[%s5277_s1 + $0x8] sm:$0xff]  ;;  %v4743_v17 = vld [vmem:[#allocation7 + $0xb0] sm:$0xff]  ;;  %v411_v19 = vld [vmem:[%s5277_s1 + $0x99] sm:$0xff]  ;;  %v364_v20 = vpack.c.bf16 %v336_v13, %v336_v13  ;;  %s5070_s28 = sshra.s32 %s4036_s19, 4  ;;  %s5071_s28 = int_to_ptr.hbm [resolvable:$true] %s5070_s28 }
  0x40   : > { %1472 = vmatpush.bf16.msra.mxu1 %v4735_v3  ;;  %4866 = vmatpush.bf16.msra.mxu3 %v4735_v3  ;;  %v392_v15 = vld [vmem:[%s5277_s1 + $0x1] sm:$0xff]  ;;  %v393_v16 = vld [vmem:[%s5277_s1 + $0x9] sm:$0xff]  ;;  %v410_v18 = vld [vmem:[%s5277_s1 + $0x91] sm:$0xff]  ;;  %v365_v21 = vpack.c.bf16 %v337_v14, %v337_v14  ;;  %v439_v27 = vpack.c.bf16 %v411_v19, %v411_v19  ;;  %s5072_s21 = scalar_lea.hbm %s5071_s28, 48  ;;  %p5077_p11 = scmp.lt.s32.totalorder %s5071_s28, %s6709_s7 }
  0x41   : > { %4874 = vmatpush.bf16.msra.mxu2 %v4743_v17  ;;  %v420_v22 = vpack.c.bf16 %v392_v15, %v392_v15  ;;  %v421_v23 = vpack.c.bf16 %v393_v16, %v393_v16  ;;  %v4722_v24 = vld [vmem:[#allocation7 + $0x8] sm:$0xff]  ;;  %v438_v26 = vpack.c.bf16 %v410_v18, %v410_v18  ;;  %v556_v28 = vunpack.c.l.b16 %v364_v20  ;;  %v4721_v32 = vld [vmem:[#allocation7] sm:$0xff]  ;;  %v338_v39 = vld [vmem:[%s5277_s1 + $0x10] sm:$0xff]  ;;  %p5073_p1 = scmp.ne.s32.totalorder %s5071_s28, %s5072_s21  ;;  %p5078_p9 = scmp.lt.s32.totalorder %s5076_s16, %s5072_s21 }
  0x42   : > { %v4730_v25 = vld [vmem:[#allocation7 + $0x48] sm:$0xff]  ;;  %v557_v29 = vunpack.c.l.b16 %v365_v21  ;;  %v4729_v33 = vld [vmem:[#allocation7 + $0x40] sm:$0xff]  ;;  %v659_v35 = vunpack.c.l.b16 %v439_v27  ;;  %v339_v40 = vld [vmem:[%s5277_s1 + $0x18] sm:$0xff]  ;;  %v366_v45 = vpack.c.bf16 %v338_v39, %v338_v39 }
  0x43   : > { %1394 = vmatpush.bf16.msra.mxu0 %v4726_v4  ;;  %v640_v30 = vunpack.c.l.b16 %v420_v22  ;;  %v641_v31 = vunpack.c.l.b16 %v421_v23  ;;  %v658_v34 = vunpack.c.l.b16 %v438_v26  ;;  %v394_v41 = vld [vmem:[%s5277_s1 + $0x11] sm:$0xff]  ;;  %v395_v42 = vld [vmem:[%s5277_s1 + $0x19] sm:$0xff]  ;;  %v412_v43 = vld [vmem:[%s5277_s1 + $0xa1] sm:$0xff]  ;;  %v367_v46 = vpack.c.bf16 %v339_v40, %v339_v40  ;;  %p5074_p4 = pnand %p5073_p1, %p5243_p3  ;;  %p5079_p2 = por %p5078_p9, %p5077_p11 }
  0x44   : > { %1473 = vmatpush.bf16.msra.mxu1 %v4734_v5  ;;  %4867 = vmatpush.bf16.msra.mxu3 %v4734_v5  ;;  %v584_v36 = vpack.c.b16 %v557_v29, %v556_v28  ;;  %v413_v44 = vld [vmem:[%s5277_s1 + $0xa9] sm:$0xff]  ;;  %v422_v47 = vpack.c.bf16 %v394_v41, %v394_v41  ;;  %v423_v48 = vpack.c.bf16 %v395_v42, %v395_v42  ;;  %v558_v51 = vunpack.c.l.b16 %v366_v45  ;;  %v340_v60 = vld [vmem:[%s5277_s1 + $0x20] sm:$0xff]  ;;  %v4752_v62 = vld [vmem:[#allocation7 + $0xf8] sm:$0xff] }
  0x45   : > { %v668_v37 = vpack.c.b16 %v641_v31, %v640_v30  ;;  %v5293_v38 = vpack.c.b16 %v659_v35, %v658_v34  ;;  %v440_v49 = vpack.c.bf16 %v412_v43, %v412_v43  ;;  %v441_v50 = vpack.c.bf16 %v413_v44, %v413_v44  ;;  %v341_v61 = vld [vmem:[%s5277_s1 + $0x28] sm:$0xff]  ;;  %v414_v2 = vld [vmem:[%s5277_s1 + $0xb1] sm:$0xff]  ;;  %v415_v3 = vld [vmem:[%s5277_s1 + $0xb9] sm:$0xff]  ;;  %p5075_p8 = pneg %p5074_p4 }
  0x46   : > { %v559_v52 = vunpack.c.l.b16 %v367_v46  ;;  %v642_v53 = vunpack.c.l.b16 %v422_v47  ;;  %v643_v54 = vunpack.c.l.b16 %v423_v48  ;;  %v396_v63 = vld [vmem:[%s5277_s1 + $0x21] sm:$0xff]  ;;  %v397_v0 = vld [vmem:[%s5277_s1 + $0x29] sm:$0xff]  ;;  %v4740_v13 = vld [vmem:[#allocation7 + $0x98] sm:$0xff] }
  0x47   : > { %1395 = vmatpush.bf16.msra.mxu0 %v4725_v7  ;;  %6763 = vst [vmem:[#allocation15_spill] sm:$0xff] %v5293_v38  ;;  %v660_v55 = vunpack.c.l.b16 %v440_v49  ;;  %v661_v56 = vunpack.c.l.b16 %v441_v50  ;;  %v4742_v1 = vld [vmem:[#allocation7 + $0xa8] sm:$0xff]  ;;  %v4751_v4 = vld [vmem:[#allocation7 + $0xf0] sm:$0xff]  ;;  %v4741_v5 = vld [vmem:[#allocation7 + $0xa0] sm:$0xff]  ;;  %v369_v7 = vpack.c.bf16 %v341_v61, %v341_v61  ;;  %p5080_p10 = pnand %p5079_p2, %p5075_p8 }
  0x48   : > { %1474 = vmatpush.bf16.msra.mxu1 %v4733_v8  ;;  %4868 = vmatpush.bf16.msra.mxu3 %v4733_v8  ;;  %v5302_v57 = vpack.c.b16 %v559_v52, %v558_v51  ;;  %v5304_v58 = vpack.c.b16 %v643_v54, %v642_v53  ;;  %v424_v8 = vpack.c.bf16 %v396_v63, %v396_v63  ;;  %v4749_v20 = vld [vmem:[#allocation7 + $0xe0] sm:$0xff]  ;;  %v398_v26 = vld [vmem:[%s5277_s1 + $0x31] sm:$0xff]  ;;  %v417_v31 = vld [vmem:[%s5277_s1 + $0xc9] sm:$0xff] }
  0x49   : > { %v5306_v59 = vpack.c.b16 %v661_v56, %v660_v55  ;;  %4875 = vmatpush.bf16.msra.mxu2 %v4742_v1  ;;  %v561_v15 = vunpack.c.l.b16 %v369_v7  ;;  %v399_v27 = vld [vmem:[%s5277_s1 + $0x39] sm:$0xff]  ;;  %v4739_v28 = vld [vmem:[#allocation7 + $0x90] sm:$0xff]  ;;  %v416_v30 = vld [vmem:[%s5277_s1 + $0xc1] sm:$0xff]  ;;  %v426_v41 = vpack.c.bf16 %v398_v26, %v398_v26  ;;  %v445_v44 = vpack.c.bf16 %v417_v31, %v417_v31 }
  0x4a   : > { %v644_v16 = vunpack.c.l.b16 %v424_v8  ;;  %v4748_v29 = vld [vmem:[#allocation7 + $0xd8] sm:$0xff]  ;;  %v427_v42 = vpack.c.bf16 %v399_v27, %v399_v27  ;;  %v444_v43 = vpack.c.bf16 %v416_v30, %v416_v30  ;;  %v4737_v47 = vld [vmem:[#allocation7 + $0x80] sm:$0xff]  ;;  %v4746_v48 = vld [vmem:[#allocation7 + $0xc8] sm:$0xff] }
  0x4b   : > { %1396 = vmatpush.bf16.msra.mxu0 %v4724_v9  ;;  %6764 = vst [vmem:[#allocation16_spill] sm:$0xff] %v5306_v59  ;;  %v425_v9 = vpack.c.bf16 %v397_v0, %v397_v0  ;;  %v458_v34 = vld [vmem:[%s5277_s1 + $0x52] sm:$0xff]  ;;  %v459_v35 = vld [vmem:[%s5277_s1 + $0x5a] sm:$0xff]  ;;  %v646_v51 = vunpack.c.l.b16 %v426_v41  ;;  %v665_v54 = vunpack.c.l.b16 %v445_v44  ;;  %v345_v0 = vld [vmem:[%s5277_s1 + $0x48] sm:$0xff] }
  0x4c   : > { %1475 = vmatpush.bf16.msra.mxu1 %v4732_v10  ;;  %4869 = vmatpush.bf16.msra.mxu3 %v4732_v10  ;;  %v442_v10 = vpack.c.bf16 %v414_v2, %v414_v2  ;;  %v647_v52 = vunpack.c.l.b16 %v427_v42  ;;  %v664_v53 = vunpack.c.l.b16 %v444_v43  ;;  %v4745_v56 = vld [vmem:[#allocation7 + $0xc0] sm:$0xff]  ;;  %v401_v2 = vld [vmem:[%s5277_s1 + $0x49] sm:$0xff]  ;;  %v347_v31 = vld [vmem:[%s5277_s1 + $0x58] sm:$0xff] }
  0x4d   : > { %4876 = vmatpush.bf16.msra.mxu2 %v4741_v5  ;;  %v344_v63 = vld [vmem:[%s5277_s1 + $0x40] sm:$0xff]  ;;  %v346_v30 = vld [vmem:[%s5277_s1 + $0x50] sm:$0xff] }
  0x4e   : > { %v662_v18 = vunpack.c.l.b16 %v442_v10  ;;  %v5338_v61 = vpack.c.b16 %v647_v52, %v646_v51  ;;  %v373_v10 = vpack.c.bf16 %v345_v0, %v345_v0  ;;  %v348_v52 = vld [vmem:[%s5277_s1 + $0x60] sm:$0xff]  ;;  %v465_v0 = vld [vmem:[%s5277_s1 + $0x8a] sm:$0xff] }
  0x4f   : > { %1397 = vmatpush.bf16.msra.mxu0 %v4723_v11  ;;  %v443_v11 = vpack.c.bf16 %v415_v3, %v415_v3  ;;  %v460_v3 = vld [vmem:[%s5277_s1 + $0x62] sm:$0xff] }
  0x50   : > { %1476 = vmatpush.bf16.msra.mxu1 %v4731_v12  ;;  %4870 = vmatpush.bf16.msra.mxu3 %v4731_v12  ;;  %v4750_v12 = vld [vmem:[#allocation7 + $0xe8] sm:$0xff]  ;;  %v488_v7 = vpack.c.bf16 %v460_v3, %v460_v3  ;;  %v376_v3 = vpack.c.bf16 %v348_v52, %v348_v52 }
  0x51   : > { %v663_v19 = vunpack.c.l.b16 %v443_v11  ;;  %4877 = vmatpush.bf16.msra.mxu2 %v4740_v13 }
  0x53   : > { %1398 = vmatpush.bf16.msra.mxu0 %v4722_v24  ;;  %v5321_v23 = vpack.c.b16 %v663_v19, %v662_v18  ;;  %v342_v24 = vld [vmem:[%s5277_s1 + $0x30] sm:$0xff]  ;;  %v565_v18 = vunpack.c.l.b16 %v373_v10 }
  0x54   : > { %1477 = vmatpush.bf16.msra.mxu1 %v4730_v25  ;;  %4871 = vmatpush.bf16.msra.mxu3 %v4730_v25  ;;  %v343_v25 = vld [vmem:[%s5277_s1 + $0x38] sm:$0xff]  ;;  %v370_v39 = vpack.c.bf16 %v342_v24, %v342_v24 }
  0x55   : > { %6765 = vst [vmem:[#allocation17_spill] sm:$0xff] %v5321_v23  ;;  %4878 = vmatpush.bf16.msra.mxu2 %v4739_v28  ;;  %v371_v40 = vpack.c.bf16 %v343_v25, %v343_v25 }
  0x56   : > { %v562_v49 = vunpack.c.l.b16 %v370_v39  ;;  %v374_v39 = vpack.c.bf16 %v346_v30, %v346_v30  ;;  %v466_v30 = vld [vmem:[%s5277_s1 + $0x92] sm:$0xff] }
  0x57   : > { %1399 = vmatpush.bf16.msra.mxu0 %v4721_v32  ;;  %v4738_v32 = vld [vmem:[#allocation7 + $0x88] sm:$0xff]  ;;  %v563_v50 = vunpack.c.l.b16 %v371_v40  ;;  %v375_v40 = vpack.c.bf16 %v347_v31, %v347_v31  ;;  %v467_v31 = vld [vmem:[%s5277_s1 + $0x9a] sm:$0xff] }
  0x58   : > { %1478 = vmatpush.bf16.msra.mxu1 %v4729_v33  ;;  %4872 = vmatpush.bf16.msra.mxu3 %v4729_v33  ;;  %v4747_v33 = vld [vmem:[#allocation7 + $0xd0] sm:$0xff] }
  0x59   : > { %4879 = vmatpush.bf16.msra.mxu2 %v4738_v32 }
  0x5a   : > { %1400 = vmatmul.bf16.vlgmr.msra.gmra.mxu0 %v584_v36  ;;  %v486_v36 = vpack.c.bf16 %v458_v34, %v458_v34  ;;  %v462_v34 = vld [vmem:[%s5277_s1 + $0x72] sm:$0xff] }
  0x5b   : > { %1550 = vmatpush.bf16.msrb.mxu0 %v4744_v6  ;;  %1479 = vmatmul.bf16.vlgmr.msra.gmra.mxu1 %v668_v37  ;;  %v368_v6 = vpack.c.bf16 %v340_v60, %v340_v60  ;;  %v487_v37 = vpack.c.bf16 %v459_v35, %v459_v35  ;;  %v5336_v60 = vpack.c.b16 %v563_v50, %v562_v49  ;;  %v463_v35 = vld [vmem:[%s5277_s1 + $0x7a] sm:$0xff] }
  0x5c   : > { %1524 = vmatmul.bf16.vlgmr.msra.gmra.mxu3 %v5293_v38  ;;  %v734_v45 = vunpack.c.l.b16 %v486_v36  ;;  %v490_v36 = vpack.c.bf16 %v462_v34, %v462_v34 }
  0x5d   : > { %1629 = vmatpush.bf16.msrb.mxu3 %v4752_v62  ;;  %v560_v14 = vunpack.c.l.b16 %v368_v6  ;;  %v735_v46 = vunpack.c.l.b16 %v487_v37  ;;  %4880 = vmatpush.bf16.msra.mxu2 %v4737_v47  ;;  %v5340_v62 = vpack.c.b16 %v665_v54, %v664_v53  ;;  %v419_v6 = vld [vmem:[%s5277_s1 + $0xd9] sm:$0xff]  ;;  %v491_v37 = vpack.c.bf16 %v463_v35, %v463_v35  ;;  %v349_v53 = vld [vmem:[%s5277_s1 + $0x68] sm:$0xff] }
  0x5e   : > { %v738_v43 = vunpack.c.l.b16 %v490_v36  ;;  %v404_v54 = vld [vmem:[%s5277_s1 + $0x61] sm:$0xff] }
  0x5f   : > { %1551 = vmatpush.bf16.msrb.mxu0 %v4743_v17  ;;  %v645_v17 = vunpack.c.l.b16 %v425_v9  ;;  %v5317_v21 = vpack.c.b16 %v561_v15, %v560_v14  ;;  %v5334_v55 = vpack.c.b16 %v735_v46, %v734_v45  ;;  %6766 = vst [vmem:[#allocation18_spill] sm:$0xff] %v5340_v62  ;;  %v372_v9 = vpack.c.bf16 %v344_v63, %v344_v63  ;;  %v464_v63 = vld [vmem:[%s5277_s1 + $0x82] sm:$0xff] }
  0x60   : > { %v447_v14 = vpack.c.bf16 %v419_v6, %v419_v6  ;;  %v736_v15 = vunpack.c.l.b16 %v488_v7  ;;  %v739_v44 = vunpack.c.l.b16 %v491_v37  ;;  %v566_v45 = vunpack.c.l.b16 %v374_v39 }
  0x61   : > { %1630 = vmatpush.bf16.msrb.mxu3 %v4751_v4  ;;  %v5319_v22 = vpack.c.b16 %v645_v17, %v644_v16  ;;  %1583 = vmatmul.bf16.vlgmr.msra.gmra.mxu2 %v5334_v55  ;;  %v461_v4 = vld [vmem:[%s5277_s1 + $0x6a] sm:$0xff]  ;;  %v564_v17 = vunpack.c.l.b16 %v372_v9  ;;  %v567_v46 = vunpack.c.l.b16 %v375_v40  ;;  %v568_v9 = vunpack.c.l.b16 %v376_v3 }
  0x62   : > { %v489_v8 = vpack.c.bf16 %v461_v4, %v461_v4  ;;  %v667_v25 = vunpack.c.l.b16 %v447_v14  ;;  %v5372_v49 = vpack.c.b16 %v739_v44, %v738_v43  ;;  %v377_v4 = vpack.c.bf16 %v349_v53, %v349_v53  ;;  %v352_v44 = vld [vmem:[%s5277_s1 + $0x80] sm:$0xff] }
  0x63   : > { %1552 = vmatpush.bf16.msrb.mxu0 %v4742_v1  ;;  %v400_v1 = vld [vmem:[%s5277_s1 + $0x41] sm:$0xff]  ;;  %v5356_v27 = vpack.c.b16 %v565_v18, %v564_v17  ;;  %v5374_v50 = vpack.c.b16 %v567_v46, %v566_v45  ;;  %v406_v17 = vld [vmem:[%s5277_s1 + $0x71] sm:$0xff]  ;;  %v407_v18 = vld [vmem:[%s5277_s1 + $0x79] sm:$0xff] }
  0x64   : > { %v428_v11 = vpack.c.bf16 %v400_v1, %v400_v1  ;;  %v737_v16 = vunpack.c.l.b16 %v489_v8  ;;  %6768 = vst [vmem:[#allocation20_spill] sm:$0xff] %v5372_v49  ;;  %v492_v1 = vpack.c.bf16 %v464_v63, %v464_v63  ;;  %v569_v10 = vunpack.c.l.b16 %v377_v4  ;;  %v353_v45 = vld [vmem:[%s5277_s1 + $0x88] sm:$0xff] }
  0x65   : > { %1631 = vmatpush.bf16.msrb.mxu3 %v4750_v12  ;;  %v429_v12 = vpack.c.bf16 %v401_v2, %v401_v2  ;;  %v493_v2 = vpack.c.bf16 %v465_v0, %v465_v0  ;;  %v408_v46 = vld [vmem:[%s5277_s1 + $0x81] sm:$0xff]  ;;  %v381_v52 = vpack.c.bf16 %v353_v45, %v353_v45  ;;  %v469_v63 = vld [vmem:[%s5277_s1 + $0xaa] sm:$0xff] }
  0x66   : > { %v648_v19 = vunpack.c.l.b16 %v428_v11  ;;  %v5354_v26 = vpack.c.b16 %v737_v16, %v736_v15  ;;  %v740_v7 = vunpack.c.l.b16 %v492_v1  ;;  %v350_v15 = vld [vmem:[%s5277_s1 + $0x70] sm:$0xff]  ;;  %v351_v16 = vld [vmem:[%s5277_s1 + $0x78] sm:$0xff]  ;;  %v436_v53 = vpack.c.bf16 %v408_v46, %v408_v46 }
  0x67   : > { %1553 = vmatpush.bf16.msrb.mxu0 %v4741_v5  ;;  %v418_v5 = vld [vmem:[%s5277_s1 + $0xd1] sm:$0xff]  ;;  %v741_v8 = vunpack.c.l.b16 %v493_v2  ;;  %v497_v1 = vpack.c.bf16 %v469_v63, %v469_v63  ;;  %v573_v3 = vunpack.c.l.b16 %v381_v52  ;;  %v357_v52 = vld [vmem:[%s5277_s1 + $0xa8] sm:$0xff] }
  0x68   : > { %v656_v4 = vunpack.c.l.b16 %v436_v53 }
  0x69   : > { %1632 = vmatpush.bf16.msrb.mxu3 %v4749_v20  ;;  %v649_v20 = vunpack.c.l.b16 %v429_v12 }
  0x6a   : > { %1405 = vmatmul.bf16.gmra.mxu0 %v5302_v57 }
  0x6b   : > { %1484 = vmatmul.bf16.gmra.mxu1 %v5304_v58  ;;  %1554 = vmatpush.bf16.msrb.mxu0 %v4740_v13  ;;  %v446_v13 = vpack.c.bf16 %v418_v5, %v418_v5  ;;  %v432_v5 = vpack.c.bf16 %v404_v54, %v404_v54 }
  0x6c   : > { %1529 = vmatmul.bf16.gmra.mxu3 %v5306_v59 }
  0x6d   : > { %1633 = vmatpush.bf16.msrb.mxu3 %v4748_v29  ;;  %v666_v24 = vunpack.c.l.b16 %v446_v13  ;;  %v652_v11 = vunpack.c.l.b16 %v432_v5  ;;  %v5390_v13 = vpack.c.b16 %v569_v10, %v568_v9 }
  0x6f   : > { %1555 = vmatpush.bf16.msrb.mxu0 %v4739_v28  ;;  %v5358_v28 = vpack.c.b16 %v649_v20, %v648_v19  ;;  %v5360_v29 = vpack.c.b16 %v667_v25, %v666_v24  ;;  %v378_v19 = vpack.c.bf16 %v350_v15, %v350_v15  ;;  %v379_v20 = vpack.c.bf16 %v351_v16, %v351_v16  ;;  %v354_v16 = vld [vmem:[%s5277_s1 + $0x90] sm:$0xff] }
  0x70   : > { %v434_v24 = vpack.c.bf16 %v406_v17, %v406_v17  ;;  %v435_v25 = vpack.c.bf16 %v407_v18, %v407_v18  ;;  %v355_v17 = vld [vmem:[%s5277_s1 + $0x98] sm:$0xff] }
  0x71   : > { %1634 = vmatpush.bf16.msrb.mxu3 %v4747_v33  ;;  %6767 = vst [vmem:[#allocation19_spill] sm:$0xff] %v5360_v29  ;;  %1588 = vmatmul.bf16.gmra.mxu2 %v5354_v26  ;;  %v403_v33 = vld [vmem:[%s5277_s1 + $0x59] sm:$0xff]  ;;  %v570_v34 = vunpack.c.l.b16 %v378_v19  ;;  %v571_v35 = vunpack.c.l.b16 %v379_v20  ;;  %v382_v19 = vpack.c.bf16 %v354_v16, %v354_v16  ;;  %v383_v20 = vpack.c.bf16 %v355_v17, %v355_v17 }
  0x72   : > { %v431_v42 = vpack.c.bf16 %v403_v33, %v403_v33  ;;  %v495_v33 = vpack.c.bf16 %v467_v31, %v467_v31  ;;  %v654_v36 = vunpack.c.l.b16 %v434_v24  ;;  %v655_v37 = vunpack.c.l.b16 %v435_v25  ;;  %v471_v31 = vld [vmem:[%s5277_s1 + $0xba] sm:$0xff] }
  0x73   : > { %1556 = vmatpush.bf16.msrb.mxu0 %v4738_v32  ;;  %v402_v32 = vld [vmem:[%s5277_s1 + $0x51] sm:$0xff] }
  0x74   : > { %v430_v41 = vpack.c.bf16 %v402_v32, %v402_v32  ;;  %v494_v32 = vpack.c.bf16 %v466_v30, %v466_v30  ;;  %v743_v40 = vunpack.c.l.b16 %v495_v33  ;;  %v5408_v43 = vpack.c.b16 %v655_v37, %v654_v36  ;;  %v470_v30 = vld [vmem:[%s5277_s1 + $0xb2] sm:$0xff] }
  0x75   : > { %1635 = vmatpush.bf16.msrb.mxu3 %v4746_v48  ;;  %v651_v48 = vunpack.c.l.b16 %v431_v42  ;;  %v5406_v42 = vpack.c.b16 %v571_v35, %v570_v34  ;;  %v499_v33 = vpack.c.bf16 %v471_v31, %v471_v31  ;;  %v574_v34 = vunpack.c.l.b16 %v382_v19  ;;  %v358_v31 = vld [vmem:[%s5277_s1 + $0xb0] sm:$0xff] }
  0x76   : > { %v742_v39 = vunpack.c.l.b16 %v494_v32  ;;  %6771 = vst [vmem:[#allocation23_spill] sm:$0xff] %v5408_v43  ;;  %v498_v32 = vpack.c.bf16 %v470_v30, %v470_v30  ;;  %v575_v35 = vunpack.c.l.b16 %v383_v20 }
  0x77   : > { %1557 = vmatpush.bf16.msrb.mxu0 %v4737_v47  ;;  %v650_v47 = vunpack.c.l.b16 %v430_v41  ;;  %v747_v37 = vunpack.c.l.b16 %v499_v33 }
  0x78   : > { %v5404_v41 = vpack.c.b16 %v743_v40, %v742_v39  ;;  %v746_v36 = vunpack.c.l.b16 %v498_v32  ;;  %v359_v32 = vld [vmem:[%s5277_s1 + $0xb8] sm:$0xff] }
  0x79   : > { %1636 = vmatpush.bf16.msrb.mxu3 %v4745_v56  ;;  %v5376_v51 = vpack.c.b16 %v651_v48, %v650_v47  ;;  %v405_v56 = vld [vmem:[%s5277_s1 + $0x69] sm:$0xff]  ;;  %v380_v48 = vpack.c.bf16 %v352_v44, %v352_v44  ;;  %v5446_v44 = vpack.c.b16 %v575_v35, %v574_v34  ;;  %v386_v34 = vpack.c.bf16 %v358_v31, %v358_v31 }
  0x7a   : > { %1410 = vmatmul.bf16.gmra.mxu0 %v5317_v21  ;;  %v433_v6 = vpack.c.bf16 %v405_v56, %v405_v56  ;;  %6770 = vst [vmem:[#allocation22_spill] sm:$0xff] %v5404_v41  ;;  %v409_v47 = vld [vmem:[%s5277_s1 + $0x89] sm:$0xff]  ;;  %v5442_v39 = vpack.c.b16 %v747_v37, %v746_v36  ;;  %v387_v35 = vpack.c.bf16 %v359_v32, %v359_v32 }
  0x7b   : > { %1489 = vmatmul.bf16.gmra.mxu1 %v5319_v22  ;;  %v437_v54 = vpack.c.bf16 %v409_v47, %v409_v47  ;;  %v468_v56 = vld [vmem:[%s5277_s1 + $0xa2] sm:$0xff]  ;;  %v572_v2 = vunpack.c.l.b16 %v380_v48  ;;  %6775 = vst [vmem:[#allocation27_spill] sm:$0xff] %v5446_v44 }
  0x7c   : > { %1534 = vmatmul.bf16.gmra.mxu3 %v5321_v23  ;;  %v653_v12 = vunpack.c.l.b16 %v433_v6  ;;  %v496_v0 = vpack.c.bf16 %v468_v56, %v468_v56  ;;  %6774 = vst [vmem:[#allocation26_spill] sm:$0xff] %v5442_v39  ;;  %v356_v48 = vld [vmem:[%s5277_s1 + $0xa0] sm:$0xff]  ;;  %v385_v56 = vpack.c.bf16 %v357_v52, %v357_v52  ;;  %v361_v31 = vld [vmem:[%s5277_s1 + $0xc8] sm:$0xff] }
  0x7d   : > { %v657_v5 = vunpack.c.l.b16 %v437_v54  ;;  %v5422_v9 = vpack.c.b16 %v573_v3, %v572_v2  ;;  %v384_v54 = vpack.c.bf16 %v356_v48, %v356_v48  ;;  %v473_v2 = vld [vmem:[%s5277_s1 + $0xca] sm:$0xff] }
  0x7e   : > { %v5392_v14 = vpack.c.b16 %v653_v12, %v652_v11  ;;  %v744_v6 = vunpack.c.l.b16 %v496_v0 }
  0x7f   : > { %v5424_v10 = vpack.c.b16 %v657_v5, %v656_v4  ;;  %v501_v4 = vpack.c.bf16 %v473_v2, %v473_v2  ;;  %v576_v5 = vunpack.c.l.b16 %v384_v54  ;;  %v578_v54 = vunpack.c.l.b16 %v386_v34 }
  0x81   : > { %1593 = vmatmul.bf16.gmra.mxu2 %v5372_v49  ;;  %6773 = vst [vmem:[#allocation25_spill] sm:$0xff] %v5424_v10 }
  0x8a   : > { %1415 = vmatmul.bf16.gmra.mxu0 %v5336_v60 }
  0x8b   : > { %1494 = vmatmul.bf16.gmra.mxu1 %v5338_v61 }
  0x8c   : > { %1539 = vmatmul.bf16.gmra.mxu3 %v5340_v62 }
  0x9a   : > { %1420 = vmatmul.bf16.gmra.mxu0 %v5356_v27 }
  0x9b   : > { %1499 = vmatmul.bf16.gmra.mxu1 %v5358_v28 }
  0x9c   : > { %1544 = vmatmul.bf16.gmra.mxu3 %v5360_v29  ;;  %v363_v29 = vld [vmem:[%s5277_s1 + $0xd8] sm:$0xff] }
  0x9d   : > { %v391_v62 = vpack.c.bf16 %v363_v29, %v363_v29 }
  0xaa   : > { %1425 = vmatmul.bf16.gmra.mxu0 %v5374_v50 }
  0xab   : > { %1504 = vmatmul.bf16.gmra.mxu1 %v5376_v51 }
  0xac   : > { %1637 = vmatmul.bf16.vlgmr.msrb.gmra.mxu3 %v5302_v57  ;;  %v5388_v57 = vpack.c.b16 %v741_v8, %v740_v7  ;;  %v745_v7 = vunpack.c.l.b16 %v497_v1  ;;  %v472_v1 = vld [vmem:[%s5277_s1 + $0xc2] sm:$0xff] }
  0xad   : > { %v500_v3 = vpack.c.bf16 %v472_v1, %v472_v1 }
  0xae   : > { %6769 = vst [vmem:[#allocation21_spill] sm:$0xff] %v5388_v57  ;;  %1598 = vmatmul.bf16.gmra.mxu2 %v5388_v57  ;;  %v5420_v8 = vpack.c.b16 %v745_v7, %v744_v6  ;;  %v577_v6 = vunpack.c.l.b16 %v385_v56  ;;  %v579_v56 = vunpack.c.l.b16 %v387_v35  ;;  %v389_v35 = vpack.c.bf16 %v361_v31, %v361_v31  ;;  %v362_v31 = vld [vmem:[%s5277_s1 + $0xd0] sm:$0xff] }
  0xaf   : > { %v748_v7 = vunpack.c.l.b16 %v500_v3 }
  0xb0   : > { %6772 = vst [vmem:[#allocation24_spill] sm:$0xff] %v5420_v8  ;;  %v5467_v17 = vpack.c.b16 %v577_v6, %v576_v5  ;;  %v5488_v5 = vpack.c.b16 %v579_v56, %v578_v54 }
  0xb2   : > { %6778 = vst [vmem:[#allocation30_spill] sm:$0xff] %v5467_v17 }
  0xb3   : > { %6784 = vst [vmem:[#allocation36_spill] sm:$0xff] %v5488_v5 }
  0xba   : > { %1430 = vmatmul.bf16.gmra.mxu0 %v5390_v13 }
  0xbb   : > { %1509 = vmatmul.bf16.gmra.mxu1 %v5392_v14 }
  0xbc   : > { %1642 = vmatmul.bf16.gmra.mxu3 %v5317_v21 }
  0xbe   : > { %1603 = vmatmul.bf16.gmra.mxu2 %v5404_v41 }
  0xca   : > { %1435 = vmatmul.bf16.gmra.mxu0 %v5406_v42 }
  0xcb   : > { %1514 = vmatmul.bf16.gmra.mxu1 %v5408_v43 }
  0xcc   : > { %1647 = vmatmul.bf16.gmra.mxu3 %v5336_v60 }
  0xce   : > { %1608 = vmatmul.bf16.gmra.mxu2 %v5420_v8 }
  0xd7   : > { %v1401_v11 = vpop.f32.mrf.mxu0 }
  0xd8   : > { %v1480_v12 = vpop.f32.mrf.mxu1 }
  0xd9   : > { %v5427_v15 = vadd.f32 %v1480_v12, %v1401_v11  ;;  %v749_v11 = vunpack.c.l.b16 %v501_v4 }
  0xda   : > { %1440 = vmatmul.bf16.gmra.mxu0 %v5422_v9 }
  0xdb   : > { %1519 = vmatmul.bf16.gmra.mxu1 %v5424_v10  ;;  %v5463_v12 = vpack.c.b16 %v749_v11, %v748_v7 }
  0xdc   : > { %1652 = vmatmul.bf16.gmra.mxu3 %v5356_v27 }
  0xdd   : > { %6776 = vst [vmem:[#allocation28_spill] sm:$0xff] %v5463_v12 }
  0xde   : > { %1613 = vmatmul.bf16.gmra.mxu2 %v5442_v39 }
  0xdf   : > { %v5434_v18 = vpop.f32.mrf.mxu3  ;;  %v5436_v24 = vpop.f32.mrf.mxu0 }
  0xe0   : > { %v5438_v25 = vpop.f32.mrf.mxu1 }
  0xe7   : > { %v5444_v40 = vpop.f32.mrf.mxu3  ;;  %v1406_v45 = vpop.f32.mrf.mxu0 }
  0xe8   : > { %v1485_v46 = vpop.f32.mrf.mxu1 }
  0xe9   : > { %v5449_v47 = vadd.f32 %v1485_v46, %v1406_v45  ;;  %v474_v45 = vld [vmem:[%s5277_s1 + $0xd2] sm:$0xff]  ;;  %v475_v46 = vld [vmem:[%s5277_s1 + $0xda] sm:$0xff] }
  0xea   : > { %1445 = vmatmul.bf16.gmra.mxu0 %v5446_v44  ;;  %v502_v48 = vpack.c.bf16 %v474_v45, %v474_v45  ;;  %v503_v52 = vpack.c.bf16 %v475_v46, %v475_v46 }
  0xec   : > { %1657 = vmatmul.bf16.gmra.mxu3 %v5374_v50  ;;  %v750_v1 = vunpack.c.l.b16 %v502_v48  ;;  %v751_v2 = vunpack.c.l.b16 %v503_v52  ;;  %v581_v52 = vunpack.c.l.b16 %v389_v35  ;;  %v390_v35 = vpack.c.bf16 %v362_v31, %v362_v31 }
  0xee   : > { %1618 = vmatmul.bf16.gmra.mxu2 %v5463_v12  ;;  %v5484_v3 = vpack.c.b16 %v751_v2, %v750_v1  ;;  %v4759_v12 = vld [vmem:[#allocation7 + $0x130] sm:$0xff] }
  0xef   : > { %v5455_v53 = vpop.f32.mrf.mxu3  ;;  %v5457_v63 = vpop.f32.mrf.mxu0 }
  0xf0   : > { %v5459_v0 = vpop.f32.mrf.mxu1  ;;  %6782 = vst [vmem:[#allocation34_spill] sm:$0xff] %v5484_v3 }
  0xf7   : > { %v5465_v16 = vpop.f32.mrf.mxu3  ;;  %v1411_v19 = vpop.f32.mrf.mxu0 }
  0xf8   : > { %6777 = vst [vmem:[#allocation29_spill] sm:$0xff] %v5465_v16  ;;  %v1490_v20 = vpop.f32.mrf.mxu1 }
  0xf9   : > { %v5470_v30 = vadd.f32 %v1490_v20, %v1411_v19  ;;  %v1584_v19 = vpop.f32.mrf.mxu2  ;;  %v360_v20 = vld [vmem:[%s5277_s1 + $0xc0] sm:$0xff] }
  0xfa   : > { %1450 = vmatmul.bf16.gmra.mxu0 %v5467_v17  ;;  %v388_v34 = vpack.c.bf16 %v360_v20, %v360_v20 }
  0xfb   : > { %6779 = vst [vmem:[#allocation31_spill] sm:$0xff] %v5470_v30 }
  0xfc   : > { %1662 = vmatmul.bf16.gmra.mxu3 %v5390_v13  ;;  %v580_v48 = vunpack.c.l.b16 %v388_v34 }
  0xfe   : > { %1623 = vmatmul.bf16.gmra.mxu2 %v5484_v3  ;;  %v5507_v1 = vpack.c.b16 %v581_v52, %v580_v48  ;;  %v4760_v3 = vld [vmem:[#allocation7 + $0x138] sm:$0xff] }
  0xff   : > { %v5476_v33 = vpop.f32.mrf.mxu3  ;;  %v5478_v36 = vpop.f32.mrf.mxu0  ;;  %1708 = vmatpush.bf16.msra.mxu0 %v4760_v3 }
 0x100   : > { %6780 = vst [vmem:[#allocation32_spill] sm:$0xff] %v5478_v36  ;;  %v5480_v37 = vpop.f32.mrf.mxu1 }
 0x101   : > { %6781 = vst [vmem:[#allocation33_spill] sm:$0xff] %v5480_v37  ;;  %v5503_v54 = vpop.f32.mrf.mxu2 }
 0x102   : > { %6789 = vst [vmem:[#allocation41_spill] sm:$0xff] %v5507_v1 }
 0x103   : > { %1709 = vmatpush.bf16.msra.mxu0 %v4759_v12 }
 0x107   : > { %v5486_v4 = vpop.f32.mrf.mxu3  ;;  %v1416_v6 = vpop.f32.mrf.mxu0 }
 0x108   : > { %6783 = vst [vmem:[#allocation35_spill] sm:$0xff] %v5486_v4  ;;  %v1495_v7 = vpop.f32.mrf.mxu1  ;;  %v4774_v4 = vld [vmem:[#allocation7 + $0x1a8] sm:$0xff] }
 0x109   : > { %v5491_v11 = vadd.f32 %v1495_v7, %v1416_v6  ;;  %v1589_v20 = vpop.f32.mrf.mxu2 }
 0x10a   : > { %1455 = vmatmul.bf16.gmra.mxu0 %v5488_v5 }
 0x10b   : > { %6785 = vst [vmem:[#allocation37_spill] sm:$0xff] %v5491_v11  ;;  %v4755_v11 = vld [vmem:[#allocation7 + $0x110] sm:$0xff] }
 0x10c   : > { %1667 = vmatmul.bf16.gmra.mxu3 %v5406_v42 }
 0x10f   : > { %v5497_v32 = vpop.f32.mrf.mxu3  ;;  %v5499_v45 = vpop.f32.mrf.mxu0 }
 0x110   : > { %6786 = vst [vmem:[#allocation38_spill] sm:$0xff] %v5499_v45  ;;  %v5501_v46 = vpop.f32.mrf.mxu1  ;;  %v451_v45 = vld [vmem:[%s5277_s1 + $0x1a] sm:$0xff] }
 0x111   : > { %6787 = vst [vmem:[#allocation39_spill] sm:$0xff] %v5501_v46  ;;  %v5521_v23 = vpop.f32.mrf.mxu2  ;;  %v450_v46 = vld [vmem:[%s5277_s1 + $0x12] sm:$0xff] }
 0x117   : > { %v5505_v56 = vpop.f32.mrf.mxu3  ;;  %v1421_v2 = vpop.f32.mrf.mxu0 }
 0x118   : > { %6788 = vst [vmem:[#allocation40_spill] sm:$0xff] %v5505_v56  ;;  %v1500_v6 = vpop.f32.mrf.mxu1 }
 0x119   : > { %v5509_v7 = vadd.f32 %v1500_v6, %v1421_v2  ;;  %v582_v2 = vunpack.c.l.b16 %v390_v35  ;;  %v583_v6 = vunpack.c.l.b16 %v391_v62  ;;  %v449_v35 = vld [vmem:[%s5277_s1 + $0xa] sm:$0xff]  ;;  %v1594_v12 = vpop.f32.mrf.mxu2 }
 0x11a   : > { %1460 = vmatmul.bf16.gmra.mxu0 %v5507_v1  ;;  %v477_v38 = vpack.c.bf16 %v449_v35, %v449_v35 }
 0x11b   : > { %6790 = vst [vmem:[#allocation42_spill] sm:$0xff] %v5509_v7  ;;  %v5525_v59 = vpack.c.b16 %v583_v6, %v582_v2  ;;  %v4758_v7 = vld [vmem:[#allocation7 + $0x128] sm:$0xff] }
 0x11c   : > { %1672 = vmatmul.bf16.gmra.mxu3 %v5422_v9  ;;  %1710 = vmatpush.bf16.msra.mxu0 %v4758_v7 }
 0x11d   : > { %6794 = vst [vmem:[#allocation46_spill] sm:$0xff] %v5525_v59 }
 0x11f   : > { %v5515_v34 = vpop.f32.mrf.mxu3  ;;  %v5517_v48 = vpop.f32.mrf.mxu0 }
 0x120   : > { %6791 = vst [vmem:[#allocation43_spill] sm:$0xff] %v5517_v48  ;;  %v5519_v52 = vpop.f32.mrf.mxu1 }
 0x121   : > { %6792 = vst [vmem:[#allocation44_spill] sm:$0xff] %v5519_v52  ;;  %v448_v52 = vld [vmem:[%s5277_s1 + $0x2] sm:$0xff] }
 0x122   : > { %v476_v48 = vpack.c.bf16 %v448_v52, %v448_v52  ;;  %v4757_v52 = vld [vmem:[#allocation7 + $0x120] sm:$0xff] }
 0x123   : > { %1711 = vmatpush.bf16.msra.mxu0 %v4757_v52 }
 0x127   : > { %v5523_v39 = vpop.f32.mrf.mxu3  ;;  %v1426_v3 = vpop.f32.mrf.mxu0 }
 0x128   : > { %6793 = vst [vmem:[#allocation45_spill] sm:$0xff] %v5523_v39  ;;  %v1505_v8 = vpop.f32.mrf.mxu1 }
 0x129   : > { %v1506_v31 = vadd.f32 %v1505_v8, %v1426_v3  ;;  %v724_v8 = vunpack.c.l.b16 %v476_v48  ;;  %v479_v48 = vpack.c.bf16 %v451_v45, %v451_v45 }
 0x12a   : > { %1465 = vmatmul.bf16.gmra.mxu0 %v5525_v59 }
 0x12b   : > { %v5527_v29 = vadd.f32 %v1584_v19, %v1506_v31  ;;  %v725_v19 = vunpack.c.l.b16 %v477_v38  ;;  %v478_v38 = vpack.c.bf16 %v450_v46, %v450_v46  ;;  %v4776_v46 = vld [vmem:[#allocation7 + $0x1b8] sm:$0xff] }
 0x12c   : > { %1677 = vmatmul.bf16.gmra.mxu3 %v5446_v44  ;;  %1866 = vmatpush.bf16.msrb.mxu2 %v4776_v46 }
 0x12d   : > { %v752_v31 = vpack.c.b16 %v725_v19, %v724_v8 }
 0x12f   : > { %v5533_v62 = vpop.f32.mrf.mxu3  ;;  %v5535_v2 = vpop.f32.mrf.mxu0 }
 0x130   : > { %6795 = vst [vmem:[#allocation47_spill] sm:$0xff] %v5533_v62  ;;  %v5537_v6 = vpop.f32.mrf.mxu1  ;;  %v5541_v62 = vpop.f32.mrf.mxu2 }
 0x137   : > { %v5539_v3 = vpop.f32.mrf.mxu3  ;;  %v1431_v39 = vpop.f32.mrf.mxu0 }
 0x138   : > { %6796 = vst [vmem:[#allocation48_spill] sm:$0xff] %v5539_v3  ;;  %v1510_v56 = vpop.f32.mrf.mxu1 }
 0x139   : > { %v1511_v41 = vadd.f32 %v1510_v56, %v1431_v39  ;;  %v726_v39 = vunpack.c.l.b16 %v478_v38  ;;  %v727_v56 = vunpack.c.l.b16 %v479_v48  ;;  %v4784_v38 = vld [vmem:[#allocation7 + $0x1f8] sm:$0xff]  ;;  %v452_v48 = vld [vmem:[%s5277_s1 + $0x22] sm:$0xff] }
 0x13a   : > { %1558 = vmatmul.bf16.vlgmr.msrb.gmra.mxu0 %v752_v31  ;;  %1945 = vmatpush.bf16.msra.mxu3 %v4784_v38  ;;  %v4782_v38 = vld [vmem:[#allocation7 + $0x1e8] sm:$0xff] }
 0x13b   : > { %v5543_v35 = vadd.f32 %v1589_v20, %v1511_v41  ;;  %v1599_v41 = vpop.f32.mrf.mxu2  ;;  %v4756_v20 = vld [vmem:[#allocation7 + $0x118] sm:$0xff]  ;;  %v5556_v31 = vpack.c.b16 %v727_v56, %v726_v39  ;;  %v4775_v56 = vld [vmem:[#allocation7 + $0x1b0] sm:$0xff] }
 0x13c   : > { %1682 = vmatmul.bf16.gmra.mxu3 %v5467_v17  ;;  %1712 = vmatpush.bf16.msra.mxu0 %v4756_v20  ;;  %v453_v17 = vld [vmem:[%s5277_s1 + $0x2a] sm:$0xff]  ;;  %v4768_v39 = vld [vmem:[#allocation7 + $0x178] sm:$0xff] }
 0x13d   : > { %1787 = vmatpush.bf16.msrb.mxu1 %v4768_v39  ;;  %1867 = vmatpush.bf16.msrb.mxu2 %v4775_v56  ;;  %v4754_v56 = vld [vmem:[#allocation7 + $0x108] sm:$0xff] }
 0x13f   : > { %v5548_v7 = vpop.f32.mrf.mxu3  ;;  %v5550_v3 = vpop.f32.mrf.mxu0 }
 0x140   : > { %6797 = vst [vmem:[#allocation49_spill] sm:$0xff] %v5548_v7  ;;  %v5552_v8 = vpop.f32.mrf.mxu1  ;;  %1713 = vmatpush.bf16.msra.mxu0 %v4755_v11  ;;  %v4766_v11 = vld [vmem:[#allocation7 + $0x168] sm:$0xff] }
 0x141   : > { %1868 = vmatpush.bf16.msrb.mxu2 %v4774_v4  ;;  %v4765_v4 = vld [vmem:[#allocation7 + $0x160] sm:$0xff] }
 0x143   : > { %v5564_v20 = vpop.f32.mrf.mxu2 }
 0x144   : > { %1714 = vmatpush.bf16.msra.mxu0 %v4754_v56 }
 0x147   : > { %v5554_v19 = vpop.f32.mrf.mxu3  ;;  %v1436_v52 = vpop.f32.mrf.mxu0 }
 0x148   : > { %6798 = vst [vmem:[#allocation50_spill] sm:$0xff] %v5554_v19  ;;  %v1515_v10 = vpop.f32.mrf.mxu1 }
 0x149   : > { %v1516_v7 = vadd.f32 %v1515_v10, %v1436_v52  ;;  %v480_v10 = vpack.c.bf16 %v452_v48, %v452_v48 }
 0x14a   : > { %1563 = vmatmul.bf16.gmra.mxu0 %v5556_v31 }
 0x14b   : > { %v5558_v45 = vadd.f32 %v1594_v12, %v1516_v7  ;;  %v481_v12 = vpack.c.bf16 %v453_v17, %v453_v17  ;;  %v4783_v7 = vld [vmem:[#allocation7 + $0x1f0] sm:$0xff]  ;;  %v728_v57 = vunpack.c.l.b16 %v480_v10  ;;  %v1604_v39 = vpop.f32.mrf.mxu2 }
 0x14c   : > { %1687 = vmatmul.bf16.gmra.mxu3 %v5488_v5  ;;  %v4767_v5 = vld [vmem:[#allocation7 + $0x170] sm:$0xff] }
 0x14d   : > { %1946 = vmatpush.bf16.msra.mxu3 %v4783_v7  ;;  %v729_v37 = vunpack.c.l.b16 %v481_v12  ;;  %1788 = vmatpush.bf16.msrb.mxu1 %v4767_v5  ;;  %v4781_v7 = vld [vmem:[#allocation7 + $0x1e0] sm:$0xff]  ;;  %v4772_v5 = vld [vmem:[#allocation7 + $0x198] sm:$0xff] }
 0x14f   : > { %v5566_v19 = vpop.f32.mrf.mxu3  ;;  %v5568_v52 = vpop.f32.mrf.mxu0  ;;  %v5574_v17 = vpack.c.b16 %v729_v37, %v728_v57  ;;  %v4780_v57 = vld [vmem:[#allocation7 + $0x1d8] sm:$0xff] }
 0x150   : > { %6799 = vst [vmem:[#allocation51_spill] sm:$0xff] %v5566_v19  ;;  %v5570_v46 = vpop.f32.mrf.mxu1  ;;  %v4773_v19 = vld [vmem:[#allocation7 + $0x1a0] sm:$0xff]  ;;  %v454_v37 = vld [vmem:[%s5277_s1 + $0x32] sm:$0xff] }
 0x151   : > { %1947 = vmatpush.bf16.msra.mxu3 %v4782_v38  ;;  %1789 = vmatpush.bf16.msrb.mxu1 %v4766_v11  ;;  %v4764_v11 = vld [vmem:[#allocation7 + $0x158] sm:$0xff] }
 0x152   : > { %1869 = vmatpush.bf16.msrb.mxu2 %v4773_v19  ;;  %v455_v19 = vld [vmem:[%s5277_s1 + $0x3a] sm:$0xff] }
 0x153   : > { %v483_v56 = vpack.c.bf16 %v455_v19, %v455_v19  ;;  %v4769_v19 = vld [vmem:[#allocation7 + $0x180] sm:$0xff] }
 0x155   : > { %1948 = vmatpush.bf16.msra.mxu3 %v4781_v7  ;;  %1790 = vmatpush.bf16.msrb.mxu1 %v4765_v4  ;;  %v4779_v7 = vld [vmem:[#allocation7 + $0x1d0] sm:$0xff]  ;;  %v4770_v4 = vld [vmem:[#allocation7 + $0x188] sm:$0xff] }
 0x156   : > { %1870 = vmatpush.bf16.msrb.mxu2 %v4772_v5  ;;  %v731_v5 = vunpack.c.l.b16 %v483_v56  ;;  %v4761_v56 = vld [vmem:[#allocation7 + $0x140] sm:$0xff] }
 0x157   : > { %v5572_v48 = vpop.f32.mrf.mxu3  ;;  %v1441_v36 = vpop.f32.mrf.mxu0 }
 0x158   : > { %6800 = vst [vmem:[#allocation52_spill] sm:$0xff] %v5572_v48  ;;  %v1520_v10 = vpop.f32.mrf.mxu1  ;;  %v4771_v48 = vld [vmem:[#allocation7 + $0x190] sm:$0xff] }
 0x159   : > { %v1521_v12 = vadd.f32 %v1520_v10, %v1441_v36  ;;  %1949 = vmatpush.bf16.msra.mxu3 %v4780_v57  ;;  %v482_v36 = vpack.c.bf16 %v454_v37, %v454_v37  ;;  %1791 = vmatpush.bf16.msrb.mxu1 %v4764_v11  ;;  %v4753_v10 = vld [vmem:[#allocation7 + $0x100] sm:$0xff]  ;;  %v4778_v57 = vld [vmem:[#allocation7 + $0x1c8] sm:$0xff] }
 0x15a   : > { %1568 = vmatmul.bf16.gmra.mxu0 %v5574_v17  ;;  %1871 = vmatpush.bf16.msrb.mxu2 %v4771_v48  ;;  %v4762_v37 = vld [vmem:[#allocation7 + $0x148] sm:$0xff] }
 0x15b   : > { %v5576_v38 = vadd.f32 %v1599_v41, %v1521_v12  ;;  %v4763_v12 = vld [vmem:[#allocation7 + $0x150] sm:$0xff]  ;;  %v730_v44 = vunpack.c.l.b16 %v482_v36  ;;  %1715 = vmatpush.bf16.msra.mxu0 %v4753_v10 }
 0x15c   : > { %1692 = vmatmul.bf16.gmra.mxu3 %v5507_v1  ;;  %v5586_v1 = vpop.f32.mrf.mxu2 }
 0x15d   : > { %1950 = vmatpush.bf16.msra.mxu3 %v4779_v7  ;;  %1792 = vmatpush.bf16.msrb.mxu1 %v4763_v12  ;;  %v5590_v48 = vpack.c.b16 %v731_v5, %v730_v44  ;;  %v4777_v7 = vld [vmem:[#allocation7 + $0x1c0] sm:$0xff]  ;;  %v4792_v5 = vld [vmem:[#allocation7 + $0x238] sm:$0xff] }
 0x15e   : > { %1872 = vmatpush.bf16.msrb.mxu2 %v4770_v4  ;;  %v456_v12 = vld [vmem:[%s5277_s1 + $0x42] sm:$0xff]  ;;  %v457_v4 = vld [vmem:[%s5277_s1 + $0x4a] sm:$0xff] }
 0x15f   : > { %v5582_v43 = vpop.f32.mrf.mxu3  ;;  %v5584_v41 = vpop.f32.mrf.mxu0  ;;  %2024 = vmatpush.bf16.msrb.mxu0 %v4792_v5 }
 0x160   : > { %6801 = vst [vmem:[#allocation53_spill] sm:$0xff] %v5582_v43 }
 0x161   : > { %1951 = vmatpush.bf16.msra.mxu3 %v4778_v57  ;;  %1793 = vmatpush.bf16.msrb.mxu1 %v4762_v37  ;;  %v504_v57 = vld [vmem:[%s5277_s1 + $0xe0] sm:$0xff]  ;;  %v505_v37 = vld [vmem:[%s5277_s1 + $0xe8] sm:$0xff] }
 0x162   : > { %1873 = vmatpush.bf16.msrb.mxu2 %v4769_v19 }
 0x164   : > { %v1609_v44 = vpop.f32.mrf.mxu2 }
 0x165   : > { %1952 = vmatpush.bf16.msra.mxu3 %v4777_v7  ;;  %1874 = vmatmul.bf16.vlgmr.msrb.gmra.mxu2 %v5317_v21  ;;  %v506_v7 = vpack.c.bf16 %v504_v57, %v504_v57  ;;  %v507_v21 = vpack.c.bf16 %v505_v37, %v505_v37 }
 0x166   : > { %1794 = vmatpush.bf16.msrb.mxu1 %v4761_v56 }
 0x167   : > { %v5588_v11 = vpop.f32.mrf.mxu3  ;;  %v1446_v43 = vpop.f32.mrf.mxu0  ;;  %v783_v30 = vunpack.c.l.b16 %v507_v21 }
 0x168   : > { %6802 = vst [vmem:[#allocation54_spill] sm:$0xff] %v5588_v11  ;;  %v1526_v36 = vadd.f32 %v5434_v18, %v1446_v43  ;;  %v484_v43 = vpack.c.bf16 %v456_v12, %v456_v12  ;;  %v485_v18 = vpack.c.bf16 %v457_v4, %v457_v4 }
 0x169   : > { %1795 = vmatmul.bf16.vlgmr.msrb.gmra.mxu1 %v5556_v31 }
 0x16a   : > { %v5593_v10 = vadd.f32 %v1604_v39, %v1526_v36  ;;  %1573 = vmatmul.bf16.gmra.mxu0 %v5590_v48  ;;  %v732_v36 = vunpack.c.l.b16 %v484_v43  ;;  %v733_v11 = vunpack.c.l.b16 %v485_v18  ;;  %v4791_v43 = vld [vmem:[#allocation7 + $0x230] sm:$0xff] }
 0x16b   : > { %2025 = vmatpush.bf16.msrb.mxu0 %v4791_v43 }
 0x16c   : > { %1697 = vmatmul.bf16.gmra.mxu3 %v5525_v59  ;;  %v782_v59 = vunpack.c.l.b16 %v506_v7  ;;  %v5607_v16 = vpop.f32.mrf.mxu2  ;;  %v5611_v49 = vpack.c.b16 %v733_v11, %v732_v36 }
 0x16f   : > { %v5602_v19 = vpop.f32.mrf.mxu3  ;;  %v5605_v39 = vpop.f32.mrf.mxu0 }
 0x170   : > { %6803 = vst [vmem:[#allocation55_spill] sm:$0xff] %v5602_v19  ;;  %v5613_v19 = vpack.c.b16 %v783_v30, %v782_v59 }
 0x174   : > { %v1614_v59 = vpop.f32.mrf.mxu2 }
 0x175   : > { %1879 = vmatmul.bf16.gmra.mxu2 %v5336_v60 }
 0x177   : > { %v5609_v56 = vpop.f32.mrf.mxu3  ;;  %v1451_v5 = vpop.f32.mrf.mxu0 }
 0x178   : > { %v1531_v12 = vadd.f32 %v5455_v53, %v1451_v5  ;;  %v1508_v53 = vadd.f32 %v5537_v6, %v5535_v2 }
 0x179   : > { %1800 = vmatmul.bf16.gmra.mxu1 %v5574_v17 }
 0x17a   : > { %v5616_v31 = vadd.f32 %v1609_v44, %v1531_v12  ;;  %1578 = vmatmul.bf16.gmra.mxu0 %v5611_v49  ;;  %v1587_v30 = vadd.f32 %v5503_v54, %v1508_v53 }
 0x17c   : > { %1702 = vmatmul.bf16.gmra.mxu3 %v5613_v19  ;;  %v5633_v7 = vpop.f32.mrf.mxu2 }
 0x17f   : > { %v1663_v4 = vpop.f32.mrf.mxu3  ;;  %v5625_v11 = vpop.f32.mrf.mxu0 }
 0x180   : > { %v5623_v57 = vadd.f32 %v1663_v4, %v5527_v29 }
 0x184   : > { %v1619_v21 = vpop.f32.mrf.mxu2 }
 0x185   : > { %1884 = vmatmul.bf16.gmra.mxu2 %v5356_v27 }
 0x187   : > { %v1665_v44 = vpop.f32.mrf.mxu3  ;;  %v1456_v60 = vpop.f32.mrf.mxu0 }
 0x188   : > { %v5630_v37 = vadd.f32 %v1665_v44, %v1587_v30  ;;  %v1536_v18 = vadd.f32 %v5476_v33, %v1456_v60  ;;  %v1513_v33 = vadd.f32 %v5552_v8, %v5550_v3 }
 0x189   : > { %1805 = vmatmul.bf16.gmra.mxu1 %v5590_v48 }
 0x18a   : > { %v5635_v29 = vadd.f32 %v1614_v59, %v1536_v18  ;;  %1716 = vmatmul.bf16.vlgmr.msra.gmra.mxu0 %v5304_v58  ;;  %v1592_v36 = vadd.f32 %v5521_v23, %v1513_v33  ;;  %v4790_v59 = vld [vmem:[#allocation7 + $0x228] sm:$0xff] }
 0x18b   : > { %2026 = vmatpush.bf16.msrb.mxu0 %v4790_v59 }
 0x18c   : > { %1953 = vmatmul.bf16.vlgmr.msra.gmra.mxu3 %v5319_v22 }
 0x18f   : > { %v1668_v2 = vpop.f32.mrf.mxu3  ;;  %v5644_v6 = vpop.f32.mrf.mxu0 }
 0x190   : > { %v5642_v54 = vadd.f32 %v1668_v2, %v5543_v35  ;;  %v5657_v35 = vpop.f32.mrf.mxu2 }
 0x195   : > { %1889 = vmatmul.bf16.gmra.mxu2 %v5374_v50 }
 0x197   : > { %v1670_v5 = vpop.f32.mrf.mxu3  ;;  %v1461_v27 = vpop.f32.mrf.mxu0 }
 0x198   : > { %v5649_v58 = vadd.f32 %v1670_v5, %v1592_v36  ;;  %v1541_v12 = vadd.f32 %v5497_v32, %v1461_v27  ;;  %v1518_v32 = vadd.f32 %v5570_v46, %v5568_v52  ;;  %v1624_v44 = vpop.f32.mrf.mxu2  ;;  %v4789_v36 = vld [vmem:[#allocation7 + $0x220] sm:$0xff] }
 0x199   : > { %1810 = vmatmul.bf16.gmra.mxu1 %v5611_v49  ;;  %2027 = vmatpush.bf16.msrb.mxu0 %v4789_v36  ;;  %v6813_v36 = vld [vmem:[#allocation37_spill] sm:$0xff] }
 0x19a   : > { %v5652_v4 = vadd.f32 %v1619_v21, %v1541_v12  ;;  %1721 = vmatmul.bf16.gmra.mxu0 %v5319_v22  ;;  %v1597_v22 = vadd.f32 %v5541_v62, %v1518_v32 }
 0x19c   : > { %1958 = vmatmul.bf16.gmra.mxu3 %v5338_v61 }
 0x19f   : > { %v1673_v3 = vpop.f32.mrf.mxu3  ;;  %v5663_v8 = vpop.f32.mrf.mxu0 }
 0x1a0   : > { %v5661_v23 = vadd.f32 %v1673_v3, %v5558_v45  ;;  %v1522_v45 = vpop.f32.mrf.mxu1 }
 0x1a1   : > { %v1523_v18 = vadd.f32 %v1522_v45, %v5584_v41 }
 0x1a5   : > { %1894 = vmatmul.bf16.gmra.mxu2 %v5390_v13 }
 0x1a7   : > { %v1675_v50 = vpop.f32.mrf.mxu3  ;;  %v1466_v30 = vpop.f32.mrf.mxu0 }
 0x1a8   : > { %v5668_v53 = vadd.f32 %v1675_v50, %v1597_v22  ;;  %v1546_v60 = vadd.f32 %v5515_v34, %v1466_v30  ;;  %v1602_v34 = vadd.f32 %v5564_v20, %v1523_v18  ;;  %v6806_v50 = vld [vmem:[#allocation31_spill] sm:$0xff]  ;;  %v4788_v30 = vld [vmem:[#allocation7 + $0x218] sm:$0xff] }
 0x1a9   : > { %1815 = vmatmul.bf16.gmra.mxu1 %v5334_v55  ;;  %2028 = vmatpush.bf16.msrb.mxu0 %v4788_v30  ;;  %v6820_v30 = vld [vmem:[#allocation42_spill] sm:$0xff] }
 0x1aa   : > { %v5671_v43 = vadd.f32 %v1624_v44, %v1546_v60  ;;  %1726 = vmatmul.bf16.gmra.mxu0 %v5338_v61  ;;  %v6809_v44 = vld [vmem:[#allocation32_spill] sm:$0xff]  ;;  %v6810_v60 = vld [vmem:[#allocation33_spill] sm:$0xff] }
 0x1ac   : > { %1963 = vmatmul.bf16.gmra.mxu3 %v5358_v28 }
 0x1af   : > { %v1678_v52 = vpop.f32.mrf.mxu3  ;;  %v5680_v46 = vpop.f32.mrf.mxu0 }
 0x1b0   : > { %v5678_v62 = vadd.f32 %v1678_v52, %v5576_v38  ;;  %v1483_v38 = vadd.f32 %v5438_v25, %v5436_v24 }
 0x1b5   : > { %1899 = vmatmul.bf16.gmra.mxu2 %v5406_v42 }
 0x1b7   : > { %v1680_v2 = vpop.f32.mrf.mxu3  ;;  %v1559_v61 = vpop.f32.mrf.mxu0 }
 0x1b8   : > { %v5684_v33 = vadd.f32 %v1680_v2, %v1602_v34  ;;  %v5687_v13 = vadd.f32 %v1559_v61, %v5427_v15 }
 0x1b9   : > { %1820 = vmatmul.bf16.gmra.mxu1 %v5354_v26 }
 0x1ba   : > { %1731 = vmatmul.bf16.gmra.mxu0 %v5358_v28  ;;  %v1528_v28 = vadd.f32 %v5444_v40, %v5605_v39  ;;  %v6804_v39 = vld [vmem:[#allocation20_spill] sm:$0xff] }
 0x1bc   : > { %1968 = vmatmul.bf16.gmra.mxu3 %v5376_v51  ;;  %v1607_v42 = vadd.f32 %v5586_v1, %v1528_v28 }
 0x1bf   : > { %v1683_v21 = vpop.f32.mrf.mxu3  ;;  %v1561_v41 = vpop.f32.mrf.mxu0 }
 0x1c0   : > { %v5696_v20 = vadd.f32 %v1683_v21, %v5593_v10  ;;  %v5698_v5 = vadd.f32 %v1561_v41, %v1483_v38  ;;  %v1488_v10 = vadd.f32 %v5459_v0, %v5457_v63  ;;  %v6807_v0 = vld [vmem:[#allocation27_spill] sm:$0xff] }
 0x1c5   : > { %1904 = vmatmul.bf16.gmra.mxu2 %v5422_v9 }
 0x1c7   : > { %v1685_v15 = vpop.f32.mrf.mxu3  ;;  %v1564_v24 = vpop.f32.mrf.mxu0 }
 0x1c8   : > { %v5703_v27 = vadd.f32 %v1685_v15, %v1607_v42  ;;  %v5706_v25 = vadd.f32 %v1564_v24, %v5449_v47  ;;  %v6805_v47 = vld [vmem:[#allocation29_spill] sm:$0xff]  ;;  %v6814_v42 = vld [vmem:[#allocation30_spill] sm:$0xff]  ;;  %v6817_v24 = vld [vmem:[#allocation39_spill] sm:$0xff] }
 0x1c9   : > { %1825 = vmatmul.bf16.gmra.mxu1 %v6804_v39  ;;  %v1533_v59 = vadd.f32 %v6805_v47, %v5625_v11  ;;  %v1493_v11 = vadd.f32 %v6810_v60, %v6809_v44  ;;  %v6816_v15 = vld [vmem:[#allocation38_spill] sm:$0xff]  ;;  %v1626_v60 = vpop.f32.mrf.mxu2 }
 0x1ca   : > { %1736 = vmatmul.bf16.gmra.mxu0 %v5376_v51 }
 0x1cb   : > { %v1612_v51 = vadd.f32 %v5607_v16, %v1533_v59  ;;  %v6811_v16 = vld [vmem:[#allocation21_spill] sm:$0xff]  ;;  %v6819_v59 = vld [vmem:[#allocation40_spill] sm:$0xff] }
 0x1cc   : > { %1973 = vmatmul.bf16.gmra.mxu3 %v5392_v14 }
 0x1cf   : > { %v1688_v40 = vpop.f32.mrf.mxu3  ;;  %v1566_v12 = vpop.f32.mrf.mxu0 }
 0x1d0   : > { %v5715_v1 = vadd.f32 %v1688_v40, %v5616_v31  ;;  %v5717_v3 = vadd.f32 %v1566_v12, %v1488_v10  ;;  %v6808_v31 = vld [vmem:[#allocation23_spill] sm:$0xff]  ;;  %v1498_v10 = vadd.f32 %v6817_v24, %v6816_v15 }
 0x1d5   : > { %1909 = vmatmul.bf16.gmra.mxu2 %v6807_v0 }
 0x1d7   : > { %v1690_v9 = vpop.f32.mrf.mxu3  ;;  %v1569_v22 = vpop.f32.mrf.mxu0 }
 0x1d8   : > { %v5722_v32 = vadd.f32 %v1690_v9, %v1612_v51  ;;  %v5725_v63 = vadd.f32 %v1569_v22, %v6806_v50  ;;  %v1543_v51 = vadd.f32 %v6819_v59, %v5663_v8  ;;  %v6824_v8 = vld [vmem:[#allocation44_spill] sm:$0xff] }
 0x1d9   : > { %1830 = vmatmul.bf16.gmra.mxu1 %v6811_v16 }
 0x1da   : > { %1741 = vmatmul.bf16.gmra.mxu0 %v5392_v14  ;;  %v6812_v14 = vld [vmem:[#allocation35_spill] sm:$0xff]  ;;  %v1622_v9 = vadd.f32 %v5657_v35, %v1543_v51 }
 0x1db   : > { %v1538_v2 = vadd.f32 %v6812_v14, %v5644_v6  ;;  %v6818_v6 = vld [vmem:[#allocation22_spill] sm:$0xff]  ;;  %v6825_v14 = vld [vmem:[#allocation24_spill] sm:$0xff] }
 0x1dc   : > { %1978 = vmatmul.bf16.gmra.mxu3 %v6808_v31 }
 0x1dd   : > { %v1617_v61 = vadd.f32 %v5633_v7, %v1538_v2 }
 0x1df   : > { %v1693_v45 = vpop.f32.mrf.mxu3  ;;  %v1571_v18 = vpop.f32.mrf.mxu0 }
 0x1e0   : > { %v5734_v52 = vadd.f32 %v1693_v45, %v5635_v29  ;;  %v5736_v34 = vadd.f32 %v1571_v18, %v1493_v11  ;;  %v6815_v29 = vld [vmem:[#allocation25_spill] sm:$0xff]  ;;  %v6822_v11 = vld [vmem:[#allocation15_spill] sm:$0xff] }
 0x1e1   : > { %v6823_v45 = vld [vmem:[#allocation43_spill] sm:$0xff] }
 0x1e2   : > { %v1503_v18 = vadd.f32 %v6824_v8, %v6823_v45  ;;  %v6831_v45 = vld [vmem:[#allocation26_spill] sm:$0xff] }
 0x1e5   : > { %1914 = vmatmul.bf16.gmra.mxu2 %v6814_v42 }
 0x1e6   : > { %v1796_v42 = vpop.f32.mrf.mxu1 }
 0x1e7   : > { %v1695_v38 = vpop.f32.mrf.mxu3  ;;  %v1574_v41 = vpop.f32.mrf.mxu0 }
 0x1e8   : > { %v5741_v21 = vadd.f32 %v1695_v38, %v1617_v61  ;;  %v5744_v28 = vadd.f32 %v1574_v41, %v6813_v36  ;;  %v6826_v41 = vld [vmem:[#allocation45_spill] sm:$0xff] }
 0x1e9   : > { %1835 = vmatmul.bf16.gmra.mxu1 %v6818_v6  ;;  %v1548_v36 = vadd.f32 %v6826_v41, %v5680_v46  ;;  %v4800_v41 = vld [vmem:[#allocation9 + $0x38] sm:$0xff] }
 0x1ea   : > { %1746 = vmatmul.bf16.gmra.mxu0 %v6808_v31  ;;  %v4787_v31 = vld [vmem:[#allocation7 + $0x210] sm:$0xff]  ;;  %3221 = vmatpush.bf16.msra.mxu1 %v4800_v41  ;;  %v6837_v41 = vld [vmem:[#allocation51_spill] sm:$0xff] }
 0x1eb   : > { %2029 = vmatpush.bf16.msrb.mxu0 %v4787_v31  ;;  %v1627_v15 = vadd.f32 %v1626_v60, %v1548_v36 }
 0x1ec   : > { %1983 = vmatmul.bf16.gmra.mxu3 %v6815_v29 }
 0x1ef   : > { %v1698_v40 = vpop.f32.mrf.mxu3  ;;  %v1576_v12 = vpop.f32.mrf.mxu0 }
 0x1f0   : > { %v5753_v7 = vadd.f32 %v1698_v40, %v5652_v4  ;;  %v5755_v47 = vadd.f32 %v1576_v12, %v1498_v10  ;;  %v6821_v4 = vld [vmem:[#allocation36_spill] sm:$0xff]  ;;  %v6827_v10 = vld [vmem:[#allocation47_spill] sm:$0xff] }
 0x1f1   : > { %v1639_v40 = vadd.f32 %v6827_v10, %v5687_v13 }
 0x1f5   : > { %1919 = vmatmul.bf16.gmra.mxu2 %v6821_v4  ;;  %v6830_v4 = vld [vmem:[#allocation48_spill] sm:$0xff] }
 0x1f6   : > { %v1641_v60 = vadd.f32 %v6830_v4, %v5698_v5  ;;  %v6836_v4 = vld [vmem:[#allocation28_spill] sm:$0xff] }
 0x1f7   : > { %v1700_v22 = vpop.f32.mrf.mxu3  ;;  %v1579_v0 = vpop.f32.mrf.mxu0 }
 0x1f8   : > { %v5760_v50 = vadd.f32 %v1700_v22, %v1622_v9  ;;  %v5763_v44 = vadd.f32 %v1579_v0, %v6820_v30  ;;  %v6829_v22 = vld [vmem:[#allocation16_spill] sm:$0xff]  ;;  %v1798_v0 = vpop.f32.mrf.mxu1 }
 0x1f9   : > { %1840 = vmatmul.bf16.gmra.mxu1 %v6825_v14 }
 0x1fa   : > { %1751 = vmatmul.bf16.gmra.mxu0 %v6815_v29  ;;  %v1875_v29 = vpop.f32.mrf.mxu2 }
 0x1fc   : > { %1988 = vmatmul.bf16.gmra.mxu3 %v6822_v11 }
 0x1ff   : > { %v1703_v35 = vpop.f32.mrf.mxu3  ;;  %v1581_v61 = vpop.f32.mrf.mxu0 }
 0x200   : > { %v5772_v2 = vadd.f32 %v1703_v35, %v5671_v43  ;;  %v5774_v38 = vadd.f32 %v1581_v61, %v1503_v18  ;;  %v6828_v43 = vld [vmem:[#allocation41_spill] sm:$0xff]  ;;  %v4808_v18 = vld [vmem:[#allocation9 + $0x78] sm:$0xff]  ;;  %v4786_v61 = vld [vmem:[#allocation7 + $0x208] sm:$0xff] }
 0x201   : > { %3290 = vmatpush.bf16.msra.mxu2 %v4808_v18  ;;  %2030 = vmatpush.bf16.msrb.mxu0 %v4786_v61 }
 0x202   : > { %v1877_v31 = vpop.f32.mrf.mxu2 }
 0x205   : > { %1924 = vmatmul.bf16.gmra.mxu2 %v6828_v43  ;;  %v6834_v43 = vld [vmem:[#allocation17_spill] sm:$0xff] }
 0x207   : > { %v1705_v24 = vpop.f32.mrf.mxu3  ;;  %v1717_v59 = vpop.f32.mrf.mxu0 }
 0x208   : > { %v5780_v12 = vadd.f32 %v1705_v24, %v1627_v15  ;;  %v1718_v51 = vadd.f32 %v1717_v59, %v1639_v40  ;;  %v6832_v15 = vld [vmem:[#allocation49_spill] sm:$0xff] }
 0x209   : > { %1845 = vmatmul.bf16.gmra.mxu1 %v6831_v45  ;;  %v1644_v24 = vadd.f32 %v6832_v15, %v5706_v25  ;;  %v6838_v15 = vld [vmem:[#allocation18_spill] sm:$0xff] }
 0x20a   : > { %v1797_v9 = vadd.f32 %v1796_v42, %v1718_v51  ;;  %1756 = vmatmul.bf16.gmra.mxu0 %v6822_v11  ;;  %v1801_v42 = vpop.f32.mrf.mxu1  ;;  %v1880_v40 = vpop.f32.mrf.mxu2 }
 0x20c   : > { %1993 = vmatmul.bf16.gmra.mxu3 %v6829_v22  ;;  %v1876_v46 = vadd.f32 %v1875_v29, %v1797_v9  ;;  %v6833_v9 = vld [vmem:[#allocation46_spill] sm:$0xff] }
 0x20f   : > { %v1954_v30 = vpop.f32.mrf.mxu3  ;;  %v1719_v8 = vpop.f32.mrf.mxu0 }
 0x210   : > { %v5788_v13 = vadd.f32 %v1954_v30, %v1876_v46  ;;  %v1720_v35 = vadd.f32 %v1719_v8, %v1641_v60 }
 0x212   : > { %v1799_v11 = vadd.f32 %v1798_v0, %v1720_v35  ;;  %v1803_v8 = vpop.f32.mrf.mxu1  ;;  %v1882_v35 = vpop.f32.mrf.mxu2 }
 0x214   : > { %v1878_v36 = vadd.f32 %v1877_v31, %v1799_v11  ;;  %v6835_v31 = vld [vmem:[#allocation50_spill] sm:$0xff] }
 0x215   : > { %1929 = vmatmul.bf16.gmra.mxu2 %v6833_v9  ;;  %v1646_v30 = vadd.f32 %v6835_v31, %v5717_v3  ;;  %v4799_v9 = vld [vmem:[#allocation9 + $0x30] sm:$0xff] }
 0x216   : > { %3222 = vmatpush.bf16.msra.mxu1 %v4799_v9 }
 0x217   : > { %v1956_v29 = vpop.f32.mrf.mxu3  ;;  %v1722_v10 = vpop.f32.mrf.mxu0 }
 0x218   : > { %v5792_v5 = vadd.f32 %v1956_v29, %v1878_v36  ;;  %v1723_v59 = vadd.f32 %v1722_v10, %v1644_v24  ;;  %v1649_v36 = vadd.f32 %v6837_v41, %v5725_v63  ;;  %v4807_v24 = vld [vmem:[#allocation9 + $0x70] sm:$0xff]  ;;  %v6839_v10 = vld [vmem:[#allocation52_spill] sm:$0xff]  ;;  %v6840_v63 = vld [vmem:[#allocation34_spill] sm:$0xff] }
 0x219   : > { %1850 = vmatmul.bf16.gmra.mxu1 %v6836_v4  ;;  %3291 = vmatpush.bf16.msra.mxu2 %v4807_v24 }
 0x21a   : > { %v1802_v51 = vadd.f32 %v1801_v42, %v1723_v59  ;;  %1761 = vmatmul.bf16.gmra.mxu0 %v6829_v22 }
 0x21c   : > { %1998 = vmatmul.bf16.gmra.mxu3 %v6834_v43  ;;  %v1881_v0 = vadd.f32 %v1880_v40, %v1802_v51  ;;  %v1651_v40 = vadd.f32 %v6839_v10, %v5736_v34  ;;  %v4785_v51 = vld [vmem:[#allocation7 + $0x200] sm:$0xff]  ;;  %v6841_v34 = vld [vmem:[#allocation53_spill] sm:$0xff] }
 0x21d   : > { %2031 = vmatpush.bf16.msrb.mxu0 %v4785_v51  ;;  %v6842_v10 = vld [vmem:[#allocation19_spill] sm:$0xff] }
 0x21f   : > { %v1959_v46 = vpop.f32.mrf.mxu3  ;;  %v1724_v60 = vpop.f32.mrf.mxu0 }
 0x220   : > { %v5800_v25 = vadd.f32 %v1959_v46, %v1881_v0  ;;  %v1725_v18 = vadd.f32 %v1724_v60, %v1646_v30 }
 0x222   : > { %v1804_v11 = vadd.f32 %v1803_v8, %v1725_v18  ;;  %v1654_v8 = vadd.f32 %v6841_v34, %v5744_v28  ;;  %v512_v18 = vld [vmem:[%s5277_s1 + $0xe2] sm:$0xff]  ;;  %v6843_v28 = vld [vmem:[#allocation54_spill] sm:$0xff] }
 0x223   : > { %v514_v41 = vpack.c.bf16 %v512_v18, %v512_v18  ;;  %v1656_v9 = vadd.f32 %v6843_v28, %v5755_v47  ;;  %v4798_v47 = vld [vmem:[#allocation9 + $0x28] sm:$0xff] }
 0x224   : > { %v1883_v61 = vadd.f32 %v1882_v35, %v1804_v11  ;;  %v513_v35 = vld [vmem:[%s5277_s1 + $0xea] sm:$0xff]  ;;  %3223 = vmatpush.bf16.msra.mxu1 %v4798_v47 }
 0x225   : > { %1934 = vmatmul.bf16.gmra.mxu2 %v5613_v19  ;;  %v517_v19 = vld [vmem:[%s5277_s1 + $0xf8] sm:$0xff] }
 0x226   : > { %v519_v31 = vpack.c.bf16 %v517_v19, %v517_v19 }
 0x227   : > { %v1961_v22 = vpop.f32.mrf.mxu3  ;;  %v1727_v29 = vpop.f32.mrf.mxu0 }
 0x228   : > { %v5804_v42 = vadd.f32 %v1961_v22, %v1883_v61  ;;  %v5806_v3 = vadd.f32 %v1727_v29, %v1649_v36  ;;  %v801_v60 = vunpack.c.l.b16 %v519_v31  ;;  %v515_v36 = vpack.c.bf16 %v513_v35, %v513_v35  ;;  %v4806_v35 = vld [vmem:[#allocation9 + $0x68] sm:$0xff] }
 0x229   : > { %1855 = vmatmul.bf16.gmra.mxu1 %v6840_v63  ;;  %v794_v29 = vunpack.c.l.b16 %v514_v41  ;;  %3292 = vmatpush.bf16.msra.mxu2 %v4806_v35  ;;  %v521_v41 = vld [vmem:[%s5277_s1 + $0xf9] sm:$0xff] }
 0x22a   : > { %1766 = vmatmul.bf16.gmra.mxu0 %v6834_v43  ;;  %v516_v43 = vld [vmem:[%s5277_s1 + $0xf0] sm:$0xff]  ;;  %v795_v24 = vunpack.c.l.b16 %v515_v36  ;;  %v1661_v36 = vadd.f32 %v5609_v56, %v5774_v38  ;;  %v4797_v38 = vld [vmem:[#allocation9 + $0x20] sm:$0xff] }
 0x22b   : > { %v518_v46 = vpack.c.bf16 %v516_v43, %v516_v43  ;;  %3224 = vmatpush.bf16.msra.mxu1 %v4797_v38  ;;  %v4802_v38 = vld [vmem:[#allocation9 + $0x48] sm:$0xff] }
 0x22c   : > { %2003 = vmatmul.bf16.gmra.mxu3 %v6838_v15  ;;  %v5828_v51 = vpack.c.b16 %v795_v24, %v794_v29 }
 0x22d   : > { %v800_v30 = vunpack.c.l.b16 %v518_v46 }
 0x22f   : > { %v1729_v59 = vpop.f32.mrf.mxu0  ;;  %v802_v61 = vpack.c.b16 %v801_v60, %v800_v30  ;;  %v6844_v60 = vld [vmem:[#allocation55_spill] sm:$0xff] }
 0x230   : > { %v5814_v0 = vadd.f32 %v1729_v59, %v1651_v40  ;;  %v508_v40 = vld [vmem:[%s5277_s1 + $0xe1] sm:$0xff]  ;;  %v509_v59 = vld [vmem:[%s5277_s1 + $0xe9] sm:$0xff]  ;;  %v1659_v34 = vadd.f32 %v6844_v60, %v5763_v44 }
 0x231   : > { %v510_v19 = vpack.c.bf16 %v508_v40, %v508_v40  ;;  %v511_v46 = vpack.c.bf16 %v509_v59, %v509_v59  ;;  %v523_v40 = vpack.c.bf16 %v521_v41, %v521_v41 }
 0x233   : > { %v788_v31 = vunpack.c.l.b16 %v510_v19  ;;  %v789_v30 = vunpack.c.l.b16 %v511_v46  ;;  %v807_v28 = vunpack.c.l.b16 %v523_v40  ;;  %v5888_v40 = vpop.f32.mrf.mxu3 }
 0x235   : > { %1939 = vmatmul.bf16.gmra.mxu2 %v802_v61  ;;  %v790_v18 = vpack.c.b16 %v789_v30, %v788_v31  ;;  %v520_v61 = vld [vmem:[%s5277_s1 + $0xf1] sm:$0xff]  ;;  %v4805_v31 = vld [vmem:[#allocation9 + $0x60] sm:$0xff] }
 0x236   : > { %v522_v24 = vpack.c.bf16 %v520_v61, %v520_v61  ;;  %3293 = vmatpush.bf16.msra.mxu2 %v4805_v31 }
 0x237   : > { %v1732_v11 = vpop.f32.mrf.mxu0 }
 0x238   : > { %v5822_v22 = vadd.f32 %v1732_v11, %v1654_v8  ;;  %v806_v59 = vunpack.c.l.b16 %v522_v24 }
 0x239   : > { %1860 = vmatmul.bf16.gmra.mxu1 %v5828_v51 }
 0x23a   : > { %1771 = vmatmul.bf16.gmra.mxu0 %v6838_v15 }
 0x23c   : > { %2008 = vmatmul.bf16.gmra.mxu3 %v6842_v10 }
 0x23f   : > { %v1734_v43 = vpop.f32.mrf.mxu0 }
 0x240   : > { %v5833_v15 = vadd.f32 %v1734_v43, %v1656_v9  ;;  %v808_v43 = vpack.c.b16 %v807_v28, %v806_v59 }
 0x247   : > { %v1737_v8 = vpop.f32.mrf.mxu0 }
 0x248   : > { %v5837_v11 = vadd.f32 %v1737_v8, %v1659_v34 }
 0x24a   : > { %1776 = vmatmul.bf16.gmra.mxu0 %v6842_v10 }
 0x24c   : > { %2013 = vmatmul.bf16.gmra.mxu3 %v790_v18 }
 0x24f   : > { %v1739_v29 = vpop.f32.mrf.mxu0 }
 0x250   : > { %v5844_v44 = vadd.f32 %v1739_v29, %v1661_v36  ;;  %v4803_v36 = vld [vmem:[#allocation9 + $0x50] sm:$0xff] }
 0x251   : > { %v4795_v29 = vld [vmem:[#allocation9 + $0x10] sm:$0xff] }
 0x257   : > { %v1742_v9 = vpop.f32.mrf.mxu0 }
 0x258   : > { %v5847_v19 = vadd.f32 %v1742_v9, %v5623_v57  ;;  %v5898_v9 = vpop.f32.mrf.mxu3 }
 0x25a   : > { %1781 = vmatmul.bf16.gmra.mxu0 %v790_v18  ;;  %v4804_v18 = vld [vmem:[#allocation9 + $0x58] sm:$0xff] }
 0x25b   : > { %3294 = vmatpush.bf16.msra.mxu2 %v4804_v18 }
 0x25c   : > { %2018 = vmatmul.bf16.gmra.mxu3 %v808_v43 }
 0x25f   : > { %v1744_v10 = vpop.f32.mrf.mxu0  ;;  %3295 = vmatpush.bf16.msra.mxu2 %v4803_v36  ;;  %v4816_v36 = vld [vmem:[#allocation9 + $0xb8] sm:$0xff] }
 0x260   : > { %v5850_v46 = vadd.f32 %v1744_v10, %v5630_v37  ;;  %3359 = vmatpush.bf16.msrb.mxu3 %v4816_v36 }
 0x263   : > { %3296 = vmatpush.bf16.msra.mxu2 %v4802_v38 }
 0x267   : > { %v1747_v56 = vpop.f32.mrf.mxu0 }
 0x268   : > { %v5853_v30 = vadd.f32 %v1747_v56, %v5642_v54  ;;  %v4796_v54 = vld [vmem:[#allocation9 + $0x18] sm:$0xff]  ;;  %v5907_v56 = vpop.f32.mrf.mxu3 }
 0x269   : > { %3225 = vmatpush.bf16.msra.mxu1 %v4796_v54 }
 0x26a   : > { %2032 = vmatmul.bf16.vlgmr.msrb.gmra.mxu0 %v5574_v17 }
 0x26d   : > { %3226 = vmatpush.bf16.msra.mxu1 %v4795_v29 }
 0x26f   : > { %v1749_v60 = vpop.f32.mrf.mxu0 }
 0x270   : > { %v5857_v57 = vadd.f32 %v1749_v60, %v5649_v58  ;;  %v5870_v58 = vpop.f32.mrf.mxu1  ;;  %v4794_v60 = vld [vmem:[#allocation9 + $0x8] sm:$0xff]  ;;  %v5920_v54 = vpop.f32.mrf.mxu3 }
 0x271   : > { %3227 = vmatpush.bf16.msra.mxu1 %v4794_v60  ;;  %v4801_v60 = vld [vmem:[#allocation9 + $0x40] sm:$0xff] }
 0x272   : > { %3297 = vmatpush.bf16.msra.mxu2 %v4801_v60 }
 0x277   : > { %v1752_v34 = vpop.f32.mrf.mxu0 }
 0x278   : > { %v5860_v8 = vadd.f32 %v1752_v34, %v5661_v23 }
 0x27a   : > { %2037 = vmatmul.bf16.gmra.mxu0 %v5590_v48  ;;  %v5875_v48 = vpop.f32.mrf.mxu1 }
 0x27f   : > { %v1754_v37 = vpop.f32.mrf.mxu0 }
 0x280   : > { %v5864_v35 = vadd.f32 %v1754_v37, %v5668_v53 }
 0x282   : > { %6845 = vst [vmem:[#allocation20_spill] sm:$0xff] %v5864_v35  ;;  %v5884_v24 = vpop.f32.mrf.mxu1 }
 0x287   : > { %v1757_v47 = vpop.f32.mrf.mxu0 }
 0x288   : > { %v5867_v17 = vadd.f32 %v1757_v47, %v5678_v62 }
 0x28a   : > { %6846 = vst [vmem:[#allocation29_spill] sm:$0xff] %v5867_v17  ;;  %2042 = vmatmul.bf16.gmra.mxu0 %v5611_v49 }
 0x28f   : > { %v1759_v23 = vpop.f32.mrf.mxu0 }
 0x290   : > { %v5873_v61 = vadd.f32 %v1759_v23, %v5684_v33  ;;  %v5886_v33 = vpop.f32.mrf.mxu2 }
 0x292   : > { %6847 = vst [vmem:[#allocation31_spill] sm:$0xff] %v5873_v61 }
 0x297   : > { %v1762_v41 = vpop.f32.mrf.mxu0 }
 0x298   : > { %v5878_v53 = vadd.f32 %v1762_v41, %v5696_v20  ;;  %v5896_v28 = vpop.f32.mrf.mxu2 }
 0x29a   : > { %6848 = vst [vmem:[#allocation27_spill] sm:$0xff] %v5878_v53  ;;  %2047 = vmatmul.bf16.gmra.mxu0 %v5334_v55  ;;  %v5894_v55 = vpop.f32.mrf.mxu1 }
 0x29f   : > { %v1764_v62 = vpop.f32.mrf.mxu0 }
 0x2a0   : > { %v5882_v49 = vadd.f32 %v1764_v62, %v5703_v27  ;;  %v5905_v31 = vpop.f32.mrf.mxu2 }
 0x2a2   : > { %6849 = vst [vmem:[#allocation23_spill] sm:$0xff] %v5882_v49  ;;  %v5903_v10 = vpop.f32.mrf.mxu1 }
 0x2a7   : > { %v1767_v59 = vpop.f32.mrf.mxu0 }
 0x2a8   : > { %v5891_v20 = vadd.f32 %v1767_v59, %v5715_v1  ;;  %v5915_v37 = vpop.f32.mrf.mxu2 }
 0x2aa   : > { %6850 = vst [vmem:[#allocation32_spill] sm:$0xff] %v5891_v20  ;;  %2052 = vmatmul.bf16.gmra.mxu0 %v5354_v26  ;;  %v5913_v34 = vpop.f32.mrf.mxu1 }
 0x2af   : > { %v1769_v27 = vpop.f32.mrf.mxu0 }
 0x2b0   : > { %v5901_v43 = vadd.f32 %v1769_v27, %v5722_v32  ;;  %v5927_v41 = vpop.f32.mrf.mxu2 }
 0x2b2   : > { %6851 = vst [vmem:[#allocation33_spill] sm:$0xff] %v5901_v43 }
 0x2b7   : > { %v1772_v1 = vpop.f32.mrf.mxu0 }
 0x2b8   : > { %v5910_v26 = vadd.f32 %v1772_v1, %v5734_v52  ;;  %v5925_v52 = vpop.f32.mrf.mxu1  ;;  %v5937_v27 = vpop.f32.mrf.mxu2  ;;  %v4814_v1 = vld [vmem:[#allocation9 + $0xa8] sm:$0xff] }
 0x2ba   : > { %6852 = vst [vmem:[#allocation21_spill] sm:$0xff] %v5910_v26  ;;  %2057 = vmatmul.bf16.gmra.mxu0 %v6804_v39  ;;  %v5930_v39 = vpop.f32.mrf.mxu3 }
 0x2bf   : > { %v1774_v32 = vpop.f32.mrf.mxu0 }
 0x2c0   : > { %v5918_v18 = vadd.f32 %v1774_v32, %v5741_v21  ;;  %v4815_v21 = vld [vmem:[#allocation9 + $0xb0] sm:$0xff]  ;;  %v5935_v59 = vpop.f32.mrf.mxu1  ;;  %v4793_v32 = vld [vmem:[#allocation9] sm:$0xff]  ;;  %v5947_v36 = vpop.f32.mrf.mxu2 }
 0x2c1   : > { %3360 = vmatpush.bf16.msrb.mxu3 %v4815_v21  ;;  %3228 = vmatpush.bf16.msra.mxu1 %v4793_v32 }
 0x2c2   : > { %6853 = vst [vmem:[#allocation35_spill] sm:$0xff] %v5918_v18 }
 0x2c5   : > { %3361 = vmatpush.bf16.msrb.mxu3 %v4814_v1  ;;  %v4810_v1 = vld [vmem:[#allocation9 + $0x88] sm:$0xff] }
 0x2c7   : > { %v1777_v47 = vpop.f32.mrf.mxu0 }
 0x2c8   : > { %v5923_v23 = vadd.f32 %v1777_v47, %v5753_v7  ;;  %v5939_v7 = vpop.f32.mrf.mxu3  ;;  %v5945_v47 = vpop.f32.mrf.mxu1 }
 0x2ca   : > { %6854 = vst [vmem:[#allocation37_spill] sm:$0xff] %v5923_v23  ;;  %2062 = vmatmul.bf16.gmra.mxu0 %v6811_v16 }
 0x2cf   : > { %v1779_v62 = vpop.f32.mrf.mxu0 }
 0x2d0   : > { %v5933_v29 = vadd.f32 %v1779_v62, %v5760_v50  ;;  %v4813_v50 = vld [vmem:[#allocation9 + $0xa0] sm:$0xff]  ;;  %v4812_v62 = vld [vmem:[#allocation9 + $0x98] sm:$0xff]  ;;  %v5949_v21 = vpop.f32.mrf.mxu3  ;;  %v5959_v60 = vpop.f32.mrf.mxu1 }
 0x2d1   : > { %3362 = vmatpush.bf16.msrb.mxu3 %v4813_v50  ;;  %v5961_v50 = vpop.f32.mrf.mxu2 }
 0x2d2   : > { %6855 = vst [vmem:[#allocation30_spill] sm:$0xff] %v5933_v29 }
 0x2d5   : > { %3363 = vmatpush.bf16.msrb.mxu3 %v4812_v62 }
 0x2d7   : > { %v1782_v38 = vpop.f32.mrf.mxu0 }
 0x2d8   : > { %v5942_v16 = vadd.f32 %v1782_v38, %v5772_v2  ;;  %v4811_v38 = vld [vmem:[#allocation9 + $0x90] sm:$0xff]  ;;  %v5975_v26 = vpop.f32.mrf.mxu1 }
 0x2d9   : > { %3364 = vmatpush.bf16.msrb.mxu3 %v4811_v38  ;;  %v4809_v38 = vld [vmem:[#allocation9 + $0x80] sm:$0xff]  ;;  %v5977_v43 = vpop.f32.mrf.mxu2 }
 0x2da   : > { %6856 = vst [vmem:[#allocation25_spill] sm:$0xff] %v5942_v16  ;;  %2067 = vmatmul.bf16.gmra.mxu0 %v6818_v6  ;;  %v5957_v6 = vld [vmem:[%s6704_s2] ss:$0 sm:$0xff] }
 0x2dd   : > { %3365 = vmatpush.bf16.msrb.mxu3 %v4810_v1 }
 0x2df   : > { %v1784_v29 = vpop.f32.mrf.mxu0 }
 0x2e0   : > { %v5952_v2 = vadd.f32 %v1784_v29, %v5780_v12  ;;  %v5967_v12 = vld [vmem:[%s6705_s3] ss:$0 sm:$0xff]  ;;  %v5969_v29 = vpop.f32.mrf.mxu3 }
 0x2e1   : > { %3366 = vmatpush.bf16.msrb.mxu3 %v4809_v38 }
 0x2e2   : > { %6857 = vst [vmem:[#allocation38_spill] sm:$0xff] %v5952_v2 }
 0x2e7   : > { %v2033_v32 = vpop.f32.mrf.mxu0 }
 0x2e8   : > { %v2034_v16 = vadd.f32 %v2033_v32, %v5788_v13  ;;  %v4832_v32 = vld [vmem:[#allocation9 + $0x138] sm:$0xff] }
 0x2e9   : > { %3497 = vmatpush.bf16.msrb.mxu2 %v4832_v32  ;;  %v5988_v32 = vpop.f32.mrf.mxu2 }
 0x2ea   : > { %v2106_v62 = vmul.f32 %v5957_v6, %v2034_v16  ;;  %2072 = vmatmul.bf16.gmra.mxu0 %v6825_v14  ;;  %v5980_v16 = vpop.f32.mrf.mxu3 }
 0x2ec   : > { %v2137_v2 = vadd.f32 %v5967_v12, %v2106_v62 }
 0x2ee   : > { %v2165_v23 = vmax.f32 %v2137_v2, 0.0 }
 0x2ef   : > { %v2035_v18 = vpop.f32.mrf.mxu0 }
 0x2f0   : > { %2193 = vst [vmem:[#allocation2] sm:$0xff] %v2165_v23  ;;  %v2036_v13 = vadd.f32 %v2035_v18, %v5792_v5  ;;  %v2249_v62 = vpack.c.bf16 %v2165_v23, %v2165_v23  ;;  %v4824_v5 = vld [vmem:[#allocation9 + $0xf8] sm:$0xff] }
 0x2f1   : > { %3428 = vmatpush.bf16.msrb.mxu1 %v4824_v5  ;;  %v6004_v17 = vpop.f32.mrf.mxu2 }
 0x2f2   : > { %v2107_v1 = vmul.f32 %v5957_v6, %v2036_v13  ;;  %v2417_v53 = vunpack.c.l.b16 %v2249_v62  ;;  %v5986_v13 = vpop.f32.mrf.mxu1  ;;  %6860 = vst [vmem:[#allocation40_spill] sm:$0xff] %v6004_v17  ;;  %v4848_v17 = vld [vmem:[#allocation9 + $0x1b8] sm:$0xff] }
 0x2f3   : > { %6858 = vst [vmem:[#allocation39_spill] sm:$0xff] %v5986_v13  ;;  %3635 = vmatpush.bf16.msra.mxu0 %v4848_v17 }
 0x2f4   : > { %v2138_v14 = vadd.f32 %v5967_v12, %v2107_v1 }
 0x2f6   : > { %v2166_v20 = vmax.f32 %v2138_v14, 0.0  ;;  %v5991_v14 = vpop.f32.mrf.mxu3 }
 0x2f7   : > { %v2038_v38 = vpop.f32.mrf.mxu0 }
 0x2f8   : > { %2194 = vst [vmem:[#allocation2 + $0x8] sm:$0xff] %v2166_v20  ;;  %v2039_v2 = vadd.f32 %v2038_v38, %v5800_v25  ;;  %v2250_v49 = vpack.c.bf16 %v2166_v20, %v2166_v20  ;;  %v1807_v25 = vadd.f32 %v5870_v58, %v5806_v3 }
 0x2fa   : > { %v2108_v18 = vmul.f32 %v5957_v6, %v2039_v2  ;;  %2077 = vmatmul.bf16.gmra.mxu0 %v6831_v45  ;;  %v2418_v61 = vunpack.c.l.b16 %v2250_v49  ;;  %v1886_v49 = vadd.f32 %v5886_v33, %v1807_v25 }
 0x2fc   : > { %v2139_v1 = vadd.f32 %v5967_v12, %v2108_v18  ;;  %v2441_v23 = vpack.c.b16 %v2418_v61, %v2417_v53  ;;  %v1809_v61 = vadd.f32 %v5875_v48, %v5814_v0  ;;  %v6001_v53 = vpop.f32.mrf.mxu1  ;;  %v4831_v48 = vld [vmem:[#allocation9 + $0x130] sm:$0xff] }
 0x2fd   : > { %6859 = vst [vmem:[#allocation22_spill] sm:$0xff] %v6001_v53  ;;  %3498 = vmatpush.bf16.msrb.mxu2 %v4831_v48 }
 0x2fe   : > { %v2167_v20 = vmax.f32 %v2139_v1, 0.0  ;;  %3229 = vmatmul.bf16.vlgmr.msra.gmra.mxu1 %v2441_v23  ;;  %v1965_v23 = vadd.f32 %v5888_v40, %v1886_v49  ;;  %v6006_v33 = vpop.f32.mrf.mxu3 }
 0x2ff   : > { %v2040_v38 = vpop.f32.mrf.mxu0  ;;  %v2273_v2 = vld [vmem:[#allocation2 + $0x1] sm:$0xff]  ;;  %6861 = vst [vmem:[#allocation42_spill] sm:$0xff] %v6006_v33 }
 0x300   : > { %2195 = vst [vmem:[#allocation2 + $0x10] sm:$0xff] %v2167_v20  ;;  %v2041_v45 = vadd.f32 %v2040_v38, %v5804_v42  ;;  %v2321_v5 = vld [vmem:[#allocation2 + $0x2] sm:$0xff]  ;;  %v2297_v3 = vpack.c.bf16 %v2273_v2, %v2273_v2  ;;  %v2251_v1 = vpack.c.bf16 %v2167_v20, %v2167_v20  ;;  %v1888_v2 = vadd.f32 %v5896_v28, %v1809_v61 }
 0x301   : > { %v2345_v58 = vpack.c.bf16 %v2321_v5, %v2321_v5  ;;  %v1812_v61 = vadd.f32 %v5884_v24, %v5822_v22 }
 0x302   : > { %v2109_v62 = vmul.f32 %v5957_v6, %v2041_v45  ;;  %v2489_v5 = vunpack.c.l.b16 %v2297_v3  ;;  %v2419_v53 = vunpack.c.l.b16 %v2251_v1  ;;  %v1967_v28 = vadd.f32 %v5898_v9, %v1888_v2  ;;  %v4823_v1 = vld [vmem:[#allocation9 + $0xf0] sm:$0xff] }
 0x303   : > { %v2561_v20 = vunpack.c.l.b16 %v2345_v58  ;;  %v6020_v58 = vpop.f32.mrf.mxu2  ;;  %v1891_v9 = vadd.f32 %v5905_v31, %v1812_v61  ;;  %3429 = vmatpush.bf16.msrb.mxu1 %v4823_v1 }
 0x304   : > { %v2140_v18 = vadd.f32 %v5967_v12, %v2109_v62 }
 0x306   : > { %v2168_v42 = vmax.f32 %v2140_v18, 0.0  ;;  %v6022_v17 = vpop.f32.mrf.mxu3 }
 0x307   : > { %v2043_v25 = vpop.f32.mrf.mxu0  ;;  %v2274_v38 = vld [vmem:[#allocation2 + $0x9] sm:$0xff] }
 0x308   : > { %v2322_v45 = vld [vmem:[#allocation2 + $0xa] sm:$0xff]  ;;  %2196 = vst [vmem:[#allocation2 + $0x18] sm:$0xff] %v2168_v42  ;;  %v2044_v62 = vadd.f32 %v2043_v25, %v1965_v23  ;;  %v2298_v13 = vpack.c.bf16 %v2274_v38, %v2274_v38  ;;  %v2252_v0 = vpack.c.bf16 %v2168_v42, %v2168_v42 }
 0x309   : > { %v2346_v35 = vpack.c.bf16 %v2322_v45, %v2322_v45  ;;  %v4846_v45 = vld [vmem:[#allocation9 + $0x1a8] sm:$0xff] }
 0x30a   : > { %v2110_v40 = vmul.f32 %v5957_v6, %v2044_v62  ;;  %2082 = vmatmul.bf16.gmra.mxu0 %v6836_v4  ;;  %v2490_v49 = vunpack.c.l.b16 %v2298_v13  ;;  %v2420_v33 = vunpack.c.l.b16 %v2252_v0  ;;  %v4847_v4 = vld [vmem:[#allocation9 + $0x1b0] sm:$0xff]  ;;  %v1814_v0 = vadd.f32 %v5894_v55, %v5833_v15 }
 0x30b   : > { %v2562_v18 = vunpack.c.l.b16 %v2346_v35  ;;  %v6017_v35 = vpop.f32.mrf.mxu1  ;;  %3636 = vmatpush.bf16.msra.mxu0 %v4847_v4 }
 0x30c   : > { %v2141_v23 = vadd.f32 %v5967_v12, %v2110_v40  ;;  %v2513_v25 = vpack.c.b16 %v2490_v49, %v2489_v5  ;;  %v6012_v42 = vpack.c.b16 %v2420_v33, %v2419_v53  ;;  %v4845_v49 = vld [vmem:[#allocation9 + $0x1a0] sm:$0xff]  ;;  %v1893_v4 = vadd.f32 %v5915_v37, %v1814_v0 }
 0x30d   : > { %v2585_v38 = vpack.c.b16 %v2562_v18, %v2561_v20  ;;  %v1970_v20 = vadd.f32 %v5907_v56, %v1891_v9 }
 0x30e   : > { %v2169_v3 = vmax.f32 %v2141_v23, 0.0  ;;  %3298 = vmatmul.bf16.vlgmr.msra.gmra.mxu2 %v2513_v25  ;;  %3234 = vmatmul.bf16.gmra.mxu1 %v6012_v42 }
 0x30f   : > { %3367 = vmatmul.bf16.vlgmr.msrb.gmra.mxu3 %v2585_v38  ;;  %v2045_v13 = vpop.f32.mrf.mxu0  ;;  %v2275_v24 = vld [vmem:[#allocation2 + $0x11] sm:$0xff]  ;;  %3637 = vmatpush.bf16.msra.mxu0 %v4846_v45 }
 0x310   : > { %2197 = vst [vmem:[#allocation2 + $0x20] sm:$0xff] %v2169_v3  ;;  %v2046_v53 = vadd.f32 %v2045_v13, %v1967_v28  ;;  %v2323_v33 = vld [vmem:[#allocation2 + $0x12] sm:$0xff]  ;;  %v2299_v48 = vpack.c.bf16 %v2275_v24, %v2275_v24  ;;  %v2253_v5 = vpack.c.bf16 %v2169_v3, %v2169_v3 }
 0x311   : > { %v2347_v2 = vpack.c.bf16 %v2323_v33, %v2323_v33  ;;  %v4844_v24 = vld [vmem:[#allocation9 + $0x198] sm:$0xff]  ;;  %v6037_v33 = vpop.f32.mrf.mxu3 }
 0x312   : > { %v2111_v22 = vmul.f32 %v5957_v6, %v2046_v53  ;;  %v2491_v15 = vunpack.c.l.b16 %v2299_v48  ;;  %v2421_v3 = vunpack.c.l.b16 %v2253_v5  ;;  %v6033_v53 = vpop.f32.mrf.mxu2  ;;  %v1972_v48 = vadd.f32 %v5920_v54, %v1893_v4  ;;  %v4843_v5 = vld [vmem:[#allocation9 + $0x190] sm:$0xff] }
 0x313   : > { %v6031_v13 = vpop.f32.mrf.mxu1  ;;  %v2563_v55 = vunpack.c.l.b16 %v2347_v2  ;;  %3638 = vmatpush.bf16.msra.mxu0 %v4845_v49  ;;  %v4830_v49 = vld [vmem:[#allocation9 + $0x128] sm:$0xff] }
 0x314   : > { %v2142_v62 = vadd.f32 %v5967_v12, %v2111_v22  ;;  %3499 = vmatpush.bf16.msrb.mxu2 %v4830_v49 }
 0x316   : > { %v2170_v40 = vmax.f32 %v2142_v62, 0.0 }
 0x317   : > { %v2048_v31 = vpop.f32.mrf.mxu0  ;;  %v2276_v18 = vld [vmem:[#allocation2 + $0x19] sm:$0xff]  ;;  %3639 = vmatpush.bf16.msra.mxu0 %v4844_v24 }
 0x318   : > { %v2324_v23 = vld [vmem:[#allocation2 + $0x1a] sm:$0xff]  ;;  %2198 = vst [vmem:[#allocation2 + $0x28] sm:$0xff] %v2170_v40  ;;  %v2049_v25 = vadd.f32 %v2048_v31, %v1970_v20  ;;  %v2300_v38 = vpack.c.bf16 %v2276_v18, %v2276_v18  ;;  %v2254_v61 = vpack.c.bf16 %v2170_v40, %v2170_v40 }
 0x319   : > { %v2348_v28 = vpack.c.bf16 %v2324_v23, %v2324_v23 }
 0x31a   : > { %v2112_v56 = vmul.f32 %v5957_v6, %v2049_v25  ;;  %2087 = vmatmul.bf16.gmra.mxu0 %v6840_v63  ;;  %v2492_v1 = vunpack.c.l.b16 %v2300_v38  ;;  %v2422_v22 = vunpack.c.l.b16 %v2254_v61  ;;  %v1817_v63 = vadd.f32 %v5903_v10, %v5837_v11  ;;  %v4842_v11 = vld [vmem:[#allocation9 + $0x188] sm:$0xff]  ;;  %v6056_v25 = vpop.f32.mrf.mxu2  ;;  %v6061_v61 = vpop.f32.mrf.mxu3 }
 0x31b   : > { %v2564_v9 = vunpack.c.l.b16 %v2348_v28  ;;  %3640 = vmatpush.bf16.msra.mxu0 %v4843_v5  ;;  %v6054_v10 = vpop.f32.mrf.mxu1  ;;  %v1819_v28 = vadd.f32 %v5913_v34, %v5844_v44  ;;  %v4822_v34 = vld [vmem:[#allocation9 + $0xe8] sm:$0xff] }
 0x31c   : > { %v2143_v37 = vadd.f32 %v5967_v12, %v2112_v56  ;;  %v6040_v45 = vpack.c.b16 %v2492_v1, %v2491_v15  ;;  %v6044_v0 = vpack.c.b16 %v2422_v22, %v2421_v3  ;;  %v1896_v31 = vadd.f32 %v5927_v41, %v1817_v63  ;;  %v4841_v56 = vld [vmem:[#allocation9 + $0x180] sm:$0xff]  ;;  %3430 = vmatpush.bf16.msrb.mxu1 %v4822_v34 }
 0x31d   : > { %v6042_v62 = vpack.c.b16 %v2564_v9, %v2563_v55  ;;  %v1898_v63 = vadd.f32 %v5937_v27, %v1819_v28 }
 0x31e   : > { %v2171_v2 = vmax.f32 %v2143_v37, 0.0  ;;  %3303 = vmatmul.bf16.gmra.mxu2 %v6040_v45  ;;  %3239 = vmatmul.bf16.gmra.mxu1 %v6044_v0  ;;  %v1975_v55 = vadd.f32 %v5930_v39, %v1896_v31 }
 0x31f   : > { %3372 = vmatmul.bf16.gmra.mxu3 %v6042_v62  ;;  %v2050_v20 = vpop.f32.mrf.mxu0  ;;  %v2277_v18 = vld [vmem:[#allocation2 + $0x21] sm:$0xff]  ;;  %3641 = vmatpush.bf16.msra.mxu0 %v4842_v11  ;;  %v1977_v28 = vadd.f32 %v5939_v7, %v1898_v63 }
 0x320   : > { %2199 = vst [vmem:[#allocation2 + $0x30] sm:$0xff] %v2171_v2  ;;  %v2051_v40 = vadd.f32 %v2050_v20, %v1972_v48  ;;  %v2325_v23 = vld [vmem:[#allocation2 + $0x22] sm:$0xff]  ;;  %v2301_v4 = vpack.c.bf16 %v2277_v18, %v2277_v18  ;;  %v2255_v41 = vpack.c.bf16 %v2171_v2, %v2171_v2  ;;  %v525_v18 = vld [vmem:[%s5277_s1 + $0xfa] sm:$0xff] }
 0x321   : > { %v2349_v15 = vpack.c.bf16 %v2325_v23, %v2325_v23 }
 0x322   : > { %v2113_v54 = vmul.f32 %v5957_v6, %v2051_v40  ;;  %v2493_v5 = vunpack.c.l.b16 %v2301_v4  ;;  %v2423_v20 = vunpack.c.l.b16 %v2255_v41 }
 0x323   : > { %v2565_v2 = vunpack.c.l.b16 %v2349_v15  ;;  %3642 = vmatpush.bf16.msra.mxu0 %v4841_v56  ;;  %v6077_v4 = vpop.f32.mrf.mxu1  ;;  %v6081_v15 = vpop.f32.mrf.mxu2 }
 0x324   : > { %v2144_v38 = vadd.f32 %v5967_v12, %v2113_v54  ;;  %v524_v54 = vld [vmem:[%s5277_s1 + $0xf2] sm:$0xff]  ;;  %v6085_v56 = vpop.f32.mrf.mxu3 }
 0x326   : > { %v2172_v3 = vmax.f32 %v2144_v38, 0.0 }
 0x327   : > { %v2053_v1 = vpop.f32.mrf.mxu0  ;;  %v2278_v9 = vld [vmem:[#allocation2 + $0x29] sm:$0xff] }
 0x328   : > { %v2326_v22 = vld [vmem:[#allocation2 + $0x2a] sm:$0xff]  ;;  %2200 = vst [vmem:[#allocation2 + $0x38] sm:$0xff] %v2172_v3  ;;  %v2054_v24 = vadd.f32 %v2053_v1, %v1975_v55  ;;  %v2302_v37 = vpack.c.bf16 %v2278_v9, %v2278_v9  ;;  %v2256_v44 = vpack.c.bf16 %v2172_v3, %v2172_v3  ;;  %v526_v55 = vpack.c.bf16 %v524_v54, %v524_v54 }
 0x329   : > { %v2350_v48 = vpack.c.bf16 %v2326_v22, %v2326_v22  ;;  %v527_v3 = vpack.c.bf16 %v525_v18, %v525_v18 }
 0x32a   : > { %v2114_v39 = vmul.f32 %v5957_v6, %v2054_v24  ;;  %2092 = vmatmul.bf16.gmra.mxu0 %v5828_v51  ;;  %v2494_v40 = vunpack.c.l.b16 %v2302_v37  ;;  %v2424_v31 = vunpack.c.l.b16 %v2256_v44  ;;  %v1822_v51 = vadd.f32 %v5925_v52, %v5847_v19 }
 0x32b   : > { %v2566_v49 = vunpack.c.l.b16 %v2350_v48  ;;  %v812_v52 = vunpack.c.l.b16 %v526_v55  ;;  %v813_v22 = vunpack.c.l.b16 %v527_v3  ;;  %v1824_v44 = vadd.f32 %v5935_v59, %v5850_v46  ;;  %v6096_v54 = vpop.f32.mrf.mxu2  ;;  %v4829_v46 = vld [vmem:[#allocation9 + $0x120] sm:$0xff] }
 0x32c   : > { %v2145_v23 = vadd.f32 %v5967_v12, %v2114_v39  ;;  %v6070_v11 = vpack.c.b16 %v2494_v40, %v2493_v5  ;;  %v6074_v27 = vpack.c.b16 %v2424_v31, %v2423_v20  ;;  %v1901_v9 = vadd.f32 %v5947_v36, %v1822_v51  ;;  %v6094_v40 = vpop.f32.mrf.mxu1  ;;  %3500 = vmatpush.bf16.msrb.mxu2 %v4829_v46 }
 0x32d   : > { %v6072_v38 = vpack.c.b16 %v2566_v49, %v2565_v2  ;;  %v814_v39 = vpack.c.b16 %v813_v22, %v812_v52  ;;  %v1903_v59 = vadd.f32 %v5961_v50, %v1824_v44 }
 0x32e   : > { %v2173_v41 = vmax.f32 %v2145_v23, 0.0  ;;  %3308 = vmatmul.bf16.gmra.mxu2 %v6070_v11  ;;  %3244 = vmatmul.bf16.gmra.mxu1 %v6074_v27  ;;  %v1980_v2 = vadd.f32 %v5949_v21, %v1901_v9 }
 0x32f   : > { %3377 = vmatmul.bf16.gmra.mxu3 %v6072_v38  ;;  %v2055_v1 = vpop.f32.mrf.mxu0  ;;  %v2279_v24 = vld [vmem:[#allocation2 + $0x31] sm:$0xff]  ;;  %v1982_v50 = vadd.f32 %v5969_v29, %v1903_v59 }
 0x330   : > { %2201 = vst [vmem:[#allocation2 + $0x40] sm:$0xff] %v2173_v41  ;;  %v2056_v7 = vadd.f32 %v2055_v1, %v1977_v28  ;;  %v2327_v37 = vld [vmem:[#allocation2 + $0x32] sm:$0xff]  ;;  %v2303_v34 = vpack.c.bf16 %v2279_v24, %v2279_v24  ;;  %v2257_v5 = vpack.c.bf16 %v2173_v41, %v2173_v41  ;;  %v6099_v41 = vpop.f32.mrf.mxu3 }
 0x331   : > { %v2351_v63 = vpack.c.bf16 %v2327_v37, %v2327_v37 }
 0x332   : > { %v2115_v19 = vmul.f32 %v5957_v6, %v2056_v7  ;;  %v2495_v21 = vunpack.c.l.b16 %v2303_v34  ;;  %v2425_v3 = vunpack.c.l.b16 %v2257_v5  ;;  %v4821_v5 = vld [vmem:[#allocation9 + $0xe0] sm:$0xff] }
 0x333   : > { %v2567_v55 = vunpack.c.l.b16 %v2351_v63  ;;  %3431 = vmatpush.bf16.msrb.mxu1 %v4821_v5 }
 0x334   : > { %v2146_v48 = vadd.f32 %v5967_v12, %v2115_v19 }
 0x336   : > { %v2174_v20 = vmax.f32 %v2146_v48, 0.0  ;;  %v1827_v48 = vadd.f32 %v5945_v47, %v5853_v30 }
 0x337   : > { %v2058_v36 = vpop.f32.mrf.mxu0  ;;  %v2280_v49 = vld [vmem:[#allocation2 + $0x39] sm:$0xff] }
 0x338   : > { %v2328_v31 = vld [vmem:[#allocation2 + $0x3a] sm:$0xff]  ;;  %2202 = vst [vmem:[#allocation2 + $0x48] sm:$0xff] %v2174_v20  ;;  %v2059_v18 = vadd.f32 %v2058_v36, %v1980_v2  ;;  %v2304_v23 = vpack.c.bf16 %v2280_v49, %v2280_v49  ;;  %v2258_v51 = vpack.c.bf16 %v2174_v20, %v2174_v20  ;;  %v6115_v2 = vpop.f32.mrf.mxu1  ;;  %v1906_v20 = vadd.f32 %v5977_v43, %v1827_v48  ;;  %v6121_v36 = vpop.f32.mrf.mxu3 }
 0x339   : > { %v2352_v28 = vpack.c.bf16 %v2328_v31, %v2328_v31  ;;  %v1829_v31 = vadd.f32 %v5959_v60, %v5857_v57 }
 0x33a   : > { %v2116_v1 = vmul.f32 %v5957_v6, %v2059_v18  ;;  %2097 = vmatmul.bf16.gmra.mxu0 %v814_v39  ;;  %v2496_v7 = vunpack.c.l.b16 %v2304_v23  ;;  %v2426_v19 = vunpack.c.l.b16 %v2258_v51  ;;  %v6118_v39 = vpop.f32.mrf.mxu2  ;;  %v1985_v51 = vadd.f32 %v5980_v16, %v1906_v20 }
 0x33b   : > { %v2568_v9 = vunpack.c.l.b16 %v2352_v28 }
 0x33c   : > { %v2147_v52 = vadd.f32 %v5967_v12, %v2116_v1  ;;  %v6103_v22 = vpack.c.b16 %v2496_v7, %v2495_v21  ;;  %v6107_v37 = vpack.c.b16 %v2426_v19, %v2425_v3 }
 0x33d   : > { %v6105_v24 = vpack.c.b16 %v2568_v9, %v2567_v55  ;;  %v1908_v9 = vadd.f32 %v5988_v32, %v1829_v31 }
 0x33e   : > { %v2175_v44 = vmax.f32 %v2147_v52, 0.0  ;;  %3313 = vmatmul.bf16.gmra.mxu2 %v6103_v22  ;;  %3249 = vmatmul.bf16.gmra.mxu1 %v6107_v37 }
 0x33f   : > { %3382 = vmatmul.bf16.gmra.mxu3 %v6105_v24  ;;  %v2060_v34 = vpop.f32.mrf.mxu0  ;;  %v2281_v30 = vld [vmem:[#allocation2 + $0x41] sm:$0xff] }
 0x340   : > { %2203 = vst [vmem:[#allocation2 + $0x50] sm:$0xff] %v2175_v44  ;;  %v2061_v63 = vadd.f32 %v2060_v34, %v1982_v50  ;;  %v2329_v47 = vld [vmem:[#allocation2 + $0x42] sm:$0xff]  ;;  %v2305_v18 = vpack.c.bf16 %v2281_v30, %v2281_v30  ;;  %v2259_v28 = vpack.c.bf16 %v2175_v44, %v2175_v44  ;;  %v6130_v44 = vpop.f32.mrf.mxu1  ;;  %v1987_v30 = vadd.f32 %v5991_v14, %v1908_v9  ;;  %v6865_v9 = vld [vmem:[#allocation42_spill] sm:$0xff] }
 0x341   : > { %v2353_v23 = vpack.c.bf16 %v2329_v47, %v2329_v47  ;;  %v1832_v47 = vadd.f32 %v5975_v26, %v5860_v8  ;;  %v6863_v26 = vld [vmem:[#allocation20_spill] sm:$0xff] }
 0x342   : > { %v2117_v29 = vmul.f32 %v5957_v6, %v2061_v63  ;;  %v2497_v19 = vunpack.c.l.b16 %v2305_v18  ;;  %v2427_v50 = vunpack.c.l.b16 %v2259_v28  ;;  %v6132_v34 = vpop.f32.mrf.mxu2  ;;  %v6862_v28 = vld [vmem:[#allocation40_spill] sm:$0xff] }
 0x343   : > { %v2569_v52 = vunpack.c.l.b16 %v2353_v23  ;;  %v4828_v23 = vld [vmem:[#allocation9 + $0x118] sm:$0xff] }
 0x344   : > { %v2148_v49 = vadd.f32 %v5967_v12, %v2117_v29  ;;  %v6141_v29 = vpop.f32.mrf.mxu3  ;;  %3501 = vmatpush.bf16.msrb.mxu2 %v4828_v23 }
 0x346   : > { %v2176_v43 = vmax.f32 %v2148_v49, 0.0 }
 0x347   : > { %v2063_v46 = vpop.f32.mrf.mxu0  ;;  %v2282_v59 = vld [vmem:[#allocation2 + $0x49] sm:$0xff] }
 0x348   : > { %v2330_v21 = vld [vmem:[#allocation2 + $0x4a] sm:$0xff]  ;;  %2204 = vst [vmem:[#allocation2 + $0x58] sm:$0xff] %v2176_v43  ;;  %v2064_v55 = vadd.f32 %v2063_v46, %v1985_v51  ;;  %v2306_v3 = vpack.c.bf16 %v2282_v59, %v2282_v59  ;;  %v2260_v7 = vpack.c.bf16 %v2176_v43, %v2176_v43  ;;  %v1911_v51 = vadd.f32 %v6862_v28, %v1832_v47  ;;  %v6864_v59 = vld [vmem:[#allocation39_spill] sm:$0xff] }
 0x349   : > { %v2354_v1 = vpack.c.bf16 %v2330_v21, %v2330_v21  ;;  %v1834_v21 = vadd.f32 %v6864_v59, %v6863_v26 }
 0x34a   : > { %v2118_v57 = vmul.f32 %v5957_v6, %v2064_v55  ;;  %3643 = vmatmul.bf16.vlgmr.msra.gmra.mxu0 %v6044_v0  ;;  %v2498_v60 = vunpack.c.l.b16 %v2306_v3  ;;  %v2428_v48 = vunpack.c.l.b16 %v2260_v7  ;;  %v6154_v55 = vpop.f32.mrf.mxu1 }
 0x34b   : > { %v2570_v16 = vunpack.c.l.b16 %v2354_v1  ;;  %v1913_v23 = vadd.f32 %v6020_v58, %v1834_v21  ;;  %v6866_v21 = vld [vmem:[#allocation29_spill] sm:$0xff] }
 0x34c   : > { %v2149_v63 = vadd.f32 %v5967_v12, %v2118_v57  ;;  %v6135_v5 = vpack.c.b16 %v2498_v60, %v2497_v19  ;;  %v6139_v32 = vpack.c.b16 %v2428_v48, %v2427_v50  ;;  %v1990_v19 = vadd.f32 %v6865_v9, %v1911_v51  ;;  %v6159_v57 = vpop.f32.mrf.mxu3 }
 0x34d   : > { %v6137_v20 = vpack.c.b16 %v2570_v16, %v2569_v52  ;;  %v6157_v52 = vpop.f32.mrf.mxu2  ;;  %v1992_v58 = vadd.f32 %v6022_v17, %v1913_v23  ;;  %v6868_v23 = vld [vmem:[#allocation31_spill] sm:$0xff] }
 0x34e   : > { %v2177_v49 = vmax.f32 %v2149_v63, 0.0  ;;  %3318 = vmatmul.bf16.gmra.mxu2 %v6135_v5  ;;  %3254 = vmatmul.bf16.gmra.mxu1 %v6139_v32 }
 0x34f   : > { %3387 = vmatmul.bf16.gmra.mxu3 %v6137_v20  ;;  %v2065_v31 = vpop.f32.mrf.mxu0  ;;  %v2283_v46 = vld [vmem:[#allocation2 + $0x51] sm:$0xff] }
 0x350   : > { %2205 = vst [vmem:[#allocation2 + $0x60] sm:$0xff] %v2177_v49  ;;  %v2066_v18 = vadd.f32 %v2065_v31, %v1987_v30  ;;  %v2331_v14 = vld [vmem:[#allocation2 + $0x52] sm:$0xff]  ;;  %v2307_v3 = vpack.c.bf16 %v2283_v46, %v2283_v46  ;;  %v2261_v7 = vpack.c.bf16 %v2177_v49, %v2177_v49 }
 0x351   : > { %v2355_v1 = vpack.c.bf16 %v2331_v14, %v2331_v14 }
 0x352   : > { %v2119_v43 = vmul.f32 %v5957_v6, %v2066_v18  ;;  %v4820_v18 = vld [vmem:[#allocation9 + $0xd8] sm:$0xff]  ;;  %v2499_v28 = vunpack.c.l.b16 %v2307_v3 }
 0x353   : > { %v2571_v49 = vunpack.c.l.b16 %v2355_v1  ;;  %3432 = vmatpush.bf16.msrb.mxu1 %v4820_v18  ;;  %v6867_v3 = vld [vmem:[#allocation22_spill] sm:$0xff] }
 0x354   : > { %v2150_v8 = vadd.f32 %v5967_v12, %v2119_v43  ;;  %v2429_v43 = vunpack.c.l.b16 %v2261_v7  ;;  %v1837_v1 = vadd.f32 %v6867_v3, %v6866_v21 }
 0x356   : > { %v2178_v50 = vmax.f32 %v2150_v8, 0.0  ;;  %v1916_v17 = vadd.f32 %v6033_v53, %v1837_v1 }
 0x357   : > { %v2068_v60 = vpop.f32.mrf.mxu0  ;;  %v2284_v16 = vld [vmem:[#allocation2 + $0x59] sm:$0xff] }
 0x358   : > { %v2332_v48 = vld [vmem:[#allocation2 + $0x5a] sm:$0xff]  ;;  %2206 = vst [vmem:[#allocation2 + $0x68] sm:$0xff] %v2178_v50  ;;  %v2069_v63 = vadd.f32 %v2068_v60, %v1990_v19  ;;  %v2308_v30 = vpack.c.bf16 %v2284_v16, %v2284_v16  ;;  %v2262_v31 = vpack.c.bf16 %v2178_v50, %v2178_v50  ;;  %v6176_v50 = vpop.f32.mrf.mxu1  ;;  %v6179_v16 = vpop.f32.mrf.mxu2 }
 0x359   : > { %v2356_v47 = vpack.c.bf16 %v2332_v48, %v2332_v48 }
 0x35a   : > { %v2120_v51 = vmul.f32 %v5957_v6, %v2069_v63  ;;  %3648 = vmatmul.bf16.gmra.mxu0 %v6074_v27  ;;  %v2500_v46 = vunpack.c.l.b16 %v2308_v30  ;;  %v2430_v8 = vunpack.c.l.b16 %v2262_v31  ;;  %v6181_v63 = vpop.f32.mrf.mxu3 }
 0x35b   : > { %v2572_v14 = vunpack.c.l.b16 %v2356_v47 }
 0x35c   : > { %v2151_v26 = vadd.f32 %v5967_v12, %v2120_v51  ;;  %v6165_v59 = vpack.c.b16 %v2500_v46, %v2499_v28  ;;  %v6169_v19 = vpack.c.b16 %v2430_v8, %v2429_v43  ;;  %v1839_v28 = vadd.f32 %v6017_v35, %v6868_v23 }
 0x35d   : > { %v6167_v9 = vpack.c.b16 %v2572_v14, %v2571_v49  ;;  %v1995_v46 = vadd.f32 %v6037_v33, %v1916_v17 }
 0x35e   : > { %v2179_v7 = vmax.f32 %v2151_v26, 0.0  ;;  %3323 = vmatmul.bf16.gmra.mxu2 %v6165_v59  ;;  %3259 = vmatmul.bf16.gmra.mxu1 %v6169_v19 }
 0x35f   : > { %3392 = vmatmul.bf16.gmra.mxu3 %v6167_v9  ;;  %v2070_v60 = vpop.f32.mrf.mxu0  ;;  %v2285_v47 = vld [vmem:[#allocation2 + $0x61] sm:$0xff] }
 0x360   : > { %2207 = vst [vmem:[#allocation2 + $0x70] sm:$0xff] %v2179_v7  ;;  %v2071_v48 = vadd.f32 %v2070_v60, %v1992_v58  ;;  %v2333_v31 = vld [vmem:[#allocation2 + $0x62] sm:$0xff]  ;;  %v2309_v49 = vpack.c.bf16 %v2285_v47, %v2285_v47  ;;  %v2263_v51 = vpack.c.bf16 %v2179_v7, %v2179_v7  ;;  %v4827_v60 = vld [vmem:[#allocation9 + $0x110] sm:$0xff]  ;;  %v6192_v7 = vpop.f32.mrf.mxu2 }
 0x361   : > { %v2357_v43 = vpack.c.bf16 %v2333_v31, %v2333_v31  ;;  %3502 = vmatpush.bf16.msrb.mxu2 %v4827_v60 }
 0x362   : > { %v2121_v30 = vmul.f32 %v5957_v6, %v2071_v48  ;;  %v1918_v48 = vadd.f32 %v6056_v25, %v1839_v28  ;;  %v2501_v35 = vunpack.c.l.b16 %v2309_v49  ;;  %v2431_v31 = vunpack.c.l.b16 %v2263_v51  ;;  %v6871_v51 = vld [vmem:[#allocation27_spill] sm:$0xff] }
 0x363   : > { %v2573_v47 = vunpack.c.l.b16 %v2357_v43 }
 0x364   : > { %v2152_v18 = vadd.f32 %v5967_v12, %v2121_v30  ;;  %v6190_v30 = vpop.f32.mrf.mxu1  ;;  %v1997_v43 = vadd.f32 %v6061_v61, %v1918_v48 }
 0x366   : > { %v2180_v14 = vmax.f32 %v2152_v18, 0.0 }
 0x367   : > { %v2073_v8 = vpop.f32.mrf.mxu0  ;;  %v2286_v26 = vld [vmem:[#allocation2 + $0x69] sm:$0xff] }
 0x368   : > { %v2334_v58 = vld [vmem:[#allocation2 + $0x6a] sm:$0xff]  ;;  %2208 = vst [vmem:[#allocation2 + $0x78] sm:$0xff] %v2180_v14  ;;  %v2074_v53 = vadd.f32 %v2073_v8, %v1995_v46  ;;  %v2310_v21 = vpack.c.bf16 %v2286_v26, %v2286_v26  ;;  %v2264_v1 = vpack.c.bf16 %v2180_v14, %v2180_v14  ;;  %v6196_v46 = vpop.f32.mrf.mxu3  ;;  %v1842_v8 = vadd.f32 %v6031_v13, %v6871_v51  ;;  %v6215_v13 = vpop.f32.mrf.mxu2 }
 0x369   : > { %v2358_v3 = vpack.c.bf16 %v2334_v58, %v2334_v58 }
 0x36a   : > { %v2122_v33 = vmul.f32 %v5957_v6, %v2074_v53  ;;  %3653 = vmatmul.bf16.gmra.mxu0 %v6107_v37  ;;  %v2502_v17 = vunpack.c.l.b16 %v2310_v21  ;;  %v2432_v23 = vunpack.c.l.b16 %v2264_v1  ;;  %v4819_v21 = vld [vmem:[#allocation9 + $0xd0] sm:$0xff] }
 0x36b   : > { %v2574_v18 = vunpack.c.l.b16 %v2358_v3  ;;  %v1921_v3 = vadd.f32 %v6081_v15, %v1842_v8  ;;  %3433 = vmatpush.bf16.msrb.mxu1 %v4819_v21 }
 0x36c   : > { %v2153_v14 = vadd.f32 %v5967_v12, %v2122_v33  ;;  %v6199_v25 = vpack.c.b16 %v2502_v17, %v2501_v35  ;;  %v6203_v49 = vpack.c.b16 %v2432_v23, %v2431_v31  ;;  %v6213_v48 = vpop.f32.mrf.mxu1 }
 0x36d   : > { %v6201_v28 = vpack.c.b16 %v2574_v18, %v2573_v47  ;;  %v6872_v47 = vld [vmem:[#allocation23_spill] sm:$0xff]  ;;  %v2000_v15 = vadd.f32 %v6085_v56, %v1921_v3 }
 0x36e   : > { %6869 = vst [vmem:[#allocation36_spill] sm:$0xff] %v6199_v25  ;;  %v2181_v26 = vmax.f32 %v2153_v14, 0.0  ;;  %3328 = vmatmul.bf16.gmra.mxu2 %v6199_v25  ;;  %3264 = vmatmul.bf16.gmra.mxu1 %v6203_v49  ;;  %v1844_v31 = vadd.f32 %v6054_v10, %v6872_v47 }
 0x36f   : > { %6870 = vst [vmem:[#allocation15_spill] sm:$0xff] %v6201_v28  ;;  %3397 = vmatmul.bf16.gmra.mxu3 %v6201_v28  ;;  %v2075_v58 = vpop.f32.mrf.mxu0  ;;  %v2287_v60 = vld [vmem:[#allocation2 + $0x71] sm:$0xff] }
 0x370   : > { %2209 = vst [vmem:[#allocation2 + $0x80] sm:$0xff] %v2181_v26  ;;  %v2076_v53 = vadd.f32 %v2075_v58, %v1997_v43  ;;  %v2335_v61 = vld [vmem:[#allocation2 + $0x72] sm:$0xff]  ;;  %v6220_v33 = vpop.f32.mrf.mxu3  ;;  %v2311_v17 = vpack.c.bf16 %v2287_v60, %v2287_v60  ;;  %v2265_v23 = vpack.c.bf16 %v2181_v26, %v2181_v26 }
 0x371   : > { %v2359_v18 = vpack.c.bf16 %v2335_v61, %v2335_v61 }
 0x372   : > { %v2123_v1 = vmul.f32 %v5957_v6, %v2076_v53  ;;  %v2503_v25 = vunpack.c.l.b16 %v2311_v17  ;;  %v2433_v47 = vunpack.c.l.b16 %v2265_v23 }
 0x373   : > { %v2575_v10 = vunpack.c.l.b16 %v2359_v18  ;;  %v6238_v18 = vpop.f32.mrf.mxu2 }
 0x374   : > { %v2154_v35 = vadd.f32 %v5967_v12, %v2123_v1  ;;  %v1923_v1 = vadd.f32 %v6096_v54, %v1844_v31  ;;  %v6875_v31 = vld [vmem:[#allocation32_spill] sm:$0xff] }
 0x375   : > { %v1847_v17 = vadd.f32 %v6077_v4, %v6875_v31 }
 0x376   : > { %v2182_v14 = vmax.f32 %v2154_v35, 0.0  ;;  %v2002_v54 = vadd.f32 %v6099_v41, %v1923_v1 }
 0x377   : > { %v2078_v43 = vpop.f32.mrf.mxu0  ;;  %v2288_v51 = vld [vmem:[#allocation2 + $0x79] sm:$0xff]  ;;  %v1926_v41 = vadd.f32 %v6118_v39, %v1847_v17 }
 0x378   : > { %v2336_v8 = vld [vmem:[#allocation2 + $0x7a] sm:$0xff]  ;;  %2210 = vst [vmem:[#allocation2 + $0x88] sm:$0xff] %v2182_v14  ;;  %v2079_v58 = vadd.f32 %v2078_v43, %v2000_v15  ;;  %v2312_v53 = vpack.c.bf16 %v2288_v51, %v2288_v51  ;;  %v2266_v28 = vpack.c.bf16 %v2182_v14, %v2182_v14 }
 0x379   : > { %v2360_v21 = vpack.c.bf16 %v2336_v8, %v2336_v8  ;;  %v4826_v8 = vld [vmem:[#allocation9 + $0x108] sm:$0xff] }
 0x37a   : > { %v2124_v60 = vmul.f32 %v5957_v6, %v2079_v58  ;;  %3658 = vmatmul.bf16.gmra.mxu0 %v6139_v32  ;;  %v2504_v26 = vunpack.c.l.b16 %v2312_v53  ;;  %v2434_v3 = vunpack.c.l.b16 %v2266_v28  ;;  %v6242_v28 = vpop.f32.mrf.mxu3  ;;  %3503 = vmatpush.bf16.msrb.mxu2 %v4826_v8 }
 0x37b   : > { %v2576_v56 = vunpack.c.l.b16 %v2360_v21  ;;  %v6226_v61 = vpop.f32.mrf.mxu1 }
 0x37c   : > { %v2155_v35 = vadd.f32 %v5967_v12, %v2124_v60  ;;  %v6229_v15 = vpack.c.b16 %v2504_v26, %v2503_v25  ;;  %v6233_v14 = vpack.c.b16 %v2434_v3, %v2433_v47  ;;  %v2005_v3 = vadd.f32 %v6121_v36, %v1926_v41 }
 0x37d   : > { %v6231_v43 = vpack.c.b16 %v2576_v56, %v2575_v10  ;;  %v6876_v10 = vld [vmem:[#allocation33_spill] sm:$0xff] }
 0x37e   : > { %6873 = vst [vmem:[#allocation43_spill] sm:$0xff] %v6229_v15  ;;  %v2183_v23 = vmax.f32 %v2155_v35, 0.0  ;;  %3333 = vmatmul.bf16.gmra.mxu2 %v6229_v15  ;;  %3269 = vmatmul.bf16.gmra.mxu1 %v6233_v14  ;;  %v1849_v47 = vadd.f32 %v6094_v40, %v6876_v10  ;;  %v6254_v15 = vpop.f32.mrf.mxu2 }
 0x37f   : > { %6874 = vst [vmem:[#allocation44_spill] sm:$0xff] %v6231_v43  ;;  %3402 = vmatmul.bf16.gmra.mxu3 %v6231_v43  ;;  %v2080_v25 = vpop.f32.mrf.mxu0  ;;  %v2289_v4 = vld [vmem:[#allocation2 + $0x81] sm:$0xff] }
 0x380   : > { %2211 = vst [vmem:[#allocation2 + $0x90] sm:$0xff] %v2183_v23  ;;  %v2081_v51 = vadd.f32 %v2080_v25, %v2002_v54  ;;  %v2337_v53 = vld [vmem:[#allocation2 + $0x82] sm:$0xff]  ;;  %v2313_v60 = vpack.c.bf16 %v2289_v4, %v2289_v4  ;;  %v2267_v56 = vpack.c.bf16 %v2183_v23, %v2183_v23 }
 0x381   : > { %v2361_v26 = vpack.c.bf16 %v2337_v53, %v2337_v53  ;;  %v4818_v43 = vld [vmem:[#allocation9 + $0xc8] sm:$0xff] }
 0x382   : > { %v2125_v58 = vmul.f32 %v5957_v6, %v2081_v51  ;;  %v6256_v40 = vpop.f32.mrf.mxu3  ;;  %v2505_v4 = vunpack.c.l.b16 %v2313_v60  ;;  %v2435_v53 = vunpack.c.l.b16 %v2267_v56  ;;  %3434 = vmatpush.bf16.msrb.mxu1 %v4818_v43  ;;  %v4840_v43 = vld [vmem:[#allocation9 + $0x178] sm:$0xff] }
 0x383   : > { %v6247_v21 = vpop.f32.mrf.mxu1  ;;  %v2577_v23 = vunpack.c.l.b16 %v2361_v26  ;;  %v6878_v26 = vld [vmem:[#allocation21_spill] sm:$0xff]  ;;  %3566 = vmatpush.bf16.msra.mxu3 %v4840_v43 }
 0x384   : > { %v2156_v1 = vadd.f32 %v5967_v12, %v2125_v58  ;;  %v1928_v58 = vadd.f32 %v6132_v34, %v1849_v47 }
 0x386   : > { %v2184_v35 = vmax.f32 %v2156_v1, 0.0  ;;  %v2007_v60 = vadd.f32 %v6141_v29, %v1928_v58 }
 0x387   : > { %v2083_v54 = vpop.f32.mrf.mxu0  ;;  %v2290_v39 = vld [vmem:[#allocation2 + $0x89] sm:$0xff] }
 0x388   : > { %v2338_v31 = vld [vmem:[#allocation2 + $0x8a] sm:$0xff]  ;;  %2212 = vst [vmem:[#allocation2 + $0x98] sm:$0xff] %v2184_v35  ;;  %v2084_v17 = vadd.f32 %v2083_v54, %v2005_v3  ;;  %v2314_v25 = vpack.c.bf16 %v2290_v39, %v2290_v39  ;;  %v2268_v8 = vpack.c.bf16 %v2184_v35, %v2184_v35 }
 0x389   : > { %v2362_v51 = vpack.c.bf16 %v2338_v31, %v2338_v31 }
 0x38a   : > { %v2126_v36 = vmul.f32 %v5957_v6, %v2084_v17  ;;  %3663 = vmatmul.bf16.gmra.mxu0 %v6169_v19  ;;  %v2506_v41 = vunpack.c.l.b16 %v2314_v25  ;;  %v2436_v10 = vunpack.c.l.b16 %v2268_v8  ;;  %v1852_v6 = vadd.f32 %v6115_v2, %v6878_v26  ;;  %v6279_v2 = vld [vmem:[%s6704_s2] ss:$0 sm:$0xff] }
 0x38b   : > { %v2578_v1 = vunpack.c.l.b16 %v2362_v51  ;;  %v6265_v47 = vpop.f32.mrf.mxu1 }
 0x38c   : > { %v2157_v3 = vadd.f32 %v5967_v12, %v2126_v36  ;;  %v6261_v35 = vpack.c.b16 %v2506_v41, %v2505_v4  ;;  %v6267_v54 = vpack.c.b16 %v2436_v10, %v2435_v53  ;;  %v1931_v51 = vadd.f32 %v6157_v52, %v1852_v6  ;;  %v4838_v6 = vld [vmem:[#allocation9 + $0x168] sm:$0xff] }
 0x38d   : > { %v6263_v34 = vpack.c.b16 %v2578_v1, %v2577_v23  ;;  %v4839_v23 = vld [vmem:[#allocation9 + $0x170] sm:$0xff]  ;;  %v6879_v1 = vld [vmem:[#allocation35_spill] sm:$0xff] }
 0x38e   : > { %v2185_v56 = vmax.f32 %v2157_v3, 0.0  ;;  %3338 = vmatmul.bf16.gmra.mxu2 %v6261_v35  ;;  %3274 = vmatmul.bf16.gmra.mxu1 %v6267_v54  ;;  %v1854_v52 = vadd.f32 %v6130_v44, %v6879_v1  ;;  %v4817_v1 = vld [vmem:[#allocation9 + $0xc0] sm:$0xff] }
 0x38f   : > { %6877 = vst [vmem:[#allocation24_spill] sm:$0xff] %v6263_v34  ;;  %3407 = vmatmul.bf16.gmra.mxu3 %v6263_v34  ;;  %v2085_v39 = vpop.f32.mrf.mxu0  ;;  %v2291_v58 = vld [vmem:[#allocation2 + $0x91] sm:$0xff]  ;;  %3435 = vmatpush.bf16.msrb.mxu1 %v4817_v1 }
 0x390   : > { %2213 = vst [vmem:[#allocation2 + $0xa0] sm:$0xff] %v2185_v56  ;;  %v2086_v31 = vadd.f32 %v2085_v39, %v2007_v60  ;;  %v2339_v4 = vld [vmem:[#allocation2 + $0x92] sm:$0xff]  ;;  %v2315_v10 = vpack.c.bf16 %v2291_v58, %v2291_v58  ;;  %3567 = vmatpush.bf16.msra.mxu3 %v4839_v23  ;;  %v2010_v60 = vadd.f32 %v6159_v57, %v1931_v51 }
 0x391   : > { %v3299_v17 = vpop.f32.mrf.mxu2  ;;  %v2363_v3 = vpack.c.bf16 %v2339_v4, %v2339_v4  ;;  %v1933_v34 = vadd.f32 %v6179_v16, %v1854_v52  ;;  %v6298_v16 = vld [vmem:[%s6705_s3] ss:$0 sm:$0xff]  ;;  %v6881_v1 = vld [vmem:[#allocation30_spill] sm:$0xff] }
 0x392   : > { %v3368_v25 = vpop.f32.mrf.mxu3  ;;  %v2127_v29 = vmul.f32 %v6279_v2, %v2086_v31  ;;  %v3300_v8 = vadd.f32 %v3299_v17, %v6226_v61  ;;  %v2269_v31 = vpack.c.bf16 %v2185_v56, %v2185_v56  ;;  %v2507_v4 = vunpack.c.l.b16 %v2315_v10 }
 0x393   : > { %v6286_v41 = vpop.f32.mrf.mxu1  ;;  %v2579_v23 = vunpack.c.l.b16 %v2363_v3 }
 0x394   : > { %v2158_v53 = vadd.f32 %v5967_v12, %v2127_v29  ;;  %v6284_v36 = vadd.f32 %v3368_v25, %v3300_v8  ;;  %v4825_v8 = vld [vmem:[#allocation9 + $0x100] sm:$0xff]  ;;  %3568 = vmatpush.bf16.msra.mxu3 %v4838_v6 }
 0x395   : > { %3504 = vmatpush.bf16.msrb.mxu2 %v4825_v8 }
 0x396   : > { %v2186_v26 = vmax.f32 %v2158_v53, 0.0 }
 0x397   : > { %v2088_v61 = vpop.f32.mrf.mxu0  ;;  %v2292_v43 = vld [vmem:[#allocation2 + $0x99] sm:$0xff] }
 0x398   : > { %v2340_v39 = vld [vmem:[#allocation2 + $0x9a] sm:$0xff]  ;;  %2214 = vst [vmem:[#allocation2 + $0xa8] sm:$0xff] %v2186_v26  ;;  %v2089_v12 = vadd.f32 %v2088_v61, %v2010_v60  ;;  %v2316_v17 = vpack.c.bf16 %v2292_v43, %v2292_v43  ;;  %v2270_v29 = vpack.c.bf16 %v2186_v26, %v2186_v26  ;;  %v2437_v26 = vunpack.c.l.b16 %v2269_v31  ;;  %v6880_v31 = vld [vmem:[#allocation37_spill] sm:$0xff] }
 0x399   : > { %v2364_v25 = vpack.c.bf16 %v2340_v39, %v2340_v39  ;;  %v3301_v44 = vpop.f32.mrf.mxu2  ;;  %v4837_v60 = vld [vmem:[#allocation9 + $0x160] sm:$0xff]  ;;  %v2012_v39 = vadd.f32 %v6181_v63, %v1933_v34 }
 0x39a   : > { %v3370_v58 = vpop.f32.mrf.mxu3  ;;  %v2128_v57 = vmul.f32 %v6279_v2, %v2089_v12  ;;  %v3302_v51 = vadd.f32 %v3301_v44, %v6247_v21  ;;  %3668 = vmatmul.bf16.gmra.mxu0 %v6203_v49  ;;  %v2508_v56 = vunpack.c.l.b16 %v2316_v17  ;;  %v2438_v61 = vunpack.c.l.b16 %v2270_v29  ;;  %3569 = vmatpush.bf16.msra.mxu3 %v4837_v60 }
 0x39b   : > { %v2580_v53 = vunpack.c.l.b16 %v2364_v25  ;;  %v6307_v6 = vpop.f32.mrf.mxu1  ;;  %v1857_v12 = vadd.f32 %v6154_v55, %v6880_v31  ;;  %v4836_v25 = vld [vmem:[#allocation9 + $0x158] sm:$0xff]  ;;  %v1859_v60 = vadd.f32 %v6176_v50, %v6881_v1  ;;  %v5134_v1 = vmov 0.0  }
 0x39c   : > { %v2159_v52 = vadd.f32 %v6298_v16, %v2128_v57  ;;  %v6301_v10 = vadd.f32 %v3370_v58, %v3302_v51  ;;  %v6303_v3 = vpack.c.b16 %v2508_v56, %v2507_v4  ;;  %v6309_v43 = vpack.c.b16 %v2438_v61, %v2437_v26  ;;  %v4835_v57 = vld [vmem:[#allocation9 + $0x150] sm:$0xff]  ;;  %2221 = vst [vmem:[#allocation2 + $0xe0] sm:$0xff] %v5134_v1 }
 0x39d   : > { %v6305_v21 = vpack.c.b16 %v2580_v53, %v2579_v23  ;;  %v1936_v4 = vadd.f32 %v6192_v7, %v1857_v12 }
 0x39e   : > { %v2187_v17 = vmax.f32 %v2159_v52, 0.0  ;;  %3343 = vmatmul.bf16.gmra.mxu2 %v6303_v3  ;;  %3279 = vmatmul.bf16.gmra.mxu1 %v6309_v43 }
 0x39f   : > { %3412 = vmatmul.bf16.gmra.mxu3 %v6305_v21  ;;  %v2090_v29 = vpop.f32.mrf.mxu0  ;;  %v2293_v34 = vld [vmem:[#allocation2 + $0xa1] sm:$0xff]  ;;  %v2015_v7 = vadd.f32 %v6196_v46, %v1936_v4 }
 0x3a0   : > { %2215 = vst [vmem:[#allocation2 + $0xb0] sm:$0xff] %v2187_v17  ;;  %v2091_v8 = vadd.f32 %v2090_v29, %v2012_v39  ;;  %3570 = vmatpush.bf16.msra.mxu3 %v4836_v25  ;;  %v2341_v23 = vld [vmem:[#allocation2 + $0xa2] sm:$0xff]  ;;  %v2317_v26 = vpack.c.bf16 %v2293_v34, %v2293_v34  ;;  %v2271_v25 = vpack.c.bf16 %v2187_v17, %v2187_v17 }
 0x3a1   : > { %v3304_v44 = vpop.f32.mrf.mxu2  ;;  %v2365_v61 = vpack.c.bf16 %v2341_v23, %v2341_v23  ;;  %v4834_v39 = vld [vmem:[#allocation9 + $0x148] sm:$0xff] }
 0x3a2   : > { %v3373_v58 = vpop.f32.mrf.mxu3  ;;  %v2129_v63 = vmul.f32 %v6279_v2, %v2091_v8  ;;  %v3305_v55 = vadd.f32 %v3304_v44, %v6265_v47  ;;  %v2509_v34 = vunpack.c.l.b16 %v2317_v26 }
 0x3a3   : > { %v6323_v53 = vpop.f32.mrf.mxu1  ;;  %v2581_v23 = vunpack.c.l.b16 %v2365_v61 }
 0x3a4   : > { %v2160_v51 = vadd.f32 %v6298_v16, %v2129_v63  ;;  %v6321_v56 = vadd.f32 %v3373_v58, %v3305_v55  ;;  %3571 = vmatpush.bf16.msra.mxu3 %v4835_v57  ;;  %v1938_v63 = vadd.f32 %v6215_v13, %v1859_v60 }
 0x3a6   : > { %v2188_v52 = vmax.f32 %v2160_v51, 0.0  ;;  %v4833_v51 = vld [vmem:[#allocation9 + $0x140] sm:$0xff] }
 0x3a7   : > { %v2093_v47 = vpop.f32.mrf.mxu0  ;;  %v2294_v31 = vld [vmem:[#allocation2 + $0xa9] sm:$0xff] }
 0x3a8   : > { %v2342_v12 = vld [vmem:[#allocation2 + $0xaa] sm:$0xff]  ;;  %2216 = vst [vmem:[#allocation2 + $0xb8] sm:$0xff] %v2188_v52  ;;  %v2094_v29 = vadd.f32 %v2093_v47, %v2015_v7  ;;  %v2318_v8 = vpack.c.bf16 %v2294_v31, %v2294_v31  ;;  %v2272_v58 = vpack.c.bf16 %v2188_v52, %v2188_v52  ;;  %3572 = vmatpush.bf16.msra.mxu3 %v4834_v39  ;;  %v2439_v7 = vunpack.c.l.b16 %v2271_v25 }
 0x3a9   : > { %v2366_v44 = vpack.c.bf16 %v2342_v12, %v2342_v12  ;;  %v3306_v55 = vpop.f32.mrf.mxu2  ;;  %v2017_v47 = vadd.f32 %v6220_v33, %v1938_v63  ;;  %v6882_v31 = vld [vmem:[#allocation25_spill] sm:$0xff] }
 0x3aa   : > { %v3375_v50 = vpop.f32.mrf.mxu3  ;;  %v2130_v46 = vmul.f32 %v6279_v2, %v2094_v29  ;;  %v3307_v4 = vadd.f32 %v3306_v55, %v6286_v41  ;;  %3673 = vmatmul.bf16.gmra.mxu0 %v6233_v14  ;;  %v2510_v57 = vunpack.c.l.b16 %v2318_v8  ;;  %v2440_v52 = vunpack.c.l.b16 %v2272_v58  ;;  %v4864_v29 = vld [vmem:[#allocation9 + $0x238] sm:$0xff] }
 0x3ab   : > { %v2582_v17 = vunpack.c.l.b16 %v2366_v44  ;;  %v6339_v39 = vpop.f32.mrf.mxu1  ;;  %v1862_v12 = vadd.f32 %v6190_v30, %v6882_v31  ;;  %3773 = vmatpush.bf16.msra.mxu2 %v4864_v29 }
 0x3ac   : > { %v2161_v13 = vadd.f32 %v6298_v16, %v2130_v46  ;;  %v6333_v60 = vadd.f32 %v3375_v50, %v3307_v4  ;;  %v6335_v26 = vpack.c.b16 %v2510_v57, %v2509_v34  ;;  %v6341_v41 = vpack.c.b16 %v2440_v52, %v2439_v7  ;;  %3573 = vmatpush.bf16.msra.mxu3 %v4833_v51  ;;  %v4856_v57 = vld [vmem:[#allocation9 + $0x1f8] sm:$0xff] }
 0x3ad   : > { %v6337_v61 = vpack.c.b16 %v2582_v17, %v2581_v23  ;;  %v1941_v50 = vadd.f32 %v6238_v18, %v1862_v12  ;;  %v6883_v17 = vld [vmem:[#allocation38_spill] sm:$0xff]  ;;  %3704 = vmatpush.bf16.msra.mxu1 %v4856_v57 }
 0x3ae   : > { %v2189_v25 = vmax.f32 %v2161_v13, 0.0  ;;  %3348 = vmatmul.bf16.gmra.mxu2 %v6335_v26  ;;  %3284 = vmatmul.bf16.gmra.mxu1 %v6341_v41  ;;  %v1864_v51 = vadd.f32 %v6213_v48, %v6883_v17 }
 0x3af   : > { %3417 = vmatmul.bf16.gmra.mxu3 %v6337_v61  ;;  %v2095_v8 = vpop.f32.mrf.mxu0  ;;  %v2295_v63 = vld [vmem:[#allocation2 + $0xb1] sm:$0xff]  ;;  %v2020_v52 = vadd.f32 %v6242_v28, %v1941_v50 }
 0x3b0   : > { %2217 = vst [vmem:[#allocation2 + $0xc0] sm:$0xff] %v2189_v25  ;;  %v2096_v44 = vadd.f32 %v2095_v8, %v2017_v47  ;;  %v2343_v34 = vld [vmem:[#allocation2 + $0xb2] sm:$0xff]  ;;  %v2319_v1 = vpack.c.bf16 %v2295_v63, %v2295_v63  ;;  %v2371_v31 = vpack.c.bf16 %v2189_v25, %v2189_v25 }
 0x3b1   : > { %v3309_v58 = vpop.f32.mrf.mxu2  ;;  %v2367_v7 = vpack.c.bf16 %v2343_v34, %v2343_v34 }
 0x3b2   : > { %v3378_v55 = vpop.f32.mrf.mxu3  ;;  %v2131_v33 = vmul.f32 %v6279_v2, %v2096_v44  ;;  %v3310_v30 = vadd.f32 %v3309_v58, %v6307_v6  ;;  %v1943_v58 = vadd.f32 %v6254_v15, %v1864_v51  ;;  %v2511_v48 = vunpack.c.l.b16 %v2319_v1 }
 0x3b3   : > { %v3247_v4 = vpop.f32.mrf.mxu1  ;;  %v2611_v25 = vunpack.c.l.b16 %v2371_v31 }
 0x3b4   : > { %v2162_v23 = vadd.f32 %v6298_v16, %v2131_v33  ;;  %v6353_v46 = vadd.f32 %v3378_v55, %v3310_v30  ;;  %v2583_v30 = vunpack.c.l.b16 %v2367_v7  ;;  %v2022_v7 = vadd.f32 %v6256_v40, %v1943_v58 }
 0x3b6   : > { %v2190_v18 = vmax.f32 %v2162_v23, 0.0 }
 0x3b7   : > { %v2098_v13 = vpop.f32.mrf.mxu0  ;;  %v2296_v47 = vld [vmem:[#allocation2 + $0xb9] sm:$0xff] }
 0x3b8   : > { %v2344_v6 = vld [vmem:[#allocation2 + $0xba] sm:$0xff]  ;;  %2218 = vst [vmem:[#allocation2 + $0xc8] sm:$0xff] %v2190_v18  ;;  %v2099_v12 = vadd.f32 %v2098_v13, %v2020_v52  ;;  %v2320_v29 = vpack.c.bf16 %v2296_v47, %v2296_v47  ;;  %v2372_v44 = vpack.c.bf16 %v2190_v18, %v2190_v18 }
 0x3b9   : > { %v2368_v8 = vpack.c.bf16 %v2344_v6, %v2344_v6  ;;  %v3311_v55 = vpop.f32.mrf.mxu2 }
 0x3ba   : > { %v3380_v33 = vpop.f32.mrf.mxu3  ;;  %v2132_v63 = vmul.f32 %v6279_v2, %v2099_v12  ;;  %v3312_v28 = vadd.f32 %v3311_v55, %v6323_v53  ;;  %3678 = vmatmul.bf16.gmra.mxu0 %v6267_v54  ;;  %v2512_v50 = vunpack.c.l.b16 %v2320_v29  ;;  %v2612_v23 = vunpack.c.l.b16 %v2372_v44  ;;  %v4863_v44 = vld [vmem:[#allocation9 + $0x230] sm:$0xff] }
 0x3bb   : > { %v2584_v34 = vunpack.c.l.b16 %v2368_v8  ;;  %v3250_v51 = vpop.f32.mrf.mxu1  ;;  %3774 = vmatpush.bf16.msra.mxu2 %v4863_v44 }
 0x3bc   : > { %v2163_v57 = vadd.f32 %v6298_v16, %v2132_v63  ;;  %v6363_v17 = vadd.f32 %v3380_v33, %v3312_v28  ;;  %v6365_v52 = vpack.c.b16 %v2512_v50, %v2511_v48  ;;  %v6369_v1 = vpack.c.b16 %v2612_v23, %v2611_v25 }
 0x3bd   : > { %v6367_v15 = vpack.c.b16 %v2584_v34, %v2583_v30 }
 0x3be   : > { %v2191_v53 = vmax.f32 %v2163_v57, 0.0  ;;  %3353 = vmatmul.bf16.gmra.mxu2 %v6365_v52  ;;  %3436 = vmatmul.bf16.vlgmr.msrb.gmra.mxu1 %v6012_v42 }
 0x3bf   : > { %3422 = vmatmul.bf16.gmra.mxu3 %v6367_v15  ;;  %v2100_v18 = vpop.f32.mrf.mxu0 }
 0x3c0   : > { %2219 = vst [vmem:[#allocation2 + $0xd0] sm:$0xff] %v2191_v53  ;;  %v2101_v13 = vadd.f32 %v2100_v18, %v2022_v7  ;;  %v2383_v55 = vpack.c.bf16 %v2191_v53, %v2191_v53 }
 0x3c1   : > { %v3314_v47 = vpop.f32.mrf.mxu2 }
 0x3c2   : > { %v3383_v6 = vpop.f32.mrf.mxu3  ;;  %v2133_v31 = vmul.f32 %v6279_v2, %v2101_v13  ;;  %v3315_v12 = vadd.f32 %v3314_v47, %v6339_v39  ;;  %v2629_v63 = vunpack.c.l.b16 %v2383_v55 }
 0x3c3   : > { %v3252_v40 = vpop.f32.mrf.mxu1 }
 0x3c4   : > { %v2164_v29 = vadd.f32 %v6298_v16, %v2133_v31  ;;  %v6378_v8 = vadd.f32 %v3383_v6, %v3315_v12  ;;  %v4855_v16 = vld [vmem:[#allocation9 + $0x1f0] sm:$0xff]  ;;  %v4854_v12 = vld [vmem:[#allocation9 + $0x1e8] sm:$0xff] }
 0x3c5   : > { %3705 = vmatpush.bf16.msra.mxu1 %v4855_v16 }
 0x3c6   : > { %v2192_v58 = vmax.f32 %v2164_v29, 0.0 }
 0x3c8   : > { %2220 = vst [vmem:[#allocation2 + $0xd8] sm:$0xff] %v2192_v58  ;;  %v2384_v33 = vpack.c.bf16 %v2192_v58, %v2192_v58 }
 0x3c9   : > { %v3316_v42 = vpop.f32.mrf.mxu2  ;;  %3706 = vmatpush.bf16.msra.mxu1 %v4854_v12 }
 0x3ca   : > { %v3385_v48 = vpop.f32.mrf.mxu3  ;;  %v3317_v30 = vadd.f32 %v3316_v42, %v3247_v4  ;;  %3683 = vmatmul.bf16.gmra.mxu0 %v6309_v43  ;;  %v2630_v2 = vunpack.c.l.b16 %v2384_v33 }
 0x3cb   : > { %v3255_v39 = vpop.f32.mrf.mxu1 }
 0x3cc   : > { %v6381_v28 = vadd.f32 %v3385_v48, %v3317_v30  ;;  %v2631_v50 = vpack.c.b16 %v2630_v2, %v2629_v63  ;;  %v4861_v63 = vld [vmem:[#allocation9 + $0x220] sm:$0xff] }
 0x3ce   : > { %3505 = vmatmul.bf16.vlgmr.msrb.gmra.mxu2 %v6040_v45  ;;  %3441 = vmatmul.bf16.gmra.mxu1 %v6044_v0  ;;  %v4862_v45 = vld [vmem:[#allocation9 + $0x228] sm:$0xff] }
 0x3cf   : > { %3574 = vmatmul.bf16.vlgmr.msra.gmra.mxu3 %v6042_v62  ;;  %3775 = vmatpush.bf16.msra.mxu2 %v4862_v45 }
 0x3d1   : > { %v3319_v34 = vpop.f32.mrf.mxu2 }
 0x3d2   : > { %v3388_v25 = vpop.f32.mrf.mxu3  ;;  %v3320_v23 = vadd.f32 %v3319_v34, %v3250_v51 }
 0x3d3   : > { %v3257_v57 = vpop.f32.mrf.mxu1  ;;  %3776 = vmatpush.bf16.msra.mxu2 %v4861_v63  ;;  %v6884_v63 = vld [vmem:[#allocation36_spill] sm:$0xff] }
 0x3d4   : > { %v6386_v4 = vadd.f32 %v3388_v25, %v3320_v23  ;;  %v4853_v23 = vld [vmem:[#allocation9 + $0x1e0] sm:$0xff] }
 0x3d5   : > { %3707 = vmatpush.bf16.msra.mxu1 %v4853_v23 }
 0x3d9   : > { %v3321_v7 = vpop.f32.mrf.mxu2 }
 0x3da   : > { %v3390_v53 = vpop.f32.mrf.mxu3  ;;  %v3322_v18 = vadd.f32 %v3321_v7, %v3252_v40  ;;  %3688 = vmatmul.bf16.gmra.mxu0 %v6341_v41 }
 0x3db   : > { %v3260_v47 = vpop.f32.mrf.mxu1 }
 0x3dc   : > { %v6389_v13 = vadd.f32 %v3390_v53, %v3322_v18 }
 0x3de   : > { %3510 = vmatmul.bf16.gmra.mxu2 %v6070_v11  ;;  %3446 = vmatmul.bf16.gmra.mxu1 %v6074_v27 }
 0x3df   : > { %3579 = vmatmul.bf16.gmra.mxu3 %v6072_v38 }
 0x3e1   : > { %v3324_v62 = vpop.f32.mrf.mxu2 }
 0x3e2   : > { %v3393_v0 = vpop.f32.mrf.mxu3  ;;  %v3325_v51 = vadd.f32 %v3324_v62, %v3255_v39 }
 0x3e3   : > { %v3262_v31 = vpop.f32.mrf.mxu1 }
 0x3e4   : > { %v6394_v6 = vadd.f32 %v3393_v0, %v3325_v51  ;;  %v4860_v51 = vld [vmem:[#allocation9 + $0x218] sm:$0xff] }
 0x3e5   : > { %3777 = vmatpush.bf16.msra.mxu2 %v4860_v51  ;;  %v6886_v51 = vld [vmem:[#allocation43_spill] sm:$0xff] }
 0x3e9   : > { %v3326_v29 = vpop.f32.mrf.mxu2 }
 0x3ea   : > { %v3395_v40 = vpop.f32.mrf.mxu3  ;;  %v3327_v44 = vadd.f32 %v3326_v29, %v3257_v57  ;;  %3693 = vmatmul.bf16.gmra.mxu0 %v6369_v1 }
 0x3eb   : > { %v3265_v55 = vpop.f32.mrf.mxu1 }
 0x3ec   : > { %v6397_v58 = vadd.f32 %v3395_v40, %v3327_v44  ;;  %v4852_v44 = vld [vmem:[#allocation9 + $0x1d8] sm:$0xff] }
 0x3ed   : > { %3708 = vmatpush.bf16.msra.mxu1 %v4852_v44 }
 0x3ee   : > { %3515 = vmatmul.bf16.gmra.mxu2 %v6103_v22  ;;  %3451 = vmatmul.bf16.gmra.mxu1 %v6107_v37 }
 0x3ef   : > { %3584 = vmatmul.bf16.gmra.mxu3 %v6105_v24 }
 0x3f1   : > { %v3329_v27 = vpop.f32.mrf.mxu2 }
 0x3f2   : > { %v3398_v33 = vpop.f32.mrf.mxu3  ;;  %v3330_v42 = vadd.f32 %v3329_v27, %v3260_v47 }
 0x3f3   : > { %v3267_v30 = vpop.f32.mrf.mxu1 }
 0x3f4   : > { %v6402_v48 = vadd.f32 %v3398_v33, %v3330_v42 }
 0x3f9   : > { %v3331_v2 = vpop.f32.mrf.mxu2 }
 0x3fa   : > { %v3400_v39 = vpop.f32.mrf.mxu3  ;;  %v3332_v16 = vadd.f32 %v3331_v2, %v3262_v31  ;;  %3698 = vmatmul.bf16.gmra.mxu0 %v2631_v50  ;;  %v6885_v2 = vld [vmem:[#allocation15_spill] sm:$0xff] }
 0x3fb   : > { %v3270_v25 = vpop.f32.mrf.mxu1 }
 0x3fc   : > { %v6404_v34 = vadd.f32 %v3400_v39, %v3332_v16 }
 0x3fe   : > { %3520 = vmatmul.bf16.gmra.mxu2 %v6135_v5  ;;  %3456 = vmatmul.bf16.gmra.mxu1 %v6139_v32 }
 0x3ff   : > { %3589 = vmatmul.bf16.gmra.mxu3 %v6137_v20 }
 0x401   : > { %v3334_v37 = vpop.f32.mrf.mxu2 }
 0x402   : > { %v3403_v57 = vpop.f32.mrf.mxu3  ;;  %v3335_v7 = vadd.f32 %v3334_v37, %v3265_v55  ;;  %v4859_v37 = vld [vmem:[#allocation9 + $0x210] sm:$0xff] }
 0x403   : > { %v3272_v18 = vpop.f32.mrf.mxu1  ;;  %3778 = vmatpush.bf16.msra.mxu2 %v4859_v37 }
 0x404   : > { %v6409_v53 = vadd.f32 %v3403_v57, %v3335_v7 }
 0x409   : > { %v3336_v47 = vpop.f32.mrf.mxu2 }
 0x40a   : > { %v3405_v45 = vpop.f32.mrf.mxu3  ;;  %v3337_v50 = vadd.f32 %v3336_v47, %v3267_v30 }
 0x40b   : > { %v3275_v0 = vpop.f32.mrf.mxu1 }
 0x40c   : > { %v6411_v62 = vadd.f32 %v3405_v45, %v3337_v50  ;;  %v4851_v50 = vld [vmem:[#allocation9 + $0x1d0] sm:$0xff] }
 0x40d   : > { %3709 = vmatpush.bf16.msra.mxu1 %v4851_v50 }
 0x40e   : > { %3525 = vmatmul.bf16.gmra.mxu2 %v6165_v59  ;;  %3461 = vmatmul.bf16.gmra.mxu1 %v6169_v19 }
 0x40f   : > { %3594 = vmatmul.bf16.gmra.mxu3 %v6167_v9 }
 0x411   : > { %v3339_v32 = vpop.f32.mrf.mxu2 }
 0x412   : > { %v3408_v31 = vpop.f32.mrf.mxu3  ;;  %v3340_v12 = vadd.f32 %v3339_v32, %v3270_v25  ;;  %v6887_v32 = vld [vmem:[#allocation44_spill] sm:$0xff] }
 0x413   : > { %v3277_v40 = vpop.f32.mrf.mxu1 }
 0x414   : > { %v6416_v29 = vadd.f32 %v3408_v31, %v3340_v12 }
 0x419   : > { %v3341_v55 = vpop.f32.mrf.mxu2 }
 0x41a   : > { %v3410_v27 = vpop.f32.mrf.mxu3  ;;  %v3342_v33 = vadd.f32 %v3341_v55, %v3272_v18 }
 0x41b   : > { %v3280_v30 = vpop.f32.mrf.mxu1 }
 0x41c   : > { %v6418_v42 = vadd.f32 %v3410_v27, %v3342_v33 }
 0x41e   : > { %3530 = vmatmul.bf16.gmra.mxu2 %v6884_v63  ;;  %3466 = vmatmul.bf16.gmra.mxu1 %v6203_v49 }
 0x41f   : > { %3599 = vmatmul.bf16.gmra.mxu3 %v6885_v2 }
 0x421   : > { %v3344_v19 = vpop.f32.mrf.mxu2 }
 0x422   : > { %v3413_v39 = vpop.f32.mrf.mxu3  ;;  %v3345_v16 = vadd.f32 %v3344_v19, %v3275_v0 }
 0x423   : > { %v3282_v23 = vpop.f32.mrf.mxu1 }
 0x424   : > { %v6423_v25 = vadd.f32 %v3413_v39, %v3345_v16  ;;  %v6888_v16 = vld [vmem:[#allocation24_spill] sm:$0xff] }
 0x429   : > { %v3346_v57 = vpop.f32.mrf.mxu2 }
 0x42a   : > { %v3415_v7 = vpop.f32.mrf.mxu3  ;;  %v3347_v18 = vadd.f32 %v3346_v57, %v3277_v40 }
 0x42b   : > { %v3285_v45 = vpop.f32.mrf.mxu1 }
 0x42c   : > { %v6425_v47 = vadd.f32 %v3415_v7, %v3347_v18 }
 0x42e   : > { %3535 = vmatmul.bf16.gmra.mxu2 %v6886_v51  ;;  %3471 = vmatmul.bf16.gmra.mxu1 %v6233_v14  ;;  %v4858_v14 = vld [vmem:[#allocation9 + $0x208] sm:$0xff] }
 0x42f   : > { %3604 = vmatmul.bf16.gmra.mxu3 %v6887_v32  ;;  %3779 = vmatpush.bf16.msra.mxu2 %v4858_v14 }
 0x431   : > { %v3349_v49 = vpop.f32.mrf.mxu2 }
 0x432   : > { %v3418_v0 = vpop.f32.mrf.mxu3  ;;  %v3350_v31 = vadd.f32 %v3349_v49, %v3280_v30 }
 0x433   : > { %v3287_v44 = vpop.f32.mrf.mxu1 }
 0x434   : > { %v6430_v12 = vadd.f32 %v3418_v0, %v3350_v31 }
 0x439   : > { %v3351_v55 = vpop.f32.mrf.mxu2 }
 0x43a   : > { %v3420_v27 = vpop.f32.mrf.mxu3  ;;  %v3352_v40 = vadd.f32 %v3351_v55, %v3282_v23  ;;  %v4850_v23 = vld [vmem:[#allocation9 + $0x1c8] sm:$0xff] }
 0x43b   : > { %v3437_v19 = vpop.f32.mrf.mxu1  ;;  %3710 = vmatpush.bf16.msra.mxu1 %v4850_v23 }
 0x43c   : > { %v6432_v33 = vadd.f32 %v3420_v27, %v3352_v40  ;;  %v3438_v39 = vadd.f32 %v3437_v19, %v6284_v36 }
 0x43e   : > { %3540 = vmatmul.bf16.gmra.mxu2 %v6261_v35  ;;  %3476 = vmatmul.bf16.gmra.mxu1 %v6267_v54 }
 0x43f   : > { %3609 = vmatmul.bf16.gmra.mxu3 %v6888_v16 }
 0x441   : > { %v3354_v30 = vpop.f32.mrf.mxu2 }
 0x442   : > { %v3423_v37 = vpop.f32.mrf.mxu3  ;;  %v3355_v57 = vadd.f32 %v3354_v30, %v3285_v45  ;;  %v4849_v30 = vld [vmem:[#allocation9 + $0x1c0] sm:$0xff] }
 0x443   : > { %v3439_v18 = vpop.f32.mrf.mxu1  ;;  %3711 = vmatpush.bf16.msra.mxu1 %v4849_v30 }
 0x444   : > { %v6438_v7 = vadd.f32 %v3423_v37, %v3355_v57  ;;  %v3440_v50 = vadd.f32 %v3439_v18, %v6301_v10  ;;  %v4857_v10 = vld [vmem:[#allocation9 + $0x200] sm:$0xff] }
 0x445   : > { %3780 = vmatpush.bf16.msra.mxu2 %v4857_v10 }
 0x449   : > { %v3356_v49 = vpop.f32.mrf.mxu2 }
 0x44a   : > { %v3357_v36 = vadd.f32 %v3356_v49, %v3287_v44  ;;  %v3425_v0 = vpop.f32.mrf.mxu3 }
 0x44b   : > { %v3442_v55 = vpop.f32.mrf.mxu1 }
 0x44c   : > { %v6441_v31 = vadd.f32 %v3425_v0, %v3357_v36  ;;  %v3443_v27 = vadd.f32 %v3442_v55, %v6321_v56  ;;  %v2378_v36 = vld [vmem:[#allocation2 + $0xca] sm:$0xff]  ;;  %v2373_v55 = vld [vmem:[#allocation2 + $0xc1] sm:$0xff] }
 0x44e   : > { %3545 = vmatmul.bf16.gmra.mxu2 %v6303_v3  ;;  %3481 = vmatmul.bf16.gmra.mxu1 %v6309_v43 }
 0x44f   : > { %3614 = vmatmul.bf16.gmra.mxu3 %v6305_v21 }
 0x451   : > { %v3506_v54 = vpop.f32.mrf.mxu2 }
 0x452   : > { %v6447_v45 = vadd.f32 %v3506_v54, %v3438_v39 }
 0x453   : > { %v3444_v40 = vpop.f32.mrf.mxu1 }
 0x454   : > { %v3445_v19 = vadd.f32 %v3444_v40, %v6333_v60  ;;  %v2380_v40 = vpack.c.bf16 %v2378_v36, %v2378_v36 }
 0x456   : > { %v2624_v30 = vunpack.c.l.b16 %v2380_v40 }
 0x459   : > { %v3508_v44 = vpop.f32.mrf.mxu2 }
 0x45a   : > { %v6450_v14 = vadd.f32 %v3508_v44, %v3440_v50 }
 0x45b   : > { %v3447_v37 = vpop.f32.mrf.mxu1 }
 0x45c   : > { %v3448_v56 = vadd.f32 %v3447_v37, %v6353_v46 }
 0x45e   : > { %3550 = vmatmul.bf16.gmra.mxu2 %v6335_v26  ;;  %3486 = vmatmul.bf16.gmra.mxu1 %v6341_v41  ;;  %v2374_v41 = vld [vmem:[#allocation2 + $0xc9] sm:$0xff] }
 0x45f   : > { %3619 = vmatmul.bf16.gmra.mxu3 %v6337_v61  ;;  %v2376_v54 = vpack.c.bf16 %v2374_v41, %v2374_v41 }
 0x461   : > { %v3511_v43 = vpop.f32.mrf.mxu2  ;;  %v2618_v44 = vunpack.c.l.b16 %v2376_v54 }
 0x462   : > { %v6456_v39 = vadd.f32 %v3511_v43, %v3443_v27  ;;  %v2377_v27 = vld [vmem:[#allocation2 + $0xc2] sm:$0xff] }
 0x463   : > { %v3449_v57 = vpop.f32.mrf.mxu1 }
 0x464   : > { %v3450_v60 = vadd.f32 %v3449_v57, %v6363_v17 }
 0x469   : > { %v3513_v18 = vpop.f32.mrf.mxu2 }
 0x46a   : > { %v6459_v23 = vadd.f32 %v3513_v18, %v3445_v19  ;;  %v2375_v19 = vpack.c.bf16 %v2373_v55, %v2373_v55 }
 0x46b   : > { %v3452_v50 = vpop.f32.mrf.mxu1 }
 0x46c   : > { %v3453_v49 = vadd.f32 %v3452_v50, %v6378_v8  ;;  %v2379_v8 = vpack.c.bf16 %v2377_v27, %v2377_v27 }
 0x46e   : > { %3555 = vmatmul.bf16.gmra.mxu2 %v6365_v52  ;;  %3491 = vmatmul.bf16.gmra.mxu1 %v6369_v1  ;;  %v2617_v1 = vunpack.c.l.b16 %v2375_v19  ;;  %v2623_v57 = vunpack.c.l.b16 %v2379_v8 }
 0x46f   : > { %3624 = vmatmul.bf16.gmra.mxu3 %v6367_v15 }
 0x470   : > { %v6470_v18 = vpack.c.b16 %v2618_v44, %v2617_v1 }
 0x471   : > { %v3516_v46 = vpop.f32.mrf.mxu2 }
 0x472   : > { %v6465_v0 = vadd.f32 %v3516_v46, %v3448_v56  ;;  %v6472_v56 = vpack.c.b16 %v2624_v30, %v2623_v57 }
 0x473   : > { %v3454_v17 = vpop.f32.mrf.mxu1 }
 0x474   : > { %v3455_v10 = vadd.f32 %v3454_v17, %v6381_v28 }
 0x479   : > { %v3518_v37 = vpop.f32.mrf.mxu2 }
 0x47a   : > { %v6468_v43 = vadd.f32 %v3518_v37, %v3450_v60 }
 0x47b   : > { %v3457_v50 = vpop.f32.mrf.mxu1 }
 0x47c   : > { %v3458_v46 = vadd.f32 %v3457_v50, %v6386_v4 }
 0x47e   : > { %3560 = vmatmul.bf16.gmra.mxu2 %v6470_v18  ;;  %3712 = vmatmul.bf16.vlgmr.msra.gmra.mxu1 %v6070_v11 }
 0x47f   : > { %3629 = vmatmul.bf16.gmra.mxu3 %v6472_v56 }
 0x481   : > { %v3521_v28 = vpop.f32.mrf.mxu2 }
 0x482   : > { %v6478_v41 = vadd.f32 %v3521_v28, %v3453_v49 }
 0x483   : > { %v3459_v60 = vpop.f32.mrf.mxu1 }
 0x484   : > { %v3460_v36 = vadd.f32 %v3459_v60, %v6389_v13 }
 0x489   : > { %v3523_v55 = vpop.f32.mrf.mxu2 }
 0x48a   : > { %v6481_v27 = vadd.f32 %v3523_v55, %v3455_v10 }
 0x48b   : > { %v3462_v17 = vpop.f32.mrf.mxu1 }
 0x48c   : > { %v3463_v54 = vadd.f32 %v3462_v17, %v6394_v6 }
 0x48e   : > { %3781 = vmatmul.bf16.vlgmr.msra.gmra.mxu2 %v6072_v38  ;;  %3717 = vmatmul.bf16.gmra.mxu1 %v6103_v22 }
 0x491   : > { %v3526_v4 = vpop.f32.mrf.mxu2 }
 0x492   : > { %v6486_v40 = vadd.f32 %v3526_v4, %v3458_v46 }
 0x493   : > { %v3464_v11 = vpop.f32.mrf.mxu1 }
 0x494   : > { %v3465_v49 = vadd.f32 %v3464_v11, %v6397_v58 }
 0x499   : > { %v3528_v19 = vpop.f32.mrf.mxu2 }
 0x49a   : > { %v6489_v8 = vadd.f32 %v3528_v19, %v3460_v36 }
 0x49b   : > { %v3467_v13 = vpop.f32.mrf.mxu1 }
 0x49c   : > { %v3468_v10 = vadd.f32 %v3467_v13, %v6402_v48  ;;  %v3644_v13 = vpop.f32.mrf.mxu0 }
 0x49e   : > { %3786 = vmatmul.bf16.gmra.mxu2 %v6105_v24  ;;  %3722 = vmatmul.bf16.gmra.mxu1 %v6135_v5 }
 0x4a1   : > { %v3531_v6 = vpop.f32.mrf.mxu2 }
 0x4a2   : > { %v6494_v38 = vadd.f32 %v3531_v6, %v3463_v54 }
 0x4a3   : > { %v3469_v22 = vpop.f32.mrf.mxu1 }
 0x4a4   : > { %v3470_v44 = vadd.f32 %v3469_v22, %v6404_v34 }
 0x4a9   : > { %v3533_v30 = vpop.f32.mrf.mxu2 }
 0x4aa   : > { %v6497_v37 = vadd.f32 %v3533_v30, %v3465_v49 }
 0x4ab   : > { %v3472_v58 = vpop.f32.mrf.mxu1 }
 0x4ac   : > { %v3473_v1 = vadd.f32 %v3472_v58, %v6409_v53 }
 0x4ae   : > { %3791 = vmatmul.bf16.gmra.mxu2 %v6137_v20  ;;  %3727 = vmatmul.bf16.gmra.mxu1 %v6165_v59 }
 0x4b1   : > { %v3536_v48 = vpop.f32.mrf.mxu2 }
 0x4b2   : > { %v6502_v24 = vadd.f32 %v3536_v48, %v3468_v10 }
 0x4b3   : > { %v3474_v5 = vpop.f32.mrf.mxu1 }
 0x4b4   : > { %v3475_v57 = vadd.f32 %v3474_v5, %v6411_v62 }
 0x4b9   : > { %v3538_v50 = vpop.f32.mrf.mxu2 }
 0x4ba   : > { %v6505_v46 = vadd.f32 %v3538_v50, %v3470_v44 }
 0x4bb   : > { %v3477_v34 = vpop.f32.mrf.mxu1 }
 0x4bc   : > { %v3478_v28 = vadd.f32 %v3477_v34, %v6416_v29 }
 0x4be   : > { %3796 = vmatmul.bf16.gmra.mxu2 %v6167_v9  ;;  %3732 = vmatmul.bf16.gmra.mxu1 %v6884_v63 }
 0x4c1   : > { %v3541_v53 = vpop.f32.mrf.mxu2 }
 0x4c2   : > { %v6510_v20 = vadd.f32 %v3541_v53, %v3473_v1 }
 0x4c3   : > { %v3479_v59 = vpop.f32.mrf.mxu1 }
 0x4c4   : > { %v3480_v60 = vadd.f32 %v3479_v59, %v6418_v42  ;;  %v3575_v42 = vpop.f32.mrf.mxu3 }
 0x4c9   : > { %v3543_v36 = vpop.f32.mrf.mxu2 }
 0x4ca   : > { %v6513_v55 = vadd.f32 %v3543_v36, %v3475_v57 }
 0x4cb   : > { %v3482_v62 = vpop.f32.mrf.mxu1 }
 0x4cc   : > { %v3483_v17 = vadd.f32 %v3482_v62, %v6423_v25  ;;  %v3577_v10 = vpop.f32.mrf.mxu3 }
 0x4ce   : > { %3801 = vmatmul.bf16.gmra.mxu2 %v6885_v2  ;;  %3737 = vmatmul.bf16.gmra.mxu1 %v6886_v51 }
 0x4d1   : > { %v3546_v29 = vpop.f32.mrf.mxu2 }
 0x4d2   : > { %v6518_v9 = vadd.f32 %v3546_v29, %v3478_v28 }
 0x4d3   : > { %v3484_v63 = vpop.f32.mrf.mxu1 }
 0x4d4   : > { %v3485_v54 = vadd.f32 %v3484_v63, %v6425_v47  ;;  %v3646_v47 = vpop.f32.mrf.mxu0  ;;  %v6557_v63 = vld [vmem:[%s6707_s5] ss:$0 sm:$0xff] }
 0x4d9   : > { %v3548_v4 = vpop.f32.mrf.mxu2 }
 0x4da   : > { %v6521_v11 = vadd.f32 %v3548_v4, %v3480_v60 }
 0x4db   : > { %v3487_v49 = vpop.f32.mrf.mxu1 }
 0x4dc   : > { %v3488_v19 = vadd.f32 %v3487_v49, %v6430_v12  ;;  %v3580_v12 = vpop.f32.mrf.mxu3 }
 0x4de   : > { %3806 = vmatmul.bf16.gmra.mxu2 %v6887_v32  ;;  %3742 = vmatmul.bf16.gmra.mxu1 %v6261_v35  ;;  %v3649_v32 = vpop.f32.mrf.mxu0 }
 0x4e1   : > { %v3551_v2 = vpop.f32.mrf.mxu2 }
 0x4e2   : > { %v6526_v25 = vadd.f32 %v3551_v2, %v3483_v17 }
 0x4e3   : > { %v3489_v51 = vpop.f32.mrf.mxu1 }
 0x4e4   : > { %v3490_v6 = vadd.f32 %v3489_v51, %v6432_v33  ;;  %v3582_v33 = vpop.f32.mrf.mxu3 }
 0x4e6   : > { %v3651_v34 = vpop.f32.mrf.mxu0 }
 0x4e9   : > { %v3553_v22 = vpop.f32.mrf.mxu2 }
 0x4ea   : > { %v6529_v44 = vadd.f32 %v3553_v22, %v3485_v54 }
 0x4eb   : > { %v3492_v30 = vpop.f32.mrf.mxu1 }
 0x4ec   : > { %v3493_v58 = vadd.f32 %v3492_v30, %v6438_v7 }
 0x4ee   : > { %3811 = vmatmul.bf16.gmra.mxu2 %v6888_v16  ;;  %3747 = vmatmul.bf16.gmra.mxu1 %v6303_v3  ;;  %v3585_v3 = vpop.f32.mrf.mxu3  ;;  %v6543_v59 = vpop.f32.mrf.mxu0 }
 0x4f1   : > { %v3556_v35 = vpop.f32.mrf.mxu2 }
 0x4f2   : > { %v6534_v1 = vadd.f32 %v3556_v35, %v3488_v19 }
 0x4f3   : > { %v3494_v48 = vpop.f32.mrf.mxu1 }
 0x4f4   : > { %v3495_v5 = vadd.f32 %v3494_v48, %v6441_v31  ;;  %v3576_v31 = vadd.f32 %v3575_v42, %v6447_v45  ;;  %v3578_v45 = vadd.f32 %v3577_v10, %v6450_v14  ;;  %v6563_v42 = vld [vmem:[%s6708_s6] ss:$0 sm:$0xff]  ;;  %v3581_v14 = vadd.f32 %v3580_v12, %v6456_v39  ;;  %v2385_v12 = vld [vmem:[#allocation2 + $0xd1] sm:$0xff] }
 0x4f6   : > { %v6548_v17 = vpop.f32.mrf.mxu3  ;;  %v3645_v29 = vadd.f32 %v3644_v13, %v3576_v31  ;;  %v3647_v49 = vadd.f32 %v3646_v47, %v3578_v45  ;;  %v3650_v35 = vadd.f32 %v3649_v32, %v3581_v14 }
 0x4f9   : > { %v3558_v57 = vpop.f32.mrf.mxu2 }
 0x4fa   : > { %v6537_v50 = vadd.f32 %v3558_v57, %v3490_v6 }
 0x4fb   : > { %v3713_v28 = vpop.f32.mrf.mxu1 }
 0x4fe   : > { %3816 = vmatmul.bf16.gmra.mxu2 %v6305_v21  ;;  %3752 = vmatmul.bf16.gmra.mxu1 %v6335_v26  ;;  %v6552_v21 = vpop.f32.mrf.mxu0  ;;  %v3714_v26 = vadd.f32 %v3713_v28, %v3645_v29  ;;  %v6567_v13 = vpop.f32.mrf.mxu3  ;;  %v2387_v29 = vpack.c.bf16 %v2385_v12, %v2385_v12 }
 0x501   : > { %v3561_v16 = vpop.f32.mrf.mxu2 }
 0x502   : > { %v6541_v7 = vadd.f32 %v3561_v16, %v3493_v58  ;;  %v3583_v16 = vadd.f32 %v3582_v33, %v6459_v23  ;;  %v3586_v23 = vadd.f32 %v3585_v3, %v6465_v0  ;;  %v2389_v3 = vld [vmem:[#allocation2 + $0xd2] sm:$0xff] }
 0x503   : > { %v3715_v53 = vpop.f32.mrf.mxu1 }
 0x504   : > { %v3716_v2 = vadd.f32 %v3715_v53, %v3647_v49  ;;  %v2386_v53 = vld [vmem:[#allocation2 + $0xd9] sm:$0xff] }
 0x506   : > { %v6569_v22 = vpop.f32.mrf.mxu0  ;;  %v6576_v57 = vpop.f32.mrf.mxu3 }
 0x509   : > { %v3563_v60 = vpop.f32.mrf.mxu2 }
 0x50a   : > { %v6546_v36 = vadd.f32 %v3563_v60, %v3495_v5 }
 0x50b   : > { %v3718_v62 = vpop.f32.mrf.mxu1 }
 0x50c   : > { %v3719_v47 = vadd.f32 %v3718_v62, %v3650_v35  ;;  %v3588_v35 = vadd.f32 %v6548_v17, %v6468_v43 }
 0x50e   : > { %3821 = vmatmul.bf16.gmra.mxu2 %v6337_v61  ;;  %3757 = vmatmul.bf16.gmra.mxu1 %v6365_v52  ;;  %v6579_v60 = vpop.f32.mrf.mxu0  ;;  %v6584_v49 = vpop.f32.mrf.mxu3 }
 0x511   : > { %v3782_v54 = vpop.f32.mrf.mxu2 }
 0x512   : > { %v3783_v4 = vadd.f32 %v3782_v54, %v3714_v26  ;;  %v3652_v26 = vadd.f32 %v3651_v34, %v3583_v16  ;;  %v3655_v34 = vadd.f32 %v6543_v59, %v3586_v23  ;;  %v2391_v59 = vpack.c.bf16 %v2389_v3, %v2389_v3 }
 0x513   : > { %v3720_v52 = vpop.f32.mrf.mxu1 }
 0x514   : > { %v3845_v61 = vmul.f32 %v6557_v63, %v3783_v4  ;;  %v3721_v62 = vadd.f32 %v3720_v52, %v3652_v26  ;;  %v2635_v4 = vunpack.c.l.b16 %v2387_v29 }
 0x516   : > { %v3872_v19 = vadd.f32 %v6563_v42, %v3845_v61  ;;  %v3597_v16 = vpop.f32.mrf.mxu3 }
 0x518   : > { %v3896_v51 = vmax.f32 %v3872_v19, 0.0 }
 0x519   : > { %v3784_v6 = vpop.f32.mrf.mxu2 }
 0x51a   : > { %3920 = vst [vmem:[#allocation3] sm:$0xff] %v3896_v51  ;;  %v3785_v10 = vadd.f32 %v3784_v6, %v3716_v2  ;;  %v6587_v6 = vpop.f32.mrf.mxu0 }
 0x51b   : > { %v3723_v58 = vpop.f32.mrf.mxu1 }
 0x51c   : > { %v3846_v30 = vmul.f32 %v6557_v63, %v3785_v10  ;;  %v3724_v14 = vadd.f32 %v3723_v58, %v3655_v34 }
 0x51e   : > { %v3873_v48 = vadd.f32 %v6563_v42, %v3846_v30  ;;  %3826 = vmatmul.bf16.gmra.mxu2 %v6367_v15  ;;  %3762 = vmatmul.bf16.gmra.mxu1 %v6470_v18  ;;  %v2388_v15 = vpack.c.bf16 %v2386_v53, %v2386_v53  ;;  %v2390_v30 = vld [vmem:[#allocation2 + $0xda] sm:$0xff] }
 0x520   : > { %v3897_v5 = vmax.f32 %v3873_v48, 0.0  ;;  %v2636_v61 = vunpack.c.l.b16 %v2388_v15  ;;  %v2641_v15 = vunpack.c.l.b16 %v2391_v59 }
 0x521   : > { %v3787_v28 = vpop.f32.mrf.mxu2 }
 0x522   : > { %3921 = vst [vmem:[#allocation3 + $0x8] sm:$0xff] %v3897_v5  ;;  %v3788_v39 = vadd.f32 %v3787_v28, %v3719_v47  ;;  %v2637_v51 = vpack.c.b16 %v2636_v61, %v2635_v4  ;;  %v2392_v28 = vpack.c.bf16 %v2390_v30, %v2390_v30  ;;  %v3666_v53 = vpop.f32.mrf.mxu0 }
 0x523   : > { %v3725_v31 = vpop.f32.mrf.mxu1 }
 0x524   : > { %v3847_v32 = vmul.f32 %v6557_v63, %v3788_v39  ;;  %v2642_v43 = vunpack.c.l.b16 %v2392_v28 }
 0x526   : > { %v3874_v18 = vadd.f32 %v6563_v42, %v3847_v32  ;;  %v2643_v61 = vpack.c.b16 %v2642_v43, %v2641_v15 }
 0x528   : > { %v3898_v54 = vmax.f32 %v3874_v18, 0.0 }
 0x529   : > { %v3789_v45 = vpop.f32.mrf.mxu2  ;;  %v3944_v39 = vld [vmem:[#allocation3] ss:$2 sm:$0xff]  ;;  %v3968_v12 = vld [vmem:[#allocation3 + $0x1] ss:$2 sm:$0xff] }
 0x52a   : > { %3922 = vst [vmem:[#allocation3 + $0x10] sm:$0xff] %v3898_v54  ;;  %v3790_v33 = vadd.f32 %v3789_v45, %v3721_v62  ;;  %v3591_v62 = vadd.f32 %v6567_v13, %v6478_v41  ;;  %v3991_v54 = vmax.f32 %v3944_v39, %v3968_v12 }
 0x52b   : > { %v3728_v2 = vpop.f32.mrf.mxu1 }
 0x52c   : > { %v3848_v19 = vmul.f32 %v6557_v63, %v3790_v33 }
 0x52e   : > { %v3875_v52 = vadd.f32 %v6563_v42, %v3848_v19  ;;  %3831 = vmatmul.bf16.gmra.mxu2 %v6472_v56  ;;  %3767 = vmatmul.bf16.gmra.mxu1 %v2637_v51  ;;  %v3657_v56 = vadd.f32 %v6552_v21, %v3588_v35  ;;  %v3600_v51 = vpop.f32.mrf.mxu3 }
 0x530   : > { %v3899_v10 = vmax.f32 %v3875_v52, 0.0  ;;  %v3726_v32 = vadd.f32 %v3725_v31, %v3657_v56  ;;  %v3660_v31 = vadd.f32 %v6569_v22, %v3591_v62  ;;  %v3669_v52 = vpop.f32.mrf.mxu0 }
 0x531   : > { %v3792_v0 = vpop.f32.mrf.mxu2 }
 0x532   : > { %3923 = vst [vmem:[#allocation3 + $0x18] sm:$0xff] %v3899_v10  ;;  %v3793_v48 = vadd.f32 %v3792_v0, %v3724_v14  ;;  %v3729_v41 = vadd.f32 %v3728_v2, %v3660_v31  ;;  %v3593_v14 = vadd.f32 %v6576_v57, %v6481_v27  ;;  %v3596_v2 = vadd.f32 %v6584_v49, %v6486_v40 }
 0x533   : > { %v3730_v5 = vpop.f32.mrf.mxu1 }
 0x534   : > { %v3849_v47 = vmul.f32 %v6557_v63, %v3793_v48  ;;  %v3662_v3 = vadd.f32 %v6579_v60, %v3593_v14 }
 0x536   : > { %v3876_v58 = vadd.f32 %v6563_v42, %v3849_v47  ;;  %v3731_v35 = vadd.f32 %v3730_v5, %v3662_v3  ;;  %v3602_v47 = vpop.f32.mrf.mxu3  ;;  %v3598_v5 = vadd.f32 %v3597_v16, %v6489_v8  ;;  %v3601_v8 = vadd.f32 %v3600_v51, %v6494_v38 }
 0x538   : > { %v3900_v29 = vmax.f32 %v3876_v58, 0.0  ;;  %v3671_v56 = vpop.f32.mrf.mxu0  ;;  %v3665_v58 = vadd.f32 %v6587_v6, %v3596_v2 }
 0x539   : > { %v3946_v17 = vld [vmem:[#allocation3 + $0x10] ss:$2 sm:$0xff]  ;;  %v3970_v26 = vld [vmem:[#allocation3 + $0x11] ss:$2 sm:$0xff]  ;;  %v3794_v18 = vpop.f32.mrf.mxu2 }
 0x53a   : > { %v3992_v45 = vmax.f32 %v3946_v17, %v3970_v26  ;;  %3924 = vst [vmem:[#allocation3 + $0x20] sm:$0xff] %v3900_v29  ;;  %v3795_v21 = vadd.f32 %v3794_v18, %v3726_v32  ;;  %v3667_v17 = vadd.f32 %v3666_v53, %v3598_v5 }
 0x53b   : > { %v3733_v23 = vpop.f32.mrf.mxu1 }
 0x53c   : > { %v3850_v4 = vmul.f32 %v6557_v63, %v3795_v21  ;;  %v4003_v33 = vmax.f32 %v3991_v54, %v3992_v45  ;;  %v3734_v60 = vadd.f32 %v3733_v23, %v3665_v58 }
 0x53e   : > { %v3877_v19 = vadd.f32 %v6563_v42, %v3850_v4  ;;  %3836 = vmatmul.bf16.gmra.mxu2 %v2643_v61  ;;  %4004 = vst [vmem:[%s6603_s10] sm:$0xff] %v4003_v33  ;;  %v3605_v15 = vpop.f32.mrf.mxu3 }
 0x540   : > { %v3901_v13 = vmax.f32 %v3877_v19, 0.0  ;;  %v3674_v43 = vpop.f32.mrf.mxu0 }
 0x541   : > { %v3797_v34 = vpop.f32.mrf.mxu2 }
 0x542   : > { %3925 = vst [vmem:[#allocation3 + $0x28] sm:$0xff] %v3901_v13  ;;  %v3798_v10 = vadd.f32 %v3797_v34, %v3729_v41  ;;  %v3670_v41 = vadd.f32 %v3669_v52, %v3601_v8 }
 0x543   : > { %v3735_v22 = vpop.f32.mrf.mxu1 }
 0x544   : > { %v3851_v0 = vmul.f32 %v6557_v63, %v3798_v10  ;;  %v3736_v6 = vadd.f32 %v3735_v22, %v3667_v17  ;;  %v3603_v22 = vadd.f32 %v3602_v47, %v6497_v37 }
 0x546   : > { %v3878_v30 = vadd.f32 %v6563_v42, %v3851_v0  ;;  %v3607_v19 = vpop.f32.mrf.mxu3 }
 0x547   : > { %v3608_v5 = vadd.f32 %v3607_v19, %v6505_v46 }
 0x548   : > { %v3902_v48 = vmax.f32 %v3878_v30, 0.0  ;;  %v3676_v34 = vpop.f32.mrf.mxu0  ;;  %v3672_v30 = vadd.f32 %v3671_v56, %v3603_v22 }
 0x549   : > { %v3799_v59 = vpop.f32.mrf.mxu2  ;;  %v3948_v18 = vld [vmem:[#allocation3 + $0x20] ss:$2 sm:$0xff]  ;;  %v3972_v62 = vld [vmem:[#allocation3 + $0x21] ss:$2 sm:$0xff] }
 0x54a   : > { %3926 = vst [vmem:[#allocation3 + $0x30] sm:$0xff] %v3902_v48  ;;  %v3800_v28 = vadd.f32 %v3799_v59, %v3731_v35  ;;  %v3993_v16 = vmax.f32 %v3948_v18, %v3972_v62 }
 0x54b   : > { %v3738_v57 = vpop.f32.mrf.mxu1 }
 0x54c   : > { %v3852_v27 = vmul.f32 %v6557_v63, %v3800_v28  ;;  %v3739_v14 = vadd.f32 %v3738_v57, %v3670_v41 }
 0x54e   : > { %v3879_v39 = vadd.f32 %v6563_v42, %v3852_v27  ;;  %v3610_v48 = vpop.f32.mrf.mxu3  ;;  %v3606_v27 = vadd.f32 %v3605_v15, %v6502_v24  ;;  %v3677_v15 = vadd.f32 %v3676_v34, %v3608_v5 }
 0x550   : > { %v3903_v12 = vmax.f32 %v3879_v39, 0.0  ;;  %v3679_v28 = vpop.f32.mrf.mxu0  ;;  %v3675_v47 = vadd.f32 %v3674_v43, %v3606_v27 }
 0x551   : > { %v3802_v32 = vpop.f32.mrf.mxu2 }
 0x552   : > { %3927 = vst [vmem:[#allocation3 + $0x38] sm:$0xff] %v3903_v12  ;;  %v3803_v29 = vadd.f32 %v3802_v32, %v3734_v60 }
 0x553   : > { %v3740_v49 = vpop.f32.mrf.mxu1 }
 0x554   : > { %v3853_v40 = vmul.f32 %v6557_v63, %v3803_v29  ;;  %v3741_v59 = vadd.f32 %v3740_v49, %v3672_v30 }
 0x556   : > { %v3880_v26 = vadd.f32 %v6563_v42, %v3853_v40  ;;  %v3612_v56 = vpop.f32.mrf.mxu3 }
 0x558   : > { %v3904_v54 = vmax.f32 %v3880_v26, 0.0  ;;  %v3681_v40 = vpop.f32.mrf.mxu0 }
 0x559   : > { %v3950_v45 = vld [vmem:[#allocation3 + $0x30] ss:$2 sm:$0xff]  ;;  %v3974_v21 = vld [vmem:[#allocation3 + $0x31] ss:$2 sm:$0xff]  ;;  %v3804_v4 = vpop.f32.mrf.mxu2 }
 0x55a   : > { %v3994_v61 = vmax.f32 %v3950_v45, %v3974_v21  ;;  %3928 = vst [vmem:[#allocation3 + $0x40] sm:$0xff] %v3904_v54  ;;  %v3805_v23 = vadd.f32 %v3804_v4, %v3736_v6  ;;  %v3611_v21 = vadd.f32 %v3610_v48, %v6510_v20 }
 0x55b   : > { %v3743_v31 = vpop.f32.mrf.mxu1 }
 0x55c   : > { %v3854_v33 = vmul.f32 %v6557_v63, %v3805_v23  ;;  %v4005_v53 = vmax.f32 %v3993_v16, %v3994_v61  ;;  %v3744_v60 = vadd.f32 %v3743_v31, %v3675_v47  ;;  %v3680_v31 = vadd.f32 %v3679_v28, %v3611_v21 }
 0x55e   : > { %v3881_v13 = vadd.f32 %v6563_v42, %v3854_v33  ;;  %4713 = vst [vmem:[%s6603_s10 + $0x8] sm:$0xff] %v4005_v53  ;;  %v3615_v16 = vpop.f32.mrf.mxu3 }
 0x560   : > { %v3905_v10 = vmax.f32 %v3881_v13, 0.0  ;;  %v3684_v33 = vpop.f32.mrf.mxu0 }
 0x561   : > { %v3807_v0 = vpop.f32.mrf.mxu2 }
 0x562   : > { %3929 = vst [vmem:[#allocation3 + $0x48] sm:$0xff] %v3905_v10  ;;  %v3808_v38 = vadd.f32 %v3807_v0, %v3739_v14  ;;  %v3613_v14 = vadd.f32 %v3612_v56, %v6513_v55 }
 0x563   : > { %v3745_v3 = vpop.f32.mrf.mxu1 }
 0x564   : > { %v3855_v51 = vmul.f32 %v6557_v63, %v3808_v38  ;;  %v3746_v43 = vadd.f32 %v3745_v3, %v3677_v15  ;;  %v3682_v22 = vadd.f32 %v3681_v40, %v3613_v14 }
 0x566   : > { %v3882_v35 = vadd.f32 %v6563_v42, %v3855_v51  ;;  %v3617_v0 = vpop.f32.mrf.mxu3 }
 0x568   : > { %v3906_v52 = vmax.f32 %v3882_v35, 0.0  ;;  %v3686_v51 = vpop.f32.mrf.mxu0 }
 0x569   : > { %v3809_v2 = vpop.f32.mrf.mxu2  ;;  %v3952_v26 = vld [vmem:[#allocation3 + $0x40] ss:$2 sm:$0xff]  ;;  %v3976_v18 = vld [vmem:[#allocation3 + $0x41] ss:$2 sm:$0xff] }
 0x56a   : > { %3930 = vst [vmem:[#allocation3 + $0x50] sm:$0xff] %v3906_v52  ;;  %v3810_v57 = vadd.f32 %v3809_v2, %v3741_v59  ;;  %v3995_v46 = vmax.f32 %v3952_v26, %v3976_v18  ;;  %v3616_v59 = vadd.f32 %v3615_v16, %v6518_v9 }
 0x56b   : > { %v3748_v37 = vpop.f32.mrf.mxu1 }
 0x56c   : > { %v3856_v58 = vmul.f32 %v6557_v63, %v3810_v57  ;;  %v3749_v41 = vadd.f32 %v3748_v37, %v3680_v31  ;;  %v3685_v55 = vadd.f32 %v3684_v33, %v3616_v59 }
 0x56e   : > { %v3883_v39 = vadd.f32 %v6563_v42, %v3856_v58  ;;  %v3620_v27 = vpop.f32.mrf.mxu3 }
 0x56f   : > { %v3621_v18 = vadd.f32 %v3620_v27, %v6526_v25 }
 0x570   : > { %v3907_v12 = vmax.f32 %v3883_v39, 0.0  ;;  %v3689_v47 = vpop.f32.mrf.mxu0  ;;  %v3618_v39 = vadd.f32 %v3617_v0, %v6521_v11 }
 0x571   : > { %v3812_v32 = vpop.f32.mrf.mxu2 }
 0x572   : > { %3931 = vst [vmem:[#allocation3 + $0x58] sm:$0xff] %v3907_v12  ;;  %v3813_v29 = vadd.f32 %v3812_v32, %v3744_v60  ;;  %v3687_v9 = vadd.f32 %v3686_v51, %v3618_v39 }
 0x573   : > { %v3750_v24 = vpop.f32.mrf.mxu1 }
 0x574   : > { %v3857_v49 = vmul.f32 %v6557_v63, %v3813_v29  ;;  %v3751_v3 = vadd.f32 %v3750_v24, %v3682_v22 }
 0x576   : > { %v3884_v17 = vadd.f32 %v6563_v42, %v3857_v49  ;;  %v3622_v24 = vpop.f32.mrf.mxu3 }
 0x578   : > { %v3908_v62 = vmax.f32 %v3884_v17, 0.0 }
 0x579   : > { %v3954_v6 = vld [vmem:[#allocation3 + $0x50] ss:$2 sm:$0xff]  ;;  %v3978_v54 = vld [vmem:[#allocation3 + $0x51] ss:$2 sm:$0xff]  ;;  %v3814_v45 = vpop.f32.mrf.mxu2 }
 0x57a   : > { %v3996_v4 = vmax.f32 %v3954_v6, %v3978_v54  ;;  %3932 = vst [vmem:[#allocation3 + $0x60] sm:$0xff] %v3908_v62  ;;  %v3815_v8 = vadd.f32 %v3814_v45, %v3746_v43  ;;  %v3691_v6 = vpop.f32.mrf.mxu0 }
 0x57b   : > { %v3753_v19 = vpop.f32.mrf.mxu1 }
 0x57c   : > { %v3858_v61 = vmul.f32 %v6557_v63, %v3815_v8  ;;  %v4008_v23 = vmax.f32 %v3995_v46, %v3996_v4  ;;  %v3754_v57 = vadd.f32 %v3753_v19, %v3685_v55  ;;  %v3690_v46 = vadd.f32 %v3689_v47, %v3621_v18 }
 0x57e   : > { %v3885_v53 = vadd.f32 %v6563_v42, %v3858_v61  ;;  %4714 = vst [vmem:[%s6603_s10 + $0x10] sm:$0xff] %v4008_v23  ;;  %v3623_v23 = vadd.f32 %v3622_v24, %v6529_v44  ;;  %v3625_v33 = vpop.f32.mrf.mxu3 }
 0x580   : > { %v3909_v13 = vmax.f32 %v3885_v53, 0.0  ;;  %v3692_v19 = vadd.f32 %v3691_v6, %v3623_v23 }
 0x581   : > { %v3817_v34 = vpop.f32.mrf.mxu2 }
 0x582   : > { %3933 = vst [vmem:[#allocation3 + $0x68] sm:$0xff] %v3909_v13  ;;  %v3818_v20 = vadd.f32 %v3817_v34, %v3749_v41  ;;  %v3694_v53 = vpop.f32.mrf.mxu0 }
 0x583   : > { %v3755_v48 = vpop.f32.mrf.mxu1 }
 0x584   : > { %v3859_v10 = vmul.f32 %v6557_v63, %v3818_v20  ;;  %v3756_v40 = vadd.f32 %v3755_v48, %v3687_v9 }
 0x586   : > { %v3886_v38 = vadd.f32 %v6563_v42, %v3859_v10  ;;  %v3626_v10 = vadd.f32 %v3625_v33, %v6534_v1  ;;  %v3627_v44 = vpop.f32.mrf.mxu3 }
 0x588   : > { %v3910_v30 = vmax.f32 %v3886_v38, 0.0  ;;  %v3695_v38 = vadd.f32 %v3694_v53, %v3626_v10 }
 0x589   : > { %v3819_v35 = vpop.f32.mrf.mxu2  ;;  %v3956_v5 = vld [vmem:[#allocation3 + $0x60] ss:$2 sm:$0xff]  ;;  %v3980_v29 = vld [vmem:[#allocation3 + $0x61] ss:$2 sm:$0xff] }
 0x58a   : > { %3934 = vst [vmem:[#allocation3 + $0x70] sm:$0xff] %v3910_v30  ;;  %v3820_v52 = vadd.f32 %v3819_v35, %v3751_v3  ;;  %v3997_v11 = vmax.f32 %v3956_v5, %v3980_v29  ;;  %v3696_v3 = vpop.f32.mrf.mxu0 }
 0x58b   : > { %v3758_v12 = vpop.f32.mrf.mxu1 }
 0x58c   : > { %v3860_v2 = vmul.f32 %v6557_v63, %v3820_v52  ;;  %v3759_v8 = vadd.f32 %v3758_v12, %v3690_v46  ;;  %v3628_v52 = vadd.f32 %v3627_v44, %v6537_v50 }
 0x58e   : > { %v3887_v28 = vadd.f32 %v6563_v42, %v3860_v2  ;;  %v3697_v1 = vadd.f32 %v3696_v3, %v3628_v52  ;;  %v3630_v27 = vpop.f32.mrf.mxu3 }
 0x590   : > { %v3911_v58 = vmax.f32 %v3887_v28, 0.0 }
 0x591   : > { %v3822_v37 = vpop.f32.mrf.mxu2 }
 0x592   : > { %3935 = vst [vmem:[#allocation3 + $0x78] sm:$0xff] %v3911_v58  ;;  %v3823_v60 = vadd.f32 %v3822_v37, %v3754_v57  ;;  %v3699_v5 = vpop.f32.mrf.mxu0 }
 0x593   : > { %v3760_v21 = vpop.f32.mrf.mxu1 }
 0x594   : > { %v3861_v56 = vmul.f32 %v6557_v63, %v3823_v60  ;;  %v3761_v34 = vadd.f32 %v3760_v21, %v3692_v19 }
 0x596   : > { %v3888_v32 = vadd.f32 %v6563_v42, %v3861_v56  ;;  %v3631_v56 = vadd.f32 %v3630_v27, %v6541_v7  ;;  %v3632_v18 = vpop.f32.mrf.mxu3 }
 0x598   : > { %v3912_v49 = vmax.f32 %v3888_v32, 0.0  ;;  %v3700_v24 = vadd.f32 %v3699_v5, %v3631_v56 }
 0x599   : > { %v3958_v15 = vld [vmem:[#allocation3 + $0x70] ss:$2 sm:$0xff]  ;;  %v3982_v17 = vld [vmem:[#allocation3 + $0x71] ss:$2 sm:$0xff]  ;;  %v3824_v26 = vpop.f32.mrf.mxu2 }
 0x59a   : > { %v3998_v43 = vmax.f32 %v3958_v15, %v3982_v17  ;;  %3936 = vst [vmem:[#allocation3 + $0x80] sm:$0xff] %v3912_v49  ;;  %v3825_v62 = vadd.f32 %v3824_v26, %v3756_v40  ;;  %v3701_v6 = vpop.f32.mrf.mxu0 }
 0x59b   : > { %v3763_v13 = vpop.f32.mrf.mxu1 }
 0x59c   : > { %v3862_v54 = vmul.f32 %v6557_v63, %v3825_v62  ;;  %v4011_v45 = vmax.f32 %v3997_v11, %v3998_v43  ;;  %v3764_v30 = vadd.f32 %v3763_v13, %v3695_v38  ;;  %v3633_v43 = vadd.f32 %v3632_v18, %v6546_v36 }
 0x59e   : > { %v3889_v4 = vadd.f32 %v6563_v42, %v3862_v54  ;;  %4715 = vst [vmem:[%s6603_s10 + $0x18] sm:$0xff] %v4011_v45  ;;  %v3702_v45 = vadd.f32 %v3701_v6, %v3633_v43 }
 0x5a0   : > { %v3913_v16 = vmax.f32 %v3889_v4, 0.0 }
 0x5a1   : > { %v3827_v61 = vpop.f32.mrf.mxu2 }
 0x5a2   : > { %3937 = vst [vmem:[#allocation3 + $0x88] sm:$0xff] %v3913_v16  ;;  %v3828_v25 = vadd.f32 %v3827_v61, %v3759_v8 }
 0x5a3   : > { %v3765_v48 = vpop.f32.mrf.mxu1 }
 0x5a4   : > { %v3863_v31 = vmul.f32 %v6557_v63, %v3828_v25  ;;  %v3766_v37 = vadd.f32 %v3765_v48, %v3697_v1 }
 0x5a6   : > { %v3890_v41 = vadd.f32 %v6563_v42, %v3863_v31 }
 0x5a8   : > { %v3914_v14 = vmax.f32 %v3890_v41, 0.0 }
 0x5a9   : > { %v3829_v20 = vpop.f32.mrf.mxu2  ;;  %v3960_v57 = vld [vmem:[#allocation3 + $0x80] ss:$2 sm:$0xff]  ;;  %v3984_v58 = vld [vmem:[#allocation3 + $0x81] ss:$2 sm:$0xff] }
 0x5aa   : > { %3938 = vst [vmem:[#allocation3 + $0x90] sm:$0xff] %v3914_v14  ;;  %v3830_v0 = vadd.f32 %v3829_v20, %v3761_v34  ;;  %v3999_v9 = vmax.f32 %v3960_v57, %v3984_v58 }
 0x5ab   : > { %v3768_v29 = vpop.f32.mrf.mxu1 }
 0x5ac   : > { %v3864_v22 = vmul.f32 %v6557_v63, %v3830_v0  ;;  %v3769_v17 = vadd.f32 %v3768_v29, %v3700_v24 }
 0x5ae   : > { %v3891_v51 = vadd.f32 %v6563_v42, %v3864_v22 }
 0x5b0   : > { %v3915_v35 = vmax.f32 %v3891_v51, 0.0 }
 0x5b1   : > { %v3832_v59 = vpop.f32.mrf.mxu2 }
 0x5b2   : > { %3939 = vst [vmem:[#allocation3 + $0x98] sm:$0xff] %v3915_v35  ;;  %v3833_v2 = vadd.f32 %v3832_v59, %v3764_v30 }
 0x5b3   : > { %v3770_v54 = vpop.f32.mrf.mxu1 }
 0x5b4   : > { %v3865_v55 = vmul.f32 %v6557_v63, %v3833_v2  ;;  %v3771_v46 = vadd.f32 %v3770_v54, %v3702_v45 }
 0x5b6   : > { %v3892_v28 = vadd.f32 %v6563_v42, %v3865_v55 }
 0x5b8   : > { %v3916_v47 = vmax.f32 %v3892_v28, 0.0 }
 0x5b9   : > { %v3962_v39 = vld [vmem:[#allocation3 + $0x90] ss:$2 sm:$0xff]  ;;  %v3986_v60 = vld [vmem:[#allocation3 + $0x91] ss:$2 sm:$0xff]  ;;  %v3834_v12 = vpop.f32.mrf.mxu2 }
 0x5ba   : > { %v4000_v50 = vmax.f32 %v3962_v39, %v3986_v60  ;;  %3940 = vst [vmem:[#allocation3 + $0xa0] sm:$0xff] %v3916_v47  ;;  %v3835_v32 = vadd.f32 %v3834_v12, %v3766_v37 }
 0x5bc   : > { %v3866_v40 = vmul.f32 %v6557_v63, %v3835_v32  ;;  %v4014_v49 = vmax.f32 %v3999_v9, %v4000_v50 }
 0x5be   : > { %v3893_v15 = vadd.f32 %v6563_v42, %v3866_v40  ;;  %4716 = vst [vmem:[%s6603_s10 + $0x20] sm:$0xff] %v4014_v49 }
 0x5c0   : > { %v3917_v26 = vmax.f32 %v3893_v15, 0.0 }
 0x5c1   : > { %v3837_v11 = vpop.f32.mrf.mxu2 }
 0x5c2   : > { %3941 = vst [vmem:[#allocation3 + $0xa8] sm:$0xff] %v3917_v26  ;;  %v3838_v7 = vadd.f32 %v3837_v11, %v3769_v17 }
 0x5c4   : > { %v3867_v62 = vmul.f32 %v6557_v63, %v3838_v7 }
 0x5c6   : > { %v3894_v21 = vadd.f32 %v6563_v42, %v3867_v62 }
 0x5c8   : > { %v3918_v4 = vmax.f32 %v3894_v21, 0.0 }
 0x5c9   : > { %v3839_v8 = vpop.f32.mrf.mxu2  ;;  %v3964_v25 = vld [vmem:[#allocation3 + $0xa0] ss:$2 sm:$0xff]  ;;  %v3988_v33 = vld [vmem:[#allocation3 + $0xa1] ss:$2 sm:$0xff] }
 0x5ca   : > { %3942 = vst [vmem:[#allocation3 + $0xb0] sm:$0xff] %v3918_v4  ;;  %v3840_v16 = vadd.f32 %v3839_v8, %v3771_v46  ;;  %v4001_v19 = vmax.f32 %v3964_v25, %v3988_v33 }
 0x5cc   : > { %v3868_v61 = vmul.f32 %v6557_v63, %v3840_v16 }
 0x5ce   : > { %v3895_v36 = vadd.f32 %v6563_v42, %v3868_v61 }
 0x5d0   : > { %v3919_v23 = vmax.f32 %v3895_v36, 0.0 }
 0x5d2   : > { %3943 = vst [vmem:[#allocation3 + $0xb8] sm:$0xff] %v3919_v23 }
 0x5d9   : > { %v3966_v31 = vld [vmem:[#allocation3 + $0xb0] ss:$2 sm:$0xff]  ;;  %v3990_v53 = vld [vmem:[#allocation3 + $0xb1] ss:$2 sm:$0xff] }
 0x5da   : > { %v4002_v63 = vmax.f32 %v3966_v31, %v3990_v53 }
 0x5dc   : > { %v4017_v42 = vmax.f32 %v4001_v19, %v4002_v63 }
 0x5de   : > { %4717 = vst [vmem:[%s6603_s10 + $0x28] sm:$0xff] %v4017_v42 }
 0x5df   : > { %5083 = shalt.err (!%p5080_p10)
}
 0x5e0   : > { %s5135_s4 = smov 128   ;;  %s5136_s11 = smov 8  }
 0x5e1   : > { %4896 = dma.vmem_to_hbm [thread:$0]  (%p5243_p3), %s4034_s15, 768, %s4036_s19, %s4021_s20, %s5135_s4, %s5135_s4, %s5136_s11  }
 0x5e2 PF: > { %s4050_s13 = sand.u32 1, %s5114_s24   ;;  %p6889_p12 = scmp.ge.s32.totalorder %s5126_s27, 2 }
 0x5e3   : > { %s4051_s10 = scalar_lea.sflag [#allocation6], %s4050_s13 }
 0x5e4   : > { %p4910_p13 = pnand %p6889_p12, %p5212_p6 }
 0x5e6   : > { %p4911_p0 = pneg %p4910_p13 }
 0x5e8   : > { %5109 = dma.done.wait (%p4911_p0), %s4051_s10, 768  }
 0x5e9   : > { %5111 = vsyncadd (%p4911_p0), %s4051_s10, 4294966528  ;;  %s6890_s18 = sld [smem:[#allocation14_spill]]  ;;  %p21_p5 = scmp.ge.s32.totalorder %s5233_s22, 4  }
 0x5ea   : > { %s6891_s24 = smov %s5118_s25  ;;  %s6892_s25 = smov %s5122_s26 }
 0x5eb   : > { %s6894_s27 = smov %s5233_s22  ;;  %23 = sbr.rel (!%p21_p5) target bundleno = 9 (0x9), region = 129 }
 0x5ef   : > { %s6893_s26 = smov %s6890_s18 }
 0x5f0   :  { %4057 = vsyncpa [#allocation5], 1 }
 0x5f1   :  { %4059 = vsyncpa [#allocation5 + $0x1], 1 }
 0x5f2   :  { %4060 = vsyncpa [#allocation8], 1 }
 0x5f3   :  { %4061 = vsyncpa [#allocation6], 1 }
 0x5f4   :  { %4063 = vsyncpa [#allocation6 + $0x1], 1 }

</bundles_post_ra>
